<compile_context>
chip_gen: v7x
topology: tpu7x:2x2x1
jax: 0.10.0
libtpu: 0.0.40
codegen_flags: <defaults>
</compile_context>

<pallas_src>
import jax
import jax.numpy as jnp
import numpy as np
from jax.experimental import pallas as pl
from jax.experimental.pallas import tpu as pltpu

D_IN = 22050                      # fixed by nn.Linear(22050, 512)
HID = 512                         # hidden width of linear1
NC = 2                            # hidden-dim splits (-> 2 TensorCores on v7x)
HID_C = HID // NC                 # 256 hidden units per split
TK = 8192                         # K tile for linear1 (multiple of 128)
D_PAD = pl.cdiv(D_IN, TK) * TK    # 24576 -> 3 K steps
NK = D_PAD // TK


def _linear1_kernel(x_ref, w1_ref, b1_ref, w23_ref, pre_ref, acc_ref):
    """Grid (NC, NK): c = hidden-half ("parallel"), k = contraction ("arbitrary").

    Computes pre_part[c] = relu(x @ W1[:, c-half] + b1[c-half]) @ [W2|W3][c-half].
    """
    k = pl.program_id(1)

    @pl.when(k == 0)
    def _():
        acc_ref[...] = jnp.zeros_like(acc_ref)

    # x is resident in VMEM; slice this K tile (lane-aligned, hinted).
    off = pl.multiple_of(k * TK, TK)
    acc_ref[...] += jnp.dot(x_ref[:, pl.ds(off, TK)], w1_ref[...],
                            preferred_element_type=jnp.float32)

    @pl.when(k == pl.num_programs(1) - 1)
    def _():
        h = jnp.maximum(acc_ref[...] + b1_ref[...], 0.0)        # ReLU(linear1) half
        # Partial fused linear2|linear3: (B, HID_C) @ (HID_C, 2L).
        pre_ref[...] = jnp.dot(h, w23_ref[...],
                               preferred_element_type=jnp.float32)


def _epilogue_kernel(pre_ref, b23_ref, eps_ref, z_ref, kl_ref):
    """Grid-less epilogue: combine hidden-half partials, reparameterize, KL."""
    L = eps_ref.shape[1]
    pre = pre_ref[...].sum(axis=0) + b23_ref[...]               # (B, 2L)
    mu = pre[:, :L]
    log_sigma = pre[:, L:]
    sigma = jnp.exp(log_sigma)
    z_ref[...] = (mu + sigma * eps_ref[...]).astype(z_ref.dtype)
    # KL reuses log_sigma directly instead of log(exp(log_sigma)).
    kl_ref[...] = jnp.sum(sigma * sigma + mu * mu - log_sigma - 0.5).reshape(1, 1)


def prepare_params(params):
    """One-time prep: pad W1 to the K grid, cast to bf16, split HID, fuse W2|W3."""
    w1, b1, w2, b2, w3, b3 = params
    w1_p = jnp.pad(w1, ((0, D_PAD - D_IN), (0, 0))).astype(jnp.bfloat16)
    # Contiguous hidden-halves -> each grid-c block is one contiguous DMA.
    w1_s = w1_p.reshape(D_PAD, NC, HID_C).transpose(1, 0, 2)          # (NC, D_PAD, HID_C)
    b1_s = b1.astype(jnp.float32).reshape(NC, 1, HID_C)               # (NC, 1, HID_C)
    w23 = jnp.concatenate([w2, w3], axis=1).astype(jnp.float32)       # (HID, 2L)
    w23_s = w23.reshape(NC, HID_C, w23.shape[1])                      # (NC, HID_C, 2L)
    b23 = jnp.concatenate([b2, b3], axis=0).reshape(1, -1).astype(jnp.float32)
    return (w1_s, b1_s, w23_s, b23)


def variational_encoder_forward(x, prepared, eps):
    """x: (B, D_IN) f32; eps: (B, L) standard-normal sample; returns (z, kl).

    Throughput note: kernel time is ~flat in B (weight-load / HBM bound), so
    batching more rows per call (B up to ~128-256) is nearly free.
    """
    w1_s, b1_s, w23_s, b23 = prepared
    B = x.shape[0]
    L = eps.shape[1]
    L2 = 2 * L

    # bf16 stream for the big matmul; heavy W1 pad/cast was hoisted to prep.
    x_p = jnp.pad(x.astype(jnp.bfloat16), ((0, 0), (0, D_PAD - x.shape[1])))

    cost = pl.CostEstimate(
        flops=2 * B * D_IN * HID + 2 * B * HID * L2,
        transcendentals=0,
        bytes_accessed=(w1_s.size * 2 + x_p.size * 2 + b1_s.size * 4
                        + w23_s.size * 4 + NC * B * L2 * 4))

    pre_part = pl.pallas_call(
        _linear1_kernel,
        out_shape=jax.ShapeDtypeStruct((NC, B, L2), jnp.float32),
        grid_spec=pltpu.PrefetchScalarGridSpec(
            num_scalar_prefetch=0,
            grid=(NC, NK),                                   # reduction axis last
            in_specs=[
                pl.BlockSpec((B, D_PAD), lambda c, k: (0, 0)),          # x resident
                pl.BlockSpec((None, TK, HID_C), lambda c, k: (c, k, 0)),  # W1 half tile
                pl.BlockSpec((None, 1, HID_C), lambda c, k: (c, 0, 0)),   # b1 half
                pl.BlockSpec((None, HID_C, L2), lambda c, k: (c, 0, 0)),  # [W2|W3] half
            ],
            out_specs=pl.BlockSpec((None, B, L2), lambda c, k: (c, 0, 0)),
            scratch_shapes=[pltpu.VMEM((B, HID_C), jnp.float32)],
        ),
        compiler_params=pltpu.CompilerParams(
            dimension_semantics=("parallel", "arbitrary"),
            vmem_limit_bytes=32 * 1024 * 1024),
        cost_estimate=cost,
    )(x_p, w1_s, b1_s, w23_s)

    # Tiny grid-less Pallas epilogue (combine halves + reparameterize + KL).
    z, kl = pl.pallas_call(
        _epilogue_kernel,
        out_shape=(jax.ShapeDtypeStruct((B, L), jnp.float32),
                   jax.ShapeDtypeStruct((1, 1), jnp.float32)),
    )(pre_part, b23, eps)
    return z, kl[0, 0]


def init_params(key, latent_dims):
    """Deterministic init mimicking PyTorch Linear default (U[-1/sqrt(fan_in), ...])."""
    ks = jax.random.split(key, 6)

    def lin(kw, kb, fan_in, fan_out):
        bound = 1.0 / np.sqrt(fan_in)
        w = jax.random.uniform(kw, (fan_in, fan_out), jnp.float32, -bound, bound)
        b = jax.random.uniform(kb, (fan_out,), jnp.float32, -bound, bound)
        return w, b

    w1, b1 = lin(ks[0], ks[1], D_IN, HID)
    w2, b2 = lin(ks[2], ks[3], HID, latent_dims)
    w3, b3 = lin(ks[4], ks[5], HID, latent_dims)
    return (w1, b1, w2, b2, w3, b3)


def reference_forward_f32(x, params, eps):
    """Pure-f32 reference (matches the PyTorch module semantics)."""
    w1, b1, w2, b2, w3, b3 = params
    h = jax.nn.relu(x @ w1 + b1)
    mu = h @ w2 + b2
    sigma = jnp.exp(h @ w3 + b3)
    z = mu + sigma * eps
    kl = jnp.sum(sigma ** 2 + mu ** 2 - jnp.log(sigma) - 0.5)
    return z, kl


def reference_forward_bf16(x, params, eps):
    """Reference with the same bf16 streaming of x/W1 (f32 accumulate)."""
    w1, b1, w2, b2, w3, b3 = params
    h = jax.nn.relu(jnp.dot(x.astype(jnp.bfloat16), w1.astype(jnp.bfloat16),
                            preferred_element_type=jnp.float32) + b1)
    pre2 = jnp.dot(h, w2, preferred_element_type=jnp.float32) + b2
    pre3 = jnp.dot(h, w3, preferred_element_type=jnp.float32) + b3
    mu = pre2
    sigma = jnp.exp(pre3)
    z = mu + sigma * eps
    kl = jnp.sum(sigma ** 2 + mu ** 2 - pre3 - 0.5)
    return z, kl


if __name__ == "__main__":
    latent_dims = 32
    B = 2

    key = jax.random.PRNGKey(0)
    k_x, k_p, k_eps = jax.random.split(key, 3)

    # Input as the module would see it pre-flatten (e.g. (B, 1, 22050) audio).
    x_raw = jax.random.normal(k_x, (B, 1, D_IN), jnp.float32)
    x = x_raw.reshape(B, -1)                      # torch.flatten(x, start_dim=1)

    params = init_params(k_p, latent_dims)
    prepared = jax.block_until_ready(prepare_params(params))   # one-time prep
    # TODO(synk): torch.distributions.Normal sampling stays outside the kernel.
    eps = jax.random.normal(k_eps, (B, latent_dims), jnp.float32)

    z, kl = jax.jit(variational_encoder_forward)(x, prepared, eps)
    z = jax.block_until_ready(z)
    kl = jax.block_until_ready(kl)

    # Tight check vs a reference using the same bf16 streaming.
    z_bref, kl_bref = reference_forward_bf16(x, params, eps)
    assert np.allclose(np.asarray(z), np.asarray(z_bref), rtol=2e-3, atol=2e-3)
    assert abs(float(kl) - float(kl_bref)) <= 2e-3 * abs(float(kl_bref)) + 1e-3

    # Loose fidelity check vs the pure-f32 module semantics.
    z_ref, kl_ref = reference_forward_f32(x, params, eps)
    assert np.allclose(np.asarray(z), np.asarray(z_ref), rtol=5e-2, atol=5e-2)
    assert abs(float(kl) - float(kl_ref)) <= 5e-2 * abs(float(kl_ref))

    print("KERNEL_OK")
</pallas_src>

<mosaic_0001>
module attributes {stable_mosaic.version = 11 : i64} {
  func.func @_linear1_kernel(%arg0: i32, %arg1: i32, %arg2: memref<2x24576xbf16, #tpu.memory_space<vmem>>, %arg3: memref<1x8192x256xbf16, #tpu.memory_space<vmem>>, %arg4: memref<1x1x256xf32, #tpu.memory_space<vmem>>, %arg5: memref<1x256x64xf32, #tpu.memory_space<vmem>>, %arg6: memref<1x2x64xf32, #tpu.memory_space<vmem>>, %arg7: memref<2x256xf32, #tpu.memory_space<vmem>>) attributes {dimension_semantics = [#tpu.dimension_semantics<parallel>, #tpu.dimension_semantics<arbitrary>], iteration_bounds = array<i64: 2, 3>, scalar_prefetch = 0 : i64, scratch_operands = 1 : i64, tpu.core_type = #tpu.core_type<tc>, window_params = [{pipeline_mode = #tpu.pipeline_mode<synchronous>, transform_indices = @transform_0, window_bounds = array<i64: 2, 24576>}, {transform_indices = @transform_1, window_bounds = array<i64: 1, 8192, 256>}, {transform_indices = @transform_2, window_bounds = array<i64: 1, 1, 256>}, {transform_indices = @transform_3, window_bounds = array<i64: 1, 256, 64>}, {transform_indices = @transform_4, window_bounds = array<i64: 1, 2, 64>}]} {
    %c0_i32 = arith.constant 0 : i32
    %0 = arith.cmpi eq, %arg1, %c0_i32 : i32
    %1 = arith.extui %0 : i1 to i32
    %c0_i32_0 = arith.constant 0 : i32
    %2 = arith.cmpi ne, %1, %c0_i32_0 : i32
    scf.if %2 {
      %cst_9 = arith.constant 0.000000e+00 : f32
      %16 = vector.broadcast %cst_9 : f32 to vector<2x256xf32>
      %c0_10 = arith.constant 0 : index
      %c0_11 = arith.constant 0 : index
      %17 = vector.load %arg7[%c0_10, %c0_11] : memref<2x256xf32, #tpu.memory_space<vmem>>, vector<2x256xf32>
      tpu.vector_store %arg7[%c0_10, %c0_11], %16 {strides = array<i32>} : memref<2x256xf32, #tpu.memory_space<vmem>>, vector<2x256xf32>,
    } else {
    }
    %c8192_i32 = arith.constant 8192 : i32
    %3 = arith.muli %arg1, %c8192_i32 : i32
    %4 = tpu.assume_multiple %3, 8192 : i32
    %c0 = arith.constant 0 : index
    %c0_1 = arith.constant 0 : index
    %5 = vector.load %arg7[%c0, %c0_1] : memref<2x256xf32, #tpu.memory_space<vmem>>, vector<2x256xf32>
    %c0_2 = arith.constant 0 : index
    %6 = arith.index_cast %4 : i32 to index
    %7 = vector.load %arg2[%c0_2, %6] : memref<2x24576xbf16, #tpu.memory_space<vmem>>, vector<2x8192xbf16>
    %c0_3 = arith.constant 0 : index
    %c0_4 = arith.constant 0 : index
    %c0_5 = arith.constant 0 : index
    %8 = vector.load %arg3[%c0_3, %c0_4, %c0_5] : memref<1x8192x256xbf16, #tpu.memory_space<vmem>>, vector<1x8192x256xbf16>
    %9 = vector.shape_cast %8 : vector<1x8192x256xbf16> to vector<8192x256xbf16>
    %cst = arith.constant dense<0.000000e+00> : vector<2x256xf32>
    %10 = tpu.matmul %7, %9, %cst {dimension_numbers = #tpu.dot_dimension_numbers<[1], [0], [0], [1], [0, 0, 1, 1], [], []>} : vector<2x8192xbf16>, vector<8192x256xbf16>, vector<2x256xf32> -> vector<2x256xf32>
    %11 = arith.addf %5, %10 : vector<2x256xf32>
    %c0_6 = arith.constant 0 : index
    %c0_7 = arith.constant 0 : index
    %12 = vector.load %arg7[%c0_6, %c0_7] : memref<2x256xf32, #tpu.memory_space<vmem>>, vector<2x256xf32>
    tpu.vector_store %arg7[%c0_6, %c0_7], %11 {strides = array<i32>} : memref<2x256xf32, #tpu.memory_space<vmem>>, vector<2x256xf32>,
    %c2_i32 = arith.constant 2 : i32
    %13 = arith.cmpi eq, %arg1, %c2_i32 : i32
    %14 = arith.extui %13 : i1 to i32
    %c0_i32_8 = arith.constant 0 : i32
    %15 = arith.cmpi ne, %14, %c0_i32_8 : i32
    scf.if %15 {
      %c0_9 = arith.constant 0 : index
      %c0_10 = arith.constant 0 : index
      %16 = vector.load %arg7[%c0_9, %c0_10] : memref<2x256xf32, #tpu.memory_space<vmem>>, vector<2x256xf32>
      %c0_11 = arith.constant 0 : index
      %c0_12 = arith.constant 0 : index
      %c0_13 = arith.constant 0 : index
      %17 = vector.load %arg4[%c0_11, %c0_12, %c0_13] : memref<1x1x256xf32, #tpu.memory_space<vmem>>, vector<1x1x256xf32>
      %18 = vector.shape_cast %17 : vector<1x1x256xf32> to vector<1x256xf32>
      %19 = vector.broadcast %18 : vector<1x256xf32> to vector<2x256xf32>
      %20 = arith.addf %16, %19 : vector<2x256xf32>
      %cst_14 = arith.constant 0.000000e+00 : f32
      %21 = vector.broadcast %cst_14 : f32 to vector<2x256xf32>
      %22 = arith.maximumf %20, %21 : vector<2x256xf32>
      %c0_15 = arith.constant 0 : index
      %c0_16 = arith.constant 0 : index
      %c0_17 = arith.constant 0 : index
      %23 = vector.load %arg5[%c0_15, %c0_16, %c0_17] : memref<1x256x64xf32, #tpu.memory_space<vmem>>, vector<1x256x64xf32>
      %24 = vector.shape_cast %23 : vector<1x256x64xf32> to vector<256x64xf32>
      %cst_18 = arith.constant dense<0.000000e+00> : vector<2x64xf32>
      %25 = tpu.matmul %22, %24, %cst_18 {dimension_numbers = #tpu.dot_dimension_numbers<[1], [0], [0], [1], [0, 0, 1, 1], [], []>} : vector<2x256xf32>, vector<256x64xf32>, vector<2x64xf32> -> vector<2x64xf32>
      %c0_19 = arith.constant 0 : index
      %c0_20 = arith.constant 0 : index
      %c0_21 = arith.constant 0 : index
      %26 = vector.load %arg6[%c0_19, %c0_20, %c0_21] : memref<1x2x64xf32, #tpu.memory_space<vmem>>, vector<1x2x64xf32>
      %27 = vector.shape_cast %26 : vector<1x2x64xf32> to vector<2x64xf32>
      %28 = vector.shape_cast %25 : vector<2x64xf32> to vector<1x2x64xf32>
      tpu.vector_store %arg6[%c0_19, %c0_20, %c0_21], %28 {strides = array<i32>} : memref<1x2x64xf32, #tpu.memory_space<vmem>>, vector<1x2x64xf32>,
    } else {
    }
    return
  }
  func.func @transform_0(%arg0: i32, %arg1: i32) -> (i32, i32) {
    %c0_i32 = arith.constant 0 : i32
    %c0_i32_0 = arith.constant 0 : i32
    %c0_i32_1 = arith.constant 0 : i32
    return %c0_i32, %c0_i32_0 : i32, i32
  }
  func.func @transform_1(%arg0: i32, %arg1: i32) -> (i32, i32, i32) {
    %c0_i32 = arith.constant 0 : i32
    %c0_i32_0 = arith.constant 0 : i32
    return %arg0, %arg1, %c0_i32 : i32, i32, i32
  }
  func.func @transform_2(%arg0: i32, %arg1: i32) -> (i32, i32, i32) {
    %c0_i32 = arith.constant 0 : i32
    %c0_i32_0 = arith.constant 0 : i32
    %c0_i32_1 = arith.constant 0 : i32
    return %arg0, %c0_i32, %c0_i32_0 : i32, i32, i32
  }
  func.func @transform_3(%arg0: i32, %arg1: i32) -> (i32, i32, i32) {
    %c0_i32 = arith.constant 0 : i32
    %c0_i32_0 = arith.constant 0 : i32
    %c0_i32_1 = arith.constant 0 : i32
    return %arg0, %c0_i32, %c0_i32_0 : i32, i32, i32
  }
  func.func @transform_4(%arg0: i32, %arg1: i32) -> (i32, i32, i32) {
    %c0_i32 = arith.constant 0 : i32
    %c0_i32_0 = arith.constant 0 : i32
    %c0_i32_1 = arith.constant 0 : i32
    return %arg0, %c0_i32, %c0_i32_0 : i32, i32, i32
  }
}

module attributes {stable_mosaic.version = 11 : i64} {
  func.func @_epilogue_kernel(%arg0: memref<2x2x64xf32, #tpu.memory_space<vmem>>, %arg1: memref<1x64xf32, #tpu.memory_space<vmem>>, %arg2: memref<2x32xf32, #tpu.memory_space<vmem>>, %arg3: memref<2x32xf32, #tpu.memory_space<vmem>>, %arg4: memref<1x1xf32, #tpu.memory_space<vmem>>) attributes {dimension_semantics = [], scalar_prefetch = 0 : i64, scratch_operands = 0 : i64, tpu.core_type = #tpu.core_type<tc>} {
    %c0 = arith.constant 0 : index
    %c0_0 = arith.constant 0 : index
    %c0_1 = arith.constant 0 : index
    %0 = vector.load %arg0[%c0, %c0_0, %c0_1] : memref<2x2x64xf32, #tpu.memory_space<vmem>>, vector<2x2x64xf32>
    %cst = arith.constant dense<0.000000e+00> : vector<2x64xf32>
    %1 = vector.multi_reduction <add>, %0, %cst [0] : vector<2x2x64xf32> to vector<2x64xf32>
    %c0_2 = arith.constant 0 : index
    %c0_3 = arith.constant 0 : index
    %2 = vector.load %arg1[%c0_2, %c0_3] : memref<1x64xf32, #tpu.memory_space<vmem>>, vector<1x64xf32>
    %3 = vector.broadcast %2 : vector<1x64xf32> to vector<2x64xf32>
    %4 = arith.addf %1, %3 : vector<2x64xf32>
    %5 = vector.extract_strided_slice %4 {offsets = [0, 0], sizes = [2, 32], strides = [1, 1]} : vector<2x64xf32> to vector<2x32xf32>
    %6 = vector.extract_strided_slice %4 {offsets = [0, 32], sizes = [2, 32], strides = [1, 1]} : vector<2x64xf32> to vector<2x32xf32>
    %7 = math.exp %6 : vector<2x32xf32>
    %c0_4 = arith.constant 0 : index
    %c0_5 = arith.constant 0 : index
    %8 = vector.load %arg2[%c0_4, %c0_5] : memref<2x32xf32, #tpu.memory_space<vmem>>, vector<2x32xf32>
    %9 = arith.mulf %7, %8 : vector<2x32xf32>
    %10 = arith.addf %5, %9 : vector<2x32xf32>
    %c0_6 = arith.constant 0 : index
    %c0_7 = arith.constant 0 : index
    %11 = vector.load %arg3[%c0_6, %c0_7] : memref<2x32xf32, #tpu.memory_space<vmem>>, vector<2x32xf32>
    tpu.vector_store %arg3[%c0_6, %c0_7], %10 {strides = array<i32>} : memref<2x32xf32, #tpu.memory_space<vmem>>, vector<2x32xf32>,
    %12 = arith.mulf %7, %7 : vector<2x32xf32>
    %13 = arith.mulf %5, %5 : vector<2x32xf32>
    %14 = arith.addf %12, %13 : vector<2x32xf32>
    %15 = arith.subf %14, %6 : vector<2x32xf32>
    %cst_8 = arith.constant 5.000000e-01 : f32
    %16 = vector.broadcast %cst_8 : f32 to vector<2x32xf32>
    %17 = arith.subf %15, %16 : vector<2x32xf32>
    %18 = vector.shape_cast %17 : vector<2x32xf32> to vector<1x2x32xf32>
    %cst_9 = arith.constant dense<0.000000e+00> : vector<1xf32>
    %19 = vector.multi_reduction <add>, %18, %cst_9 [1, 2] : vector<1x2x32xf32> to vector<1xf32>
    %20 = vector.shape_cast %19 : vector<1xf32> to vector<1x1x1xf32>
    %21 = vector.extract %20[0, 0, 0] : f32 from vector<1x1x1xf32>
    %22 = vector.broadcast %21 : f32 to vector<1x1xf32>
    %c0_10 = arith.constant 0 : index
    %c0_11 = arith.constant 0 : index
    %23 = vector.load %arg4[%c0_10, %c0_11] : memref<1x1xf32, #tpu.memory_space<vmem>>, vector<1x1xf32>
    tpu.vector_store %arg4[%c0_10, %c0_11], %22 {strides = array<i32>} : memref<1x1xf32, #tpu.memory_space<vmem>>, vector<1x1xf32>,
    return
  }
}

</mosaic_0001>

<bundles_post_ra>
// kernel: variational_encoder_forward.3
= control target key start
LH: loop header
LB: loop body
LE: loop exit
PB: predicated region body
PF: predicated region fallthrough
CT: control target
= control target key end

     0   :  { %10 = vsyncpa [#allocation3], 0  ;;  %vm20_vm0 = vcmask 517120   ;;  %s226_s0 = inlined_call_operand.vmem [shape: f32[2,2,64], index: 0, kind: input, shape index: {}]   ;;  %s227_s1 = inlined_call_operand.vmem [shape: f32[1,64], index: 1, kind: input, shape index: {}]   ;;  %s228_s2 = inlined_call_operand.vmem [shape: f32[2,32], index: 2, kind: input, shape index: {}]   ;;  %s229_s3 = inlined_call_operand.hbm [shape: f32[2,32], index: 3, kind: output, shape index: {0}]   ;;  %s230_s4 = inlined_call_operand.hbm [shape: f32[1,1], index: 4, kind: output, shape index: {1}]  }
   0x1   :  { %v18_v0 = vld [vmem:[%s226_s0] sm:$0x3]  ;;  %v19_v1 = vld [vmem:[%s226_s0 + $0x2] sm:$0x3] }
   0x2   :  { %v21_v2 = vsel %vm20_vm0, %v18_v0, 0.0  ;;  %v22_v3 = vsel %vm20_vm0, %v19_v1, 0.0  ;;  %v101_v4 = vld [vmem:[%s227_s1] ss:$0 sm:$0xff] }
   0x3   :  { %v23_v5 = vadd.f32 %v22_v3, %v21_v2 }
   0x4   :  { %11 = vsyncpa [#allocation5], 0  ;;  %s159_s21 = smov 32   ;;  %s160_s0 = smov 96   ;;  %vm45_vm1 = vcmask 254976   ;;  %vm71_vm2 = vcmask 0  }
   0x5   :  { %v31_v6 = vadd.f32 %v101_v4, %v23_v5  ;;  %v34_v17 = vld [vmem:[%s228_s2] sm:$0x3]  ;;  %s161_s23 = smov [#allocation4]  }
   0x6   :  { %s89_s24 = sshll.u32 %s161_s23, 4  ;;  %s90_s24 = int_to_ptr.vmem [resolvable:$true] %s89_s24 }
   0x7   :  { %v48_v7 = vmul.f32 %v31_v6, %v31_v6  ;;  %v32_v8 = vmul.f32 1.442695, %v31_v6  ;;  %s111_s2 = scalar_lea.vmem %s90_s24, 16  ;;  %s115_s26 = scalar_lea.vmem %s90_s24, 32 }
   0x8   :  { %p112_p0 = scmp.ne.s32.totalorder %s90_s24, %s111_s2  ;;  %p116_p1 = scmp.lt.s32.totalorder %s90_s24, %s90_s24 }
   0x9   :  { %50 = vrot.lane.b32.xlu0 %v48_v7, %s159_s21  ;;  %109 = vpow2.f32 %v32_v8  ;;  %p117_p2 = scmp.lt.s32.totalorder %s115_s26, %s111_s2 }
   0xb   :  { %p118_p3 = por %p117_p2, %p116_p1 }
   0xd   :  { %p119_p4 = pnand %p118_p3, %p112_p0 }
  0x13   :  { %v110_v9 = vpop.eup %109 }
  0x14   :  { %v47_v10 = vmul.f32 %v110_v9, %v110_v9 }
  0x7b   :  { %v51_v11 = vpop.permute.xlu0 %50 }
  0x7c   :  { %v53_v12 = vadd.f32 %v51_v11, %v47_v10 }
  0x7e   :  { %v54_v13 = vsub.f32 %v53_v12, %v31_v6 }
  0x80   :  { %v102_v14 = vadd.f32 -0.5, %v54_v13 }
  0x82   :  { %57 = vrot.lane.b32.xlu0 %v102_v14, %s160_s0 }
  0xf4   :  { %v58_v15 = vpop.permute.xlu0 %57 }
  0xf5   :  { %v60_v16 = vsel %vm45_vm1, %v58_v15, 0.0 }
  0xf6   :  { %61 = vadd.xlane.f32.xlu1 %v60_v16 }
 0x107   :  { %36 = vrot.lane.b32.xlu1 %v34_v17, %s159_s21 }
 0x183   :  { %v62_v18 = vpop.xlane.xlu1 %61 }
 0x184   :  { %v63_v19 = vrot.slane %v62_v18, 4 }
 0x186   :  { %v64_v20 = vadd.f32 %v63_v19, %v62_v18 }
 0x187   :  { %v37_v21 = vpop.permute.xlu1 %36 }
 0x188   :  { %v65_v22 = vrot.slane %v64_v20, 2  ;;  %v39_v23 = vmul.f32 %v110_v9, %v37_v21 }
 0x18a   :  { %41 = vrot.lane.b32.xlu0 %v39_v23, %s160_s0  ;;  %v66_v24 = vadd.f32 %v65_v22, %v64_v20 }
 0x18c   :  { %v67_v25 = vrot.slane %v66_v24, 1 }
 0x18e   :  { %v68_v26 = vadd.f32 %v67_v25, %v66_v24 }
 0x190   :  { %103 = vpush %v68_v26 }
 0x1c1   :  { %s104_s25 = spop %103 }
 0x1c2   :  { %v70_v27 = vstv %s104_s25 }
 0x1c3   :  { %72 = vst.msk [vmem:[#allocation4] sm:$0x1] %vm71_vm2, %v70_v27 }
 0x1c4   :  { %122 = shalt.err (!%p119_p4)
}
 0x1c5   :  { %s123_s29 = scalar_lea.hbm %s230_s4, 16 }
 0x1c6   :  { %p124_p5 = scmp.ne.s32.totalorder %s230_s4, %s123_s29  ;;  %p127_p6 = scmp.lt.u32.totalorder %s123_s29, %s230_s4 }
 0x1c8   :  { %p129_p7 = pnand %p127_p6, %p124_p5 }
 0x1ca   :  { %132 = shalt.err (!%p129_p7)
}
 0x1cb   :  { %92 = dma.vmem_to_hbm [thread:$0]  %s90_s24, 16, %s230_s4, [#allocation5]  }
 0x1cc   :  { %s162_s10 = smov [#allocation2]  }
 0x1cd   :  { %s79_s11 = sshll.u32 %s162_s10, 4  ;;  %s80_s11 = int_to_ptr.vmem [resolvable:$true] %s79_s11 }
 0x1ce   :  { %s133_s12 = scalar_lea.vmem %s80_s11, 32  ;;  %p138_p9 = scmp.lt.s32.totalorder %s80_s11, %s80_s11 }
 0x1cf   :  { %p134_p8 = scmp.ne.s32.totalorder %s80_s11, %s133_s12  ;;  %p139_p10 = scmp.lt.s32.totalorder %s133_s12, %s133_s12 }
 0x1d1   :  { %p140_p11 = por %p139_p10, %p138_p9 }
 0x1d3   :  { %p141_p12 = pnand %p140_p11, %p134_p8 }
 0x1fc   :  { %v42_v28 = vpop.permute.xlu0 %41 }
 0x1fd   :  { %v44_v29 = vadd.f32 %v42_v28, %v31_v6 }
 0x1ff   :  { %46 = vst.msk [vmem:[#allocation2] sm:$0x3] %vm45_vm1, %v44_v29 }
 0x200   :  { %144 = shalt.err (!%p141_p12)
}
 0x201   :  { %s145_s15 = scalar_lea.hbm %s229_s3, 32 }
 0x202   :  { %p146_p13 = scmp.ne.s32.totalorder %s229_s3, %s145_s15  ;;  %p149_p0 = scmp.lt.u32.totalorder %s145_s15, %s229_s3 }
 0x204   :  { %p151_p1 = pnand %p149_p0, %p146_p13 }
 0x206   :  { %154 = shalt.err (!%p151_p1)
}
 0x207   :  { %82 = dma.vmem_to_hbm [thread:$0]  %s80_s11, 32, %s229_s3, [#allocation3]  }
 0x208   :  { %155 = dma.done.wait [#allocation3], 32  }
 0x209   :  { %156 = vsyncadd [#allocation3], 4294967264 }
 0x20a   :  { %157 = dma.done.wait [#allocation5], 16  }
 0x20b   :  { %158 = vsyncadd [#allocation5], 4294967280 }
 0x20c   :  { %99 = vsyncpa [#allocation3], 1 }
 0x20d   :  { %100 = vsyncpa [#allocation5], 1 }

// kernel: variational_encoder_forward.2
= control target key start
LH: loop header
LB: loop body
LE: loop exit
PB: predicated region body
PF: predicated region fallthrough
CT: control target
= control target key end

     0   :  { %s13227_s0 = inlined_call_operand.vmem [shape: bf16[2,24576], index: 0, kind: input, shape index: {}]   ;;  %s13228_s1 = inlined_call_operand.hbm [shape: bf16[2,24576,256], index: 1, kind: input, shape index: {}]   ;;  %s13229_s2 = inlined_call_operand.hbm [shape: f32[2,1,256], index: 2, kind: input, shape index: {}]   ;;  %s13230_s3 = inlined_call_operand.vmem [shape: f32[2,256,64], index: 3, kind: input, shape index: {}]   ;;  %s13231_s4 = inlined_call_operand.vmem [shape: f32[2,2,64], index: 4, kind: output, shape index: {}]  }
   0x1   :  { %13239 = sst [smem:[#allocation12_spill]] %s13227_s0 }
   0x2   :  { %9 = vsyncpa [#allocation4], 0 }
   0x3   :  { %11 = vsyncpa [#allocation4 + $0x1], 0 }
   0x4   :  { %12 = vsyncpa [#allocation6], 0 }
   0x5   :  { %14 = vsyncpa [#allocation6 + $0x1], 0  ;;  %s11579_s15 = smov 0   ;;  %s11581_s16 = smov 0  }
   0x6   :  { %s11583_s17 = smov 0   ;;  %s11585_s18 = smov 0  }
   0x7   :  { %s11587_s19 = smov 0   ;;  %s11589_s20 = smov 0  }
   0x8   :  { %s11591_s21 = smov 0   ;;  %s11593_s22 = smov 0  }
   0x9   :  { %s11595_s23 = smov 0   ;;  %s11597_s24 = smov 0  }
   0xa   :  { %s11599_s25 = smov 0  }
   0xb LB: > { %13240 = sst [smem:[#allocation9_spill]] %s11537_s23  ;;  %s29_s26 = sadd.s32 1, %s11537_s23  ;;  %s11545_s25 = sphi %s11599_s25, %s20_s25   ;;  %s11541_s24 = sphi %s11597_s24, %s13264_s24   ;;  %s11537_s23 = sphi %s11595_s23, %s13255_s23   ;;  %s11533_s22 = sphi %s11593_s22, %s13263_s22   ;;  %s11529_s21 = sphi %s11591_s21, %s13254_s21   ;;  %s11525_s20 = sphi %s11589_s20, %s13262_s20   ;;  %s11521_s19 = sphi %s11587_s19, %s13261_s19   ;;  %s11517_s18 = sphi %s11585_s18, %s13260_s18   ;;  %s11513_s17 = sphi %s11583_s17, %s13259_s17   ;;  %s11509_s16 = sphi %s11581_s16, %s13258_s16   ;;  %s11505_s15 = sphi %s11579_s15, %s13257_s15  }
   0xc   : > { %s32_s27 = sadd.s32 1, %s11541_s24  ;;  %p30_p0 = scmp.ge.s32.totalorder %s29_s26, 3 }
   0xd   : > { %s62_s28 = sadd.s32 1, %s11525_s20  ;;  %p69_p1 = scmp.ne.s32.totalorder %s11525_s20, %s11521_s19 }
   0xe   : > { %p13236_p2 = scmp.eq.s32.totalorder %s11545_s25, 0  ;;  %s13266_s26 = smov (%p30_p0, %s29_s26), 0 }
   0xf   : > { %13241 = sst [smem:[#allocation10_spill]] %s13266_s26  ;;  %s13268_s27 = smov (!%p30_p0, %s32_s27), %s11541_s24 }
  0x10   : > { %s58_s29 = ssub.s32 %s11537_s23, %s13266_s26  ;;  %p11647_p3 = por %p13236_p2, %p69_p1 }
  0x11   : > { %p34_p4 = scmp.ge.s32.totalorder %s13268_s27, 2  ;;  %p75_p5 = scmp.ne.s32.totalorder %s11521_s19, %s11517_s18 }
  0x12   : > { %p13235_p6 = scmp.lt.s32.totalorder %s11545_s25, 6  ;;  %s180_s5 = sand.u32 1, %s11525_s20  }
  0x13   : > { %s13270_s27 = smov (%p34_p4, %s13268_s27), 0  ;;  %s9545_s6 = sshll.u32 %s11537_s23, 11 }
  0x14   : > { %13243 = sst [smem:[#allocation11_spill]] %s13270_s27  ;;  %s11660_s7 = ssub.s32 %s11541_s24, %s13270_s27 }
  0x15   : > { %s59_s8 = sor.u32 %s58_s29, %s11660_s7  ;;  %s8503_s9 = sshll.u32 %s180_s5, 13 }
  0x16   : > { %p60_p7 = scmp.eq.s32.totalorder %s59_s8, 0  ;;  %s9737_s10 = smul.u32 6144, %s11541_s24 }
  0x17   : > { %s184_s11 = scalar_lea.vmem [#allocation3], %s8503_s9  ;;  %p11673_p8 = pnand %p13235_p6, %p11647_p3 }
  0x18   : > { %s194_s12 = sshll.u32 %s184_s11, 4  ;;  %s191_s14 = sadd.s32 %s9737_s10, %s9545_s6  ;;  %s11667_s12 = int_to_ptr.vmem [resolvable:$true] %s194_s12 }
  0x19   : > { %s11665_s13 = scalar_select %p60_p7, %s11525_s20, %s62_s28  }
  0x1a   : > { %s8506_s26 = sshll.u32 %s191_s14, 6  ;;  %s11682_s28 = scalar_lea.sflag [#allocation4], %s180_s5 }
  0x1b   : > { %s11680_s29 = scalar_lea.hbm %s13228_s1, %s8506_s26  ;;  %p11393_p10 = pneg %p11673_p8 }
  0x1c   : > { %s11391_s6 = scalar_lea.hbm %s11680_s29, 131072  ;;  %s11396_s27 = scalar_lea.hbm %s13228_s1, 786432 }
  0x1d   : > { %p11392_p9 = scmp.ne.s32.totalorder %s11680_s29, %s11391_s6  ;;  %p11397_p13 = scmp.lt.u32.totalorder %s11680_s29, %s13228_s1 }
  0x1e   : > { %p11398_p0 = scmp.lt.u32.totalorder %s11396_s27, %s11391_s6  ;;  %p11400_p3 = scmp.lt.u32.totalorder %s11391_s6, %s11680_s29 }
  0x1f   : > { %p11394_p11 = pnand %p11393_p10, %p11392_p9 }
  0x20   : > { %p11399_p1 = por %p11398_p0, %p11397_p13 }
  0x21   : > { %p11395_p12 = pneg %p11394_p11 }
  0x22   : > { %p11401_p4 = por %p11400_p3, %p11399_p1 }
  0x24   : > { %p11402_p7 = pnand %p11401_p4, %p11395_p12 }
  0x26   : > { %11405 = shalt.err (!%p11402_p7)
}
  0x27   : > { %s11406_s5 = scalar_lea.vmem %s11667_s12, 131072  ;;  %s11547_s9 = smov [#allocation3]  }
  0x28   : > { %p11407_p9 = scmp.ne.s32.totalorder %s11667_s12, %s11406_s5  ;;  %s11411_s10 = sshll.u32 %s11547_s9, 4  ;;  %s11412_s10 = int_to_ptr.vmem [resolvable:$false] %s11411_s10 }
  0x29   : > { %s11413_s11 = scalar_lea.vmem %s11412_s10, 262144  ;;  %p11414_p2 = scmp.lt.s32.totalorder %s11667_s12, %s11412_s10 }
  0x2a   : > { %p11409_p11 = pnand %p11407_p9, %p11393_p10  ;;  %p11415_p13 = scmp.lt.s32.totalorder %s11413_s11, %s11406_s5 }
  0x2c   : > { %p11410_p6 = pneg %p11409_p11  ;;  %p11416_p0 = por %p11415_p13, %p11414_p2 }
  0x2e   : > { %p11417_p1 = pnand %p11416_p0, %p11410_p6 }
  0x30   : > { %11420 = shalt.err (!%p11417_p1)
}
  0x31   : > { %s11548_s14 = smov 128   ;;  %s11549_s6 = smov 8  }
  0x32   : > { %9745 = dma.hbm_to_vmem [thread:$0]  (!%p11673_p8), %s11680_s29, 131072, %s11667_s12, %s11682_s28, %s11548_s14, %s11548_s14, %s11549_s6  }
  0x33   : > { %p8510_p2 = scmp.ge.s32.totalorder %s11545_s25, 1  ;;  %p229_p6 = scmp.lt.s32.totalorder %s11545_s25, 7 }
  0x34   : > { %s8499_s23 = sadd.s32 4294967295, %s11545_s25   ;;  %p86_p3 = scmp.eq.s32.totalorder %s11660_s7, 0 }
  0x35   : > { %p11712_p10 = pnand %p8510_p2, %p229_p6  ;;  %p76_p12 = scmp.eq.s32.totalorder %s8499_s23, 0 }
  0x36   : > { %s88_s27 = sadd.s32 1, %s11513_s17  ;;  %p95_p4 = scmp.ne.s32.totalorder %s11513_s17, %s11509_s16 }
  0x37   : > { %p11724_p7 = por %p76_p12, %p75_p5  ;;  %p101_p9 = scmp.ne.s32.totalorder %s11509_s16, %s11505_s15 }
  0x38   : > { %s11731_s0 = scalar_select %p86_p3, %s11513_s17, %s88_s27  }
  0x39   : > { %s13246_s26 = scalar_select %p11724_p7, 1, 0 }
  0x3a   : > { %p13247_p8 = scmp.eq.s32.totalorder %s11545_s25, 0  ;;  %p11735_p13 = por %p101_p9, %p76_p12 }
  0x3b   : > { %s204_s29 = sand.u32 1, %s11513_s17   ;;  %s9546_s28 = sshll.u32 %s11541_s24, 5 }
  0x3c   : > { %p97_p11 = por %p95_p4, %p13247_p8  ;;  %s8507_s8 = sshll.u32 %s204_s29, 1 }
  0x3d   : > { %s13248_s12 = scalar_select %p11735_p13, 1, 0 }
  0x3e   : > { %s11744_s18 = scalar_lea.hbm %s13229_s2, %s9546_s28  ;;  %s208_s15 = scalar_lea.vmem [#allocation5], %s8507_s8 }
  0x3f   : > { %s216_s9 = sshll.u32 %s208_s15, 4  ;;  %p13249_p5 = scmp.lt.s32.totalorder %s11545_s25, 6  ;;  %s11752_s9 = int_to_ptr.vmem [resolvable:$true] %s216_s9 }
  0x40   : > { %s205_s11 = scalar_lea.sflag [#allocation6], %s204_s29  ;;  %s11421_s14 = scalar_lea.hbm %s11744_s18, 32 }
  0x41   : > { %p11748_p0 = pnand %p13249_p5, %p97_p11  ;;  %p11422_p1 = scmp.ne.s32.totalorder %s11744_s18, %s11421_s14 }
  0x42   : > { %s11426_s27 = scalar_lea.hbm %s13229_s2, 64  ;;  %p11427_p3 = scmp.lt.u32.totalorder %s11744_s18, %s13229_s2 }
  0x43   : > { %p11423_p2 = pneg %p11748_p0  ;;  %p11428_p4 = scmp.lt.u32.totalorder %s11426_s27, %s11421_s14 }
  0x44   : > { %p11430_p8 = scmp.lt.u32.totalorder %s11421_s14, %s11744_s18 }
  0x45   : > { %p11424_p6 = pnand %p11423_p2, %p11422_p1  ;;  %p11429_p9 = por %p11428_p4, %p11427_p3 }
  0x47   : > { %p11425_p12 = pneg %p11424_p6  ;;  %p11431_p11 = por %p11430_p8, %p11429_p9 }
  0x49   : > { %p11432_p5 = pnand %p11431_p11, %p11425_p12 }
  0x4b   : > { %11435 = shalt.err (!%p11432_p5)
}
  0x4c   : > { %s11436_s29 = scalar_lea.vmem %s11752_s9, 32  ;;  %s11550_s7 = smov [#allocation5]  }
  0x4d   : > { %p11437_p1 = scmp.ne.s32.totalorder %s11752_s9, %s11436_s29  ;;  %s11441_s5 = sshll.u32 %s11550_s7, 4  ;;  %s11442_s5 = int_to_ptr.vmem [resolvable:$false] %s11441_s5 }
  0x4e   : > { %s11443_s15 = scalar_lea.vmem %s11442_s5, 64  ;;  %p11444_p7 = scmp.lt.s32.totalorder %s11752_s9, %s11442_s5 }
  0x4f   : > { %p11439_p6 = pnand %p11437_p1, %p11423_p2  ;;  %p11445_p3 = scmp.lt.s32.totalorder %s11443_s15, %s11436_s29 }
  0x51   : > { %p11440_p13 = pneg %p11439_p6  ;;  %p11446_p4 = por %p11445_p3, %p11444_p7 }
  0x53   : > { %p11447_p9 = pnand %p11446_p4, %p11440_p13 }
  0x55   : > { %11450 = shalt.err (!%p11447_p9)
}
  0x56   : > { %9748 = dma.hbm_to_vmem [thread:$0]  (!%p11748_p0), %s11744_s18, 32, %s11752_s9, %s205_s11  }
  0x57   : > { %233 = sbr.rel (%p11712_p10) target bundleno = 1588 (0x634), region = 36  ;;  %s235_s14 = sand.u32 (!%p11712_p10), 1, %s11521_s19  }
  0x58   : > { %s8511_s6 = sshll.u32 (!%p11712_p10), %s235_s14, 13  ;;  %s236_s23 = scalar_lea.sflag (!%p11712_p10), [#allocation4], %s235_s14 }
  0x59   : > { %s11782_s27 = scalar_lea.vmem (!%p11712_p10), [#allocation3], %s8511_s6  ;;  %p13251_p2 = scmp.ne.s32.totalorder (!%p11712_p10), %s13246_s26, 0 }
  0x5e   : > { %11496 = dma.done.wait (%p13251_p2), %s236_s23, 131072  }
  0x5f   : > { %11498 = vsyncadd (%p13251_p2), %s236_s23, 4294836224  ;;  %s244_s10 = sand.u32 1, %s11509_s16   ;;  %p13252_p10 = scmp.ne.s32.totalorder %s13248_s12, 0 }
  0x60   : > { %s11789_s28 = sshll.u32 %s244_s10, 1  ;;  %s245_s30 = scalar_lea.sflag [#allocation6], %s244_s10 }
  0x61   : > { %s248_s18 = scalar_lea.vmem [#allocation5], %s11789_s28 }
  0x62   : > { %11500 = dma.done.wait (%p13252_p10), %s245_s30, 32  }
  0x63   : > { %11502 = vsyncadd (%p13252_p10), %s245_s30, 4294967264  ;;  %p283_p7 = scmp.lt.s32.totalorder %s11533_s22, 1  ;;  %p8516_p13 = scmp.ne.s32.totalorder %s11529_s21, 0 }
  0x64   : > { %v11551_v0 = vmov (!%p8516_p13), 0.0  }
  0x65   : > { %s13272_s22 = smov (!%p283_p7, %s11533_s22), 1  ;;  %295 = sbr.rel (%p8516_p13) target bundleno = 108 (0x6c), region = 48 }
  0x66   : > { %s9547_s9 = sshll.u32 %s13272_s22, 8  ;;  %s8515_s26 = sshll.u32 %s13272_s22, 1  ;;  %296 = vst [vmem:[#allocation2] sm:$0xf] (!%p8516_p13), %v11551_v0 }
  0x67   : > { %s11801_s29 = scalar_lea.vmem %s13230_s3, %s9547_s9  ;;  %s11806_s15 = scalar_lea.vmem %s13231_s4, %s8515_s26 }
  0x6c PF: > { %v9843_v1 = vld [vmem:[%s11782_s27 + $0x4] ss:$8 sps:$4 sm:$0xff]   ;;  %v9847_v3 = vld [vmem:[%s11782_s27] ss:$8 sps:$4 sm:$0xff]   ;;  %v9849_v5 = vld [vmem:[%s11782_s27 + $0x14] ss:$8 sps:$4 sm:$0xff]   ;;  %v1346_v39 = vlaneseq }
  0x6d   : > { %v9845_v2 = vld [vmem:[%s11782_s27 + $0x1004] ss:$8 sps:$4 sm:$0xff]   ;;  %6918 = vmatprep.subr.bf16.mxu1 %v9843_v1  ;;  %v9848_v4 = vld [vmem:[%s11782_s27 + $0x1000] ss:$8 sps:$4 sm:$0xff]   ;;  %v9851_v6 = vld [vmem:[%s11782_s27 + $0x1014] ss:$8 sps:$4 sm:$0xff]  }
  0x6e   : > { %7574 = vmatprep.subr.bf16.mxu0 %v9845_v2  ;;  %6919 = vmatpush1.bf16.msra.mxu1 %v9847_v3  ;;  %v9853_v7 = vld [vmem:[%s11782_s27 + $0x10] ss:$8 sps:$4 sm:$0xff]   ;;  %v9855_v9 = vld [vmem:[%s11782_s27 + $0x24] ss:$8 sps:$4 sm:$0xff]   ;;  %v9859_v11 = vld [vmem:[%s11782_s27 + $0x20] ss:$8 sps:$4 sm:$0xff]  }
  0x6f   : > { %7575 = vmatpush1.bf16.msra.mxu0 %v9848_v4  ;;  %6920 = vmatprep.subr.bf16.mxu1 %v9849_v5  ;;  %v9854_v8 = vld [vmem:[%s11782_s27 + $0x1010] ss:$8 sps:$4 sm:$0xff]   ;;  %v9857_v10 = vld [vmem:[%s11782_s27 + $0x1024] ss:$8 sps:$4 sm:$0xff]   ;;  %v9860_v12 = vld [vmem:[%s11782_s27 + $0x1020] ss:$8 sps:$4 sm:$0xff]  }
  0x70   : > { %7576 = vmatprep.subr.bf16.mxu0 %v9851_v6  ;;  %v9861_v13 = vld [vmem:[%s11782_s27 + $0x34] ss:$8 sps:$4 sm:$0xff]   ;;  %v9865_v15 = vld [vmem:[%s11782_s27 + $0x30] ss:$8 sps:$4 sm:$0xff]   ;;  %v9867_v17 = vld [vmem:[%s11782_s27 + $0x44] ss:$8 sps:$4 sm:$0xff]  }
  0x71   : > { %v9863_v14 = vld [vmem:[%s11782_s27 + $0x1034] ss:$8 sps:$4 sm:$0xff]   ;;  %v9866_v16 = vld [vmem:[%s11782_s27 + $0x1030] ss:$8 sps:$4 sm:$0xff]   ;;  %v9869_v18 = vld [vmem:[%s11782_s27 + $0x1044] ss:$8 sps:$4 sm:$0xff]  }
  0x72   : > { %6921 = vmatpush1.bf16.msra.mxu1 %v9853_v7  ;;  %v9871_v19 = vld [vmem:[%s11782_s27 + $0x40] ss:$8 sps:$4 sm:$0xff]   ;;  %v9873_v21 = vld [vmem:[%s11782_s27 + $0x54] ss:$8 sps:$4 sm:$0xff]   ;;  %v9877_v23 = vld [vmem:[%s11782_s27 + $0x50] ss:$8 sps:$4 sm:$0xff]  }
  0x73   : > { %7577 = vmatpush1.bf16.msra.mxu0 %v9854_v8  ;;  %6922 = vmatprep.subr.bf16.mxu1 %v9855_v9  ;;  %v9872_v20 = vld [vmem:[%s11782_s27 + $0x1040] ss:$8 sps:$4 sm:$0xff]   ;;  %v9875_v22 = vld [vmem:[%s11782_s27 + $0x1054] ss:$8 sps:$4 sm:$0xff]   ;;  %v9878_v24 = vld [vmem:[%s11782_s27 + $0x1050] ss:$8 sps:$4 sm:$0xff]  }
  0x74   : > { %7578 = vmatprep.subr.bf16.mxu0 %v9857_v10  ;;  %v9879_v25 = vld [vmem:[%s11782_s27 + $0x64] ss:$8 sps:$4 sm:$0xff]   ;;  %v9883_v27 = vld [vmem:[%s11782_s27 + $0x60] ss:$8 sps:$4 sm:$0xff]   ;;  %v9885_v29 = vld [vmem:[%s11782_s27 + $0x74] ss:$8 sps:$4 sm:$0xff]  }
  0x75   : > { %v9881_v26 = vld [vmem:[%s11782_s27 + $0x1064] ss:$8 sps:$4 sm:$0xff]   ;;  %v9884_v28 = vld [vmem:[%s11782_s27 + $0x1060] ss:$8 sps:$4 sm:$0xff]   ;;  %v9887_v30 = vld [vmem:[%s11782_s27 + $0x1074] ss:$8 sps:$4 sm:$0xff]  }
  0x76   : > { %6923 = vmatpush1.bf16.msra.mxu1 %v9859_v11  ;;  %v9889_v31 = vld [vmem:[%s11782_s27 + $0x70] ss:$8 sps:$4 sm:$0xff]   ;;  %v9891_v33 = vld [vmem:[%s11782_s27 + $0x84] ss:$8 sps:$4 sm:$0xff]   ;;  %v9895_v35 = vld [vmem:[%s11782_s27 + $0x80] ss:$8 sps:$4 sm:$0xff]  }
  0x77   : > { %7579 = vmatpush1.bf16.msra.mxu0 %v9860_v12  ;;  %6924 = vmatprep.subr.bf16.mxu1 %v9861_v13  ;;  %v9890_v32 = vld [vmem:[%s11782_s27 + $0x1070] ss:$8 sps:$4 sm:$0xff]   ;;  %v9893_v34 = vld [vmem:[%s11782_s27 + $0x1084] ss:$8 sps:$4 sm:$0xff]   ;;  %v9896_v36 = vld [vmem:[%s11782_s27 + $0x1080] ss:$8 sps:$4 sm:$0xff]  }
  0x78   : > { %7580 = vmatprep.subr.bf16.mxu0 %v9863_v14  ;;  %v11552_v37 = vmov 1966171168   ;;  %v9897_v40 = vld [vmem:[%s11782_s27 + $0x94] ss:$8 sps:$4 sm:$0xff]   ;;  %s8517_s22 = sshll.u32 %s11529_s21, 13  ;;  %v11849_v44 = vshrl.u32 %v1346_v39, 7 }
  0x79   : > { %v1344_v38 = vunpack.c.l.s4 %v11552_v37  ;;  %v9899_v41 = vld [vmem:[%s11782_s27 + $0x1094] ss:$8 sps:$4 sm:$0xff]   ;;  %v9901_v42 = vld [vmem:[%s11782_s27 + $0x90] ss:$8 sps:$4 sm:$0xff]   ;;  %v9903_v46 = vld [vmem:[%s11782_s27 + $0xa4] ss:$8 sps:$4 sm:$0xff]  }
  0x7a   : > { %6925 = vmatpush1.bf16.msra.mxu1 %v9865_v15  ;;  %v9902_v45 = vld [vmem:[%s11782_s27 + $0x1090] ss:$8 sps:$4 sm:$0xff]   ;;  %s299_s12 = sshra.s32 %s8517_s22, 7  ;;  %v9905_v47 = vld [vmem:[%s11782_s27 + $0x10a4] ss:$8 sps:$4 sm:$0xff]   ;;  %s13253_s23 = sld [smem:[#allocation12_spill]] }
  0x7b   : > { %7581 = vmatpush1.bf16.msra.mxu0 %v9866_v16  ;;  %6926 = vmatprep.subr.bf16.mxu1 %v9867_v17  ;;  %v1345_v43 = vunpack.c.0.s8 %v1344_v38  ;;  %v9907_v48 = vld [vmem:[%s11782_s27 + $0xa0] ss:$8 sps:$4 sm:$0xff]   ;;  %v9909_v51 = vld [vmem:[%s11782_s27 + $0xb4] ss:$8 sps:$4 sm:$0xff]   ;;  %v9913_v54 = vld [vmem:[%s11782_s27 + $0xb0] ss:$8 sps:$4 sm:$0xff]  }
  0x7c   : > { %7582 = vmatprep.subr.bf16.mxu0 %v9869_v18  ;;  %v9908_v49 = vld [vmem:[%s11782_s27 + $0x10a0] ss:$8 sps:$4 sm:$0xff]   ;;  %v9911_v52 = vld [vmem:[%s11782_s27 + $0x10b4] ss:$8 sps:$4 sm:$0xff]   ;;  %v9914_v56 = vld [vmem:[%s11782_s27 + $0x10b0] ss:$8 sps:$4 sm:$0xff]  }
  0x7d   : > { %v11862_v50 = vsub.s32 %v1345_v43, %v11849_v44  ;;  %v9915_v58 = vld [vmem:[%s11782_s27 + $0xc4] ss:$8 sps:$4 sm:$0xff]   ;;  %v9919_v0 = vld [vmem:[%s11782_s27 + $0xc0] ss:$8 sps:$4 sm:$0xff]   ;;  %v9921_v2 = vld [vmem:[%s11782_s27 + $0xd4] ss:$8 sps:$4 sm:$0xff]  }
  0x7e   : > { %6927 = vmatpush1.bf16.msra.mxu1 %v9871_v19  ;;  %v9917_v59 = vld [vmem:[%s11782_s27 + $0x10c4] ss:$8 sps:$4 sm:$0xff]   ;;  %v9920_v1 = vld [vmem:[%s11782_s27 + $0x10c0] ss:$8 sps:$4 sm:$0xff]   ;;  %v9923_v3 = vld [vmem:[%s11782_s27 + $0x10d4] ss:$8 sps:$4 sm:$0xff]  }
  0x7f   : > { %7583 = vmatpush1.bf16.msra.mxu0 %v9872_v20  ;;  %6928 = vmatprep.subr.bf16.mxu1 %v9873_v21  ;;  %v9925_v5 = vld [vmem:[%s11782_s27 + $0xd0] ss:$8 sps:$4 sm:$0xff]   ;;  %v9927_v7 = vld [vmem:[%s11782_s27 + $0xe4] ss:$8 sps:$4 sm:$0xff]   ;;  %v9931_v9 = vld [vmem:[%s11782_s27 + $0xe0] ss:$8 sps:$4 sm:$0xff]  }
  0x80   : > { %7584 = vmatprep.subr.bf16.mxu0 %v9875_v22  ;;  %s11859_s10 = scalar_lea.vmem %s13253_s23, %s299_s12  ;;  %v9926_v6 = vld [vmem:[%s11782_s27 + $0x10d0] ss:$8 sps:$4 sm:$0xff]   ;;  %v9929_v8 = vld [vmem:[%s11782_s27 + $0x10e4] ss:$8 sps:$4 sm:$0xff]   ;;  %v9932_v10 = vld [vmem:[%s11782_s27 + $0x10e0] ss:$8 sps:$4 sm:$0xff]  }
  0x81   : > { %v11867_v53 = vld [vmem:[%s11859_s10] sm:$0xff]  ;;  %v9937_v13 = vld [vmem:[%s11782_s27 + $0xf0] ss:$8 sps:$4 sm:$0xff]   ;;  %v9942_v15 = vld [vmem:[%s11782_s27 + $0x104] ss:$8 sps:$4 sm:$0xff]   ;;  %p9542_p0 = scmp.ne.s32.totalorder %s11529_s21, 2 }
  0x82   : > { %6929 = vmatpush1.bf16.msra.mxu1 %v9877_v23  ;;  %v1349_v55 = vrot.slane %v11867_v53, %v11862_v50  ;;  %v11874_v57 = vld [vmem:[%s11859_s10 + $0x20] sm:$0xff]  ;;  %v9938_v14 = vld [vmem:[%s11782_s27 + $0x10f0] ss:$8 sps:$4 sm:$0xff]   ;;  %v9946_v16 = vld [vmem:[%s11782_s27 + $0x1104] ss:$8 sps:$4 sm:$0xff]   ;;  %vm8382_vm0 = vcmask (!%p9542_p0), 517120  }
  0x83   : > { %7585 = vmatpush1.bf16.msra.mxu0 %v9878_v24  ;;  %6930 = vmatprep.subr.bf16.mxu1 %v9879_v25  ;;  %v1545_v61 = vrot.slane %v11874_v57, %v11862_v50  ;;  %v9933_v11 = vld [vmem:[%s11782_s27 + $0xf4] ss:$8 sps:$4 sm:$0xff]   ;;  %v9940_v19 = vld [vmem:[%s11782_s27 + $0x100] ss:$8 sps:$4 sm:$0xff]   ;;  %v9947_v25 = vld [vmem:[%s11782_s27 + $0x110] ss:$8 sps:$4 sm:$0xff]  }
  0x84   : > { %7586 = vmatprep.subr.bf16.mxu0 %v9881_v26  ;;  %v1357_v60 = vcombine.high %v1349_v55, %v1349_v55  ;;  %v9935_v12 = vld [vmem:[%s11782_s27 + $0x10f4] ss:$8 sps:$4 sm:$0xff]   ;;  %v11899_v17 = vrot.slane %v1349_v55, %v11862_v50  ;;  %v9944_v20 = vld [vmem:[%s11782_s27 + $0x1100] ss:$8 sps:$4 sm:$0xff]   ;;  %v9950_v26 = vld [vmem:[%s11782_s27 + $0x1110] ss:$8 sps:$4 sm:$0xff]  }
  0x85   : > { %v1553_v63 = vcombine.high %v1545_v61, %v1545_v61  ;;  %v11902_v18 = vrot.slane %v1545_v61, %v11862_v50  ;;  %v9949_v21 = vld [vmem:[%s11782_s27 + $0x114] ss:$8 sps:$4 sm:$0xff]   ;;  %v9965_v37 = vld [vmem:[%s11782_s27 + $0x140] ss:$8 sps:$4 sm:$0xff]   ;;  %v9979_v43 = vld [vmem:[%s11782_s27 + $0x164] ss:$8 sps:$4 sm:$0xff]  }
  0x86   : > { %6931 = vmatpush1.bf16.msra.mxu1 %v9883_v27  ;;  %v1379_v62 = vrot.slane %v1357_v60, %v11862_v50  ;;  %v9952_v22 = vld [vmem:[%s11782_s27 + $0x1114] ss:$8 sps:$4 sm:$0xff]   ;;  %v9955_v27 = vld [vmem:[%s11782_s27 + $0x124] ss:$8 sps:$4 sm:$0xff]   ;;  %v9968_v38 = vld [vmem:[%s11782_s27 + $0x1140] ss:$8 sps:$4 sm:$0xff]  }
  0x87   : > { %7587 = vmatpush1.bf16.msra.mxu0 %v9884_v28  ;;  %6932 = vmatprep.subr.bf16.mxu1 %v9885_v29  ;;  %v1575_v4 = vrot.slane %v1553_v63, %v11862_v50  ;;  %v9958_v28 = vld [vmem:[%s11782_s27 + $0x1124] ss:$8 sps:$4 sm:$0xff]   ;;  %v9953_v29 = vld [vmem:[%s11782_s27 + $0x120] ss:$8 sps:$4 sm:$0xff]   ;;  %v9973_v39 = vld [vmem:[%s11782_s27 + $0x154] ss:$8 sps:$4 sm:$0xff]  }
  0x88   : > { %7588 = vmatprep.subr.bf16.mxu0 %v9887_v30  ;;  %6950 = vmatprep.mubr.bf16.mxu1 %v1379_v62  ;;  %v1389_v23 = vcombine.high %v1379_v62, %v1379_v62  ;;  %v9956_v30 = vld [vmem:[%s11782_s27 + $0x1120] ss:$8 sps:$4 sm:$0xff]   ;;  %v9994_v55 = vld [vmem:[%s11782_s27 + $0x1184] ss:$8 sps:$4 sm:$0xff]   ;;  %v10000_v60 = vld [vmem:[%s11782_s27 + $0x1194] ss:$8 sps:$4 sm:$0xff]  }
  0x89   : > { %7606 = vmatprep.mubr.bf16.mxu0 %v1575_v4  ;;  %v1585_v24 = vcombine.high %v1575_v4, %v1575_v4  ;;  %v9995_v61 = vld [vmem:[%s11782_s27 + $0x190] ss:$8 sps:$4 sm:$0xff]   ;;  %v10003_v63 = vld [vmem:[%s11782_s27 + $0x1a4] ss:$8 sps:$4 sm:$0xff]   ;;  %v10012_v4 = vld [vmem:[%s11782_s27 + $0x11b4] ss:$8 sps:$4 sm:$0xff]  }
  0x8a   : > { %6933 = vmatpush1.bf16.msra.mxu1 %v9889_v31  ;;  %v9961_v31 = vld [vmem:[%s11782_s27 + $0x134] ss:$8 sps:$4 sm:$0xff]   ;;  %v9998_v62 = vld [vmem:[%s11782_s27 + $0x1190] ss:$8 sps:$4 sm:$0xff]  }
  0x8b   : > { %7589 = vmatpush1.bf16.msra.mxu0 %v9890_v32  ;;  %6934 = vmatprep.subr.bf16.mxu1 %v9891_v33  ;;  %v9964_v32 = vld [vmem:[%s11782_s27 + $0x1134] ss:$8 sps:$4 sm:$0xff]   ;;  %v9959_v33 = vld [vmem:[%s11782_s27 + $0x130] ss:$8 sps:$4 sm:$0xff]  }
  0x8c   : > { %7590 = vmatprep.subr.bf16.mxu0 %v9893_v34  ;;  %v9962_v34 = vld [vmem:[%s11782_s27 + $0x1130] ss:$8 sps:$4 sm:$0xff]  }
  0x8e   : > { %6935 = vmatpush1.bf16.msra.mxu1 %v9895_v35  ;;  %v9967_v35 = vld [vmem:[%s11782_s27 + $0x144] ss:$8 sps:$4 sm:$0xff]  }
  0x8f   : > { %7591 = vmatpush1.bf16.msra.mxu0 %v9896_v36  ;;  %6936 = vmatprep.subr.bf16.mxu1 %v9897_v40  ;;  %v9970_v36 = vld [vmem:[%s11782_s27 + $0x1144] ss:$8 sps:$4 sm:$0xff]   ;;  %v9976_v40 = vld [vmem:[%s11782_s27 + $0x1154] ss:$8 sps:$4 sm:$0xff]  }
  0x90   : > { %7592 = vmatprep.subr.bf16.mxu0 %v9899_v41  ;;  %v9971_v41 = vld [vmem:[%s11782_s27 + $0x150] ss:$8 sps:$4 sm:$0xff]  }
  0x92   : > { %6937 = vmatpush1.bf16.msra.mxu1 %v9901_v42  ;;  %v9974_v42 = vld [vmem:[%s11782_s27 + $0x1150] ss:$8 sps:$4 sm:$0xff]  }
  0x93   : > { %7593 = vmatpush1.bf16.msra.mxu0 %v9902_v45  ;;  %6938 = vmatprep.subr.bf16.mxu1 %v9903_v46  ;;  %v9982_v45 = vld [vmem:[%s11782_s27 + $0x1164] ss:$8 sps:$4 sm:$0xff]   ;;  %v9977_v46 = vld [vmem:[%s11782_s27 + $0x160] ss:$8 sps:$4 sm:$0xff]  }
  0x94   : > { %7594 = vmatprep.subr.bf16.mxu0 %v9905_v47  ;;  %v9980_v47 = vld [vmem:[%s11782_s27 + $0x1160] ss:$8 sps:$4 sm:$0xff]  }
  0x96   : > { %6939 = vmatpush1.bf16.msra.mxu1 %v9907_v48  ;;  %v9985_v48 = vld [vmem:[%s11782_s27 + $0x174] ss:$8 sps:$4 sm:$0xff]  }
  0x97   : > { %7595 = vmatpush1.bf16.msra.mxu0 %v9908_v49  ;;  %6940 = vmatprep.subr.bf16.mxu1 %v9909_v51  ;;  %v9988_v49 = vld [vmem:[%s11782_s27 + $0x1174] ss:$8 sps:$4 sm:$0xff]   ;;  %v9983_v51 = vld [vmem:[%s11782_s27 + $0x170] ss:$8 sps:$4 sm:$0xff]  }
  0x98   : > { %7596 = vmatprep.subr.bf16.mxu0 %v9911_v52  ;;  %v9986_v52 = vld [vmem:[%s11782_s27 + $0x1170] ss:$8 sps:$4 sm:$0xff]  }
  0x9a   : > { %6941 = vmatpush1.bf16.msra.mxu1 %v9913_v54  ;;  %v9991_v54 = vld [vmem:[%s11782_s27 + $0x184] ss:$8 sps:$4 sm:$0xff]  }
  0x9b   : > { %7597 = vmatpush1.bf16.msra.mxu0 %v9914_v56  ;;  %6942 = vmatprep.subr.bf16.mxu1 %v9915_v58  ;;  %v9989_v56 = vld [vmem:[%s11782_s27 + $0x180] ss:$8 sps:$4 sm:$0xff]  }
  0x9c   : > { %7598 = vmatprep.subr.bf16.mxu0 %v9917_v59  ;;  %v9992_v58 = vld [vmem:[%s11782_s27 + $0x1180] ss:$8 sps:$4 sm:$0xff]   ;;  %v9997_v59 = vld [vmem:[%s11782_s27 + $0x194] ss:$8 sps:$4 sm:$0xff]  }
  0x9e   : > { %6943 = vmatpush1.bf16.msra.mxu1 %v9919_v0  ;;  %v10006_v0 = vld [vmem:[%s11782_s27 + $0x11a4] ss:$8 sps:$4 sm:$0xff]  }
  0x9f   : > { %7599 = vmatpush1.bf16.msra.mxu0 %v9920_v1  ;;  %6944 = vmatprep.subr.bf16.mxu1 %v9921_v2  ;;  %v10001_v1 = vld [vmem:[%s11782_s27 + $0x1a0] ss:$8 sps:$4 sm:$0xff]  }
  0xa0   : > { %7600 = vmatprep.subr.bf16.mxu0 %v9923_v3  ;;  %v10004_v2 = vld [vmem:[%s11782_s27 + $0x11a0] ss:$8 sps:$4 sm:$0xff]   ;;  %v10009_v3 = vld [vmem:[%s11782_s27 + $0x1b4] ss:$8 sps:$4 sm:$0xff]  }
  0xa2   : > { %6945 = vmatpush1.bf16.msra.mxu1 %v9925_v5  ;;  %v10007_v5 = vld [vmem:[%s11782_s27 + $0x1b0] ss:$8 sps:$4 sm:$0xff]  }
  0xa3   : > { %7601 = vmatpush1.bf16.msra.mxu0 %v9926_v6  ;;  %6946 = vmatprep.subr.bf16.mxu1 %v9927_v7  ;;  %v10010_v6 = vld [vmem:[%s11782_s27 + $0x11b0] ss:$8 sps:$4 sm:$0xff]   ;;  %v10015_v7 = vld [vmem:[%s11782_s27 + $0x1c4] ss:$8 sps:$4 sm:$0xff]  }
  0xa4   : > { %7602 = vmatprep.subr.bf16.mxu0 %v9929_v8  ;;  %v10018_v8 = vld [vmem:[%s11782_s27 + $0x11c4] ss:$8 sps:$4 sm:$0xff]  }
  0xa6   : > { %6947 = vmatpush1.bf16.msra.mxu1 %v9931_v9  ;;  %v10013_v9 = vld [vmem:[%s11782_s27 + $0x1c0] ss:$8 sps:$4 sm:$0xff]  }
  0xa7   : > { %7603 = vmatpush1.bf16.msra.mxu0 %v9932_v10  ;;  %6948 = vmatprep.subr.bf16.mxu1 %v9933_v11  ;;  %v10016_v10 = vld [vmem:[%s11782_s27 + $0x11c0] ss:$8 sps:$4 sm:$0xff]   ;;  %v10021_v11 = vld [vmem:[%s11782_s27 + $0x1d4] ss:$8 sps:$4 sm:$0xff]  }
  0xa8   : > { %7604 = vmatprep.subr.bf16.mxu0 %v9935_v12  ;;  %v10024_v12 = vld [vmem:[%s11782_s27 + $0x11d4] ss:$8 sps:$4 sm:$0xff]  }
  0xaa   : > { %6949 = vmatpush1.bf16.msra.mxu1 %v9937_v13  ;;  %v10019_v13 = vld [vmem:[%s11782_s27 + $0x1d0] ss:$8 sps:$4 sm:$0xff]  }
  0xab   : > { %7605 = vmatpush1.bf16.msra.mxu0 %v9938_v14  ;;  %6959 = vmatprep.subr.bf16.mxu1 %v9942_v15  ;;  %v10022_v14 = vld [vmem:[%s11782_s27 + $0x11d0] ss:$8 sps:$4 sm:$0xff]   ;;  %v10027_v15 = vld [vmem:[%s11782_s27 + $0x1e4] ss:$8 sps:$4 sm:$0xff]  }
  0xac   : > { %7615 = vmatprep.subr.bf16.mxu0 %v9946_v16  ;;  %v10030_v16 = vld [vmem:[%s11782_s27 + $0x11e4] ss:$8 sps:$4 sm:$0xff]  }
  0xad   : > { %6951 = vmatmul.mubr.bf16.vlgmr.msra.gmra.mrb[0].mxu1 %v11899_v17 }
  0xae   : > { %7607 = vmatmul.mubr.bf16.vlgmr.msra.gmra.mrb[0].mxu0 %v11902_v18  ;;  %6960 = vmatpush1.bf16.msra.mxu1 %v9940_v19  ;;  %v1342_v19 = vcombine.high %v11867_v53, %v11867_v53  ;;  %v10031_v53 = vld [vmem:[%s11782_s27 + $0x1f0] ss:$8 sps:$4 sm:$0xff]  }
  0xaf   : > { %7616 = vmatpush1.bf16.msra.mxu0 %v9944_v20  ;;  %6961 = vmatprep.subr.bf16.mxu1 %v9949_v21  ;;  %v1538_v20 = vcombine.high %v11874_v57, %v11874_v57  ;;  %v10025_v21 = vld [vmem:[%s11782_s27 + $0x1e0] ss:$8 sps:$4 sm:$0xff]   ;;  %v10034_v57 = vld [vmem:[%s11782_s27 + $0x11f0] ss:$8 sps:$4 sm:$0xff]  }
  0xb0   : > { %7617 = vmatprep.subr.bf16.mxu0 %v9952_v22  ;;  %6991 = vmatprep.mubr.bf16.mxu1 %v1389_v23  ;;  %v10028_v22 = vld [vmem:[%s11782_s27 + $0x11e0] ss:$8 sps:$4 sm:$0xff]   ;;  %v10033_v23 = vld [vmem:[%s11782_s27 + $0x1f4] ss:$8 sps:$4 sm:$0xff]  }
  0xb1   : > { %7647 = vmatprep.mubr.bf16.mxu0 %v1585_v24  ;;  %v10036_v24 = vld [vmem:[%s11782_s27 + $0x11f4] ss:$8 sps:$4 sm:$0xff]  }
  0xb2   : > { %6962 = vmatpush1.bf16.msra.mxu1 %v9947_v25  ;;  %v11971_v25 = vrot.slane %v1342_v19, %v11862_v50  ;;  %v10103_v19 = vld [vmem:[%s11782_s27 + $0x2b0] ss:$8 sps:$4 sm:$0xff]  }
  0xb3   : > { %7618 = vmatpush1.bf16.msra.mxu0 %v9950_v26  ;;  %6963 = vmatprep.subr.bf16.mxu1 %v9955_v27  ;;  %v11974_v26 = vrot.slane %v1538_v20, %v11862_v50  ;;  %v10039_v27 = vld [vmem:[%s11782_s27 + $0x204] ss:$8 sps:$4 sm:$0xff]   ;;  %v10106_v20 = vld [vmem:[%s11782_s27 + $0x12b0] ss:$8 sps:$4 sm:$0xff]  }
  0xb4   : > { %7619 = vmatprep.subr.bf16.mxu0 %v9958_v28  ;;  %v10042_v28 = vld [vmem:[%s11782_s27 + $0x1204] ss:$8 sps:$4 sm:$0xff]  }
  0xb6   : > { %6964 = vmatpush1.bf16.msra.mxu1 %v9953_v29  ;;  %v1358_v29 = vcombine.high %v11971_v25, %v11971_v25 }
  0xb7   : > { %7620 = vmatpush1.bf16.msra.mxu0 %v9956_v30  ;;  %6965 = vmatprep.subr.bf16.mxu1 %v9961_v31  ;;  %v1554_v30 = vcombine.high %v11974_v26, %v11974_v26  ;;  %v1387_v31 = vcombine.high %v11899_v17, %v11899_v17 }
  0xb8   : > { %7621 = vmatprep.subr.bf16.mxu0 %v9964_v32  ;;  %v1583_v32 = vcombine.high %v11902_v18, %v11902_v18  ;;  %v10043_v18 = vld [vmem:[%s11782_s27 + $0x210] ss:$8 sps:$4 sm:$0xff]  }
  0xb9   : > { %v11996_v17 = vrot.slane %v1554_v30, %v11862_v50  ;;  %v10126_v30 = vld [vmem:[%s11782_s27 + $0x12e4] ss:$8 sps:$4 sm:$0xff]  }
  0xba   : > { %6966 = vmatpush1.bf16.msra.mxu1 %v9959_v33  ;;  %v10037_v33 = vld [vmem:[%s11782_s27 + $0x200] ss:$8 sps:$4 sm:$0xff]  }
  0xbb   : > { %7622 = vmatpush1.bf16.msra.mxu0 %v9962_v34  ;;  %6967 = vmatprep.subr.bf16.mxu1 %v9967_v35  ;;  %v10040_v34 = vld [vmem:[%s11782_s27 + $0x1200] ss:$8 sps:$4 sm:$0xff]   ;;  %v10045_v35 = vld [vmem:[%s11782_s27 + $0x214] ss:$8 sps:$4 sm:$0xff]  }
  0xbc   : > { %7623 = vmatprep.subr.bf16.mxu0 %v9970_v36  ;;  %v10048_v36 = vld [vmem:[%s11782_s27 + $0x1214] ss:$8 sps:$4 sm:$0xff]  }
  0xbe   : > { %6968 = vmatpush1.bf16.msra.mxu1 %v9965_v37  ;;  %v11993_v37 = vrot.slane %v1358_v29, %v11862_v50  ;;  %v10123_v29 = vld [vmem:[%s11782_s27 + $0x2e4] ss:$8 sps:$4 sm:$0xff]  }
  0xbf   : > { %7624 = vmatpush1.bf16.msra.mxu0 %v9968_v38  ;;  %6969 = vmatprep.subr.bf16.mxu1 %v9973_v39  ;;  %v10046_v38 = vld [vmem:[%s11782_s27 + $0x1210] ss:$8 sps:$4 sm:$0xff]   ;;  %v10051_v39 = vld [vmem:[%s11782_s27 + $0x224] ss:$8 sps:$4 sm:$0xff]  }
  0xc0   : > { %7625 = vmatprep.subr.bf16.mxu0 %v9976_v40  ;;  %v10054_v40 = vld [vmem:[%s11782_s27 + $0x1224] ss:$8 sps:$4 sm:$0xff]  }
  0xc2   : > { %6970 = vmatpush1.bf16.msra.mxu1 %v9971_v41  ;;  %v10049_v41 = vld [vmem:[%s11782_s27 + $0x220] ss:$8 sps:$4 sm:$0xff]  }
  0xc3   : > { %7626 = vmatpush1.bf16.msra.mxu0 %v9974_v42  ;;  %6971 = vmatprep.subr.bf16.mxu1 %v9979_v43  ;;  %v10052_v42 = vld [vmem:[%s11782_s27 + $0x1220] ss:$8 sps:$4 sm:$0xff]   ;;  %v10057_v43 = vld [vmem:[%s11782_s27 + $0x234] ss:$8 sps:$4 sm:$0xff]  }
  0xc4   : > { %7627 = vmatprep.subr.bf16.mxu0 %v9982_v45  ;;  %v10060_v45 = vld [vmem:[%s11782_s27 + $0x1234] ss:$8 sps:$4 sm:$0xff]  }
  0xc6   : > { %6972 = vmatpush1.bf16.msra.mxu1 %v9977_v46  ;;  %v10055_v46 = vld [vmem:[%s11782_s27 + $0x230] ss:$8 sps:$4 sm:$0xff]  }
  0xc7   : > { %7628 = vmatpush1.bf16.msra.mxu0 %v9980_v47  ;;  %6973 = vmatprep.subr.bf16.mxu1 %v9985_v48  ;;  %v10058_v47 = vld [vmem:[%s11782_s27 + $0x1230] ss:$8 sps:$4 sm:$0xff]   ;;  %v10063_v48 = vld [vmem:[%s11782_s27 + $0x244] ss:$8 sps:$4 sm:$0xff]  }
  0xc8   : > { %7629 = vmatprep.subr.bf16.mxu0 %v9988_v49  ;;  %v10066_v49 = vld [vmem:[%s11782_s27 + $0x1244] ss:$8 sps:$4 sm:$0xff]  }
  0xca   : > { %6974 = vmatpush1.bf16.msra.mxu1 %v9983_v51  ;;  %v10061_v51 = vld [vmem:[%s11782_s27 + $0x240] ss:$8 sps:$4 sm:$0xff]  }
  0xcb   : > { %7630 = vmatpush1.bf16.msra.mxu0 %v9986_v52  ;;  %6975 = vmatprep.subr.bf16.mxu1 %v9991_v54  ;;  %v10064_v52 = vld [vmem:[%s11782_s27 + $0x1240] ss:$8 sps:$4 sm:$0xff]   ;;  %v10069_v54 = vld [vmem:[%s11782_s27 + $0x254] ss:$8 sps:$4 sm:$0xff]  }
  0xcc   : > { %7631 = vmatprep.subr.bf16.mxu0 %v9994_v55  ;;  %v10072_v55 = vld [vmem:[%s11782_s27 + $0x1254] ss:$8 sps:$4 sm:$0xff]  }
  0xce   : > { %6976 = vmatpush1.bf16.msra.mxu1 %v9989_v56  ;;  %v10067_v56 = vld [vmem:[%s11782_s27 + $0x250] ss:$8 sps:$4 sm:$0xff]  }
  0xcf   : > { %7632 = vmatpush1.bf16.msra.mxu0 %v9992_v58  ;;  %6977 = vmatprep.subr.bf16.mxu1 %v9997_v59  ;;  %v10070_v58 = vld [vmem:[%s11782_s27 + $0x1250] ss:$8 sps:$4 sm:$0xff]   ;;  %v10075_v59 = vld [vmem:[%s11782_s27 + $0x264] ss:$8 sps:$4 sm:$0xff]  }
  0xd0   : > { %7633 = vmatprep.subr.bf16.mxu0 %v10000_v60  ;;  %v10078_v60 = vld [vmem:[%s11782_s27 + $0x1264] ss:$8 sps:$4 sm:$0xff]  }
  0xd2   : > { %6978 = vmatpush1.bf16.msra.mxu1 %v9995_v61  ;;  %v10073_v61 = vld [vmem:[%s11782_s27 + $0x260] ss:$8 sps:$4 sm:$0xff]  }
  0xd3   : > { %7634 = vmatpush1.bf16.msra.mxu0 %v9998_v62  ;;  %6979 = vmatprep.subr.bf16.mxu1 %v10003_v63  ;;  %v10076_v62 = vld [vmem:[%s11782_s27 + $0x1260] ss:$8 sps:$4 sm:$0xff]   ;;  %v10081_v63 = vld [vmem:[%s11782_s27 + $0x274] ss:$8 sps:$4 sm:$0xff]  }
  0xd4   : > { %7635 = vmatprep.subr.bf16.mxu0 %v10006_v0  ;;  %v10084_v0 = vld [vmem:[%s11782_s27 + $0x1274] ss:$8 sps:$4 sm:$0xff]  }
  0xd6   : > { %6980 = vmatpush1.bf16.msra.mxu1 %v10001_v1  ;;  %v10079_v1 = vld [vmem:[%s11782_s27 + $0x270] ss:$8 sps:$4 sm:$0xff]  }
  0xd7   : > { %7636 = vmatpush1.bf16.msra.mxu0 %v10004_v2  ;;  %6981 = vmatprep.subr.bf16.mxu1 %v10009_v3  ;;  %v10082_v2 = vld [vmem:[%s11782_s27 + $0x1270] ss:$8 sps:$4 sm:$0xff]   ;;  %v10087_v3 = vld [vmem:[%s11782_s27 + $0x284] ss:$8 sps:$4 sm:$0xff]  }
  0xd8   : > { %7637 = vmatprep.subr.bf16.mxu0 %v10012_v4  ;;  %v10090_v4 = vld [vmem:[%s11782_s27 + $0x1284] ss:$8 sps:$4 sm:$0xff]  }
  0xda   : > { %6982 = vmatpush1.bf16.msra.mxu1 %v10007_v5  ;;  %v10085_v5 = vld [vmem:[%s11782_s27 + $0x280] ss:$8 sps:$4 sm:$0xff]  }
  0xdb   : > { %7638 = vmatpush1.bf16.msra.mxu0 %v10010_v6  ;;  %6983 = vmatprep.subr.bf16.mxu1 %v10015_v7  ;;  %v10088_v6 = vld [vmem:[%s11782_s27 + $0x1280] ss:$8 sps:$4 sm:$0xff]   ;;  %v10093_v7 = vld [vmem:[%s11782_s27 + $0x294] ss:$8 sps:$4 sm:$0xff]  }
  0xdc   : > { %7639 = vmatprep.subr.bf16.mxu0 %v10018_v8  ;;  %v10096_v8 = vld [vmem:[%s11782_s27 + $0x1294] ss:$8 sps:$4 sm:$0xff]  }
  0xde   : > { %6984 = vmatpush1.bf16.msra.mxu1 %v10013_v9  ;;  %v10091_v9 = vld [vmem:[%s11782_s27 + $0x290] ss:$8 sps:$4 sm:$0xff]  }
  0xdf   : > { %7640 = vmatpush1.bf16.msra.mxu0 %v10016_v10  ;;  %6985 = vmatprep.subr.bf16.mxu1 %v10021_v11  ;;  %v10094_v10 = vld [vmem:[%s11782_s27 + $0x1290] ss:$8 sps:$4 sm:$0xff]   ;;  %v10099_v11 = vld [vmem:[%s11782_s27 + $0x2a4] ss:$8 sps:$4 sm:$0xff]  }
  0xe0   : > { %7641 = vmatprep.subr.bf16.mxu0 %v10024_v12  ;;  %v10102_v12 = vld [vmem:[%s11782_s27 + $0x12a4] ss:$8 sps:$4 sm:$0xff]  }
  0xe2   : > { %6986 = vmatpush1.bf16.msra.mxu1 %v10019_v13  ;;  %v10097_v13 = vld [vmem:[%s11782_s27 + $0x2a0] ss:$8 sps:$4 sm:$0xff]  }
  0xe3   : > { %7642 = vmatpush1.bf16.msra.mxu0 %v10022_v14  ;;  %6987 = vmatprep.subr.bf16.mxu1 %v10027_v15  ;;  %v10100_v14 = vld [vmem:[%s11782_s27 + $0x12a0] ss:$8 sps:$4 sm:$0xff]   ;;  %v10105_v15 = vld [vmem:[%s11782_s27 + $0x2b4] ss:$8 sps:$4 sm:$0xff]  }
  0xe4   : > { %7643 = vmatprep.subr.bf16.mxu0 %v10030_v16  ;;  %v10108_v16 = vld [vmem:[%s11782_s27 + $0x12b4] ss:$8 sps:$4 sm:$0xff]  }
  0xe6   : > { %6988 = vmatpush1.bf16.msra.mxu1 %v10025_v21  ;;  %v10111_v21 = vld [vmem:[%s11782_s27 + $0x2c4] ss:$8 sps:$4 sm:$0xff]  }
  0xe7   : > { %7644 = vmatpush1.bf16.msra.mxu0 %v10028_v22  ;;  %6989 = vmatprep.subr.bf16.mxu1 %v10033_v23  ;;  %v10114_v22 = vld [vmem:[%s11782_s27 + $0x12c4] ss:$8 sps:$4 sm:$0xff]   ;;  %v10109_v23 = vld [vmem:[%s11782_s27 + $0x2c0] ss:$8 sps:$4 sm:$0xff]  }
  0xe8   : > { %7645 = vmatprep.subr.bf16.mxu0 %v10036_v24  ;;  %v10112_v24 = vld [vmem:[%s11782_s27 + $0x12c0] ss:$8 sps:$4 sm:$0xff]  }
  0xea   : > { %6990 = vmatpush1.bf16.msra.mxu1 %v10031_v53  ;;  %v10117_v53 = vld [vmem:[%s11782_s27 + $0x2d4] ss:$8 sps:$4 sm:$0xff]  }
  0xeb   : > { %7646 = vmatpush1.bf16.msra.mxu0 %v10034_v57  ;;  %7000 = vmatprep.subr.bf16.mxu1 %v10039_v27  ;;  %v10120_v57 = vld [vmem:[%s11782_s27 + $0x12d4] ss:$8 sps:$4 sm:$0xff]   ;;  %v10115_v27 = vld [vmem:[%s11782_s27 + $0x2d0] ss:$8 sps:$4 sm:$0xff]  }
  0xec   : > { %7656 = vmatprep.subr.bf16.mxu0 %v10042_v28  ;;  %v10118_v28 = vld [vmem:[%s11782_s27 + $0x12d0] ss:$8 sps:$4 sm:$0xff]  }
  0xed   : > { %6992 = vmatmul.mubr.bf16.vlgmr.msra.gmra.mrb[0].mxu1 %v1387_v31  ;;  %v10121_v31 = vld [vmem:[%s11782_s27 + $0x2e0] ss:$8 sps:$4 sm:$0xff]  }
  0xee   : > { %7648 = vmatmul.mubr.bf16.vlgmr.msra.gmra.mrb[0].mxu0 %v1583_v32  ;;  %7001 = vmatpush1.bf16.msra.mxu1 %v10037_v33  ;;  %v10124_v32 = vld [vmem:[%s11782_s27 + $0x12e0] ss:$8 sps:$4 sm:$0xff]   ;;  %v10129_v33 = vld [vmem:[%s11782_s27 + $0x2f4] ss:$8 sps:$4 sm:$0xff]  }
  0xef   : > { %7657 = vmatpush1.bf16.msra.mxu0 %v10040_v34  ;;  %7002 = vmatprep.subr.bf16.mxu1 %v10045_v35  ;;  %v10132_v34 = vld [vmem:[%s11782_s27 + $0x12f4] ss:$8 sps:$4 sm:$0xff]   ;;  %v10127_v35 = vld [vmem:[%s11782_s27 + $0x2f0] ss:$8 sps:$4 sm:$0xff]  }
  0xf0   : > { %7658 = vmatprep.subr.bf16.mxu0 %v10048_v36  ;;  %7032 = vmatprep.mubr.bf16.mxu1 %v11993_v37  ;;  %v10130_v36 = vld [vmem:[%s11782_s27 + $0x12f0] ss:$8 sps:$4 sm:$0xff]  }
  0xf1   : > { %7688 = vmatprep.mubr.bf16.mxu0 %v11996_v17 }
  0xf2   : > { %7003 = vmatpush1.bf16.msra.mxu1 %v10043_v18  ;;  %v10135_v18 = vld [vmem:[%s11782_s27 + $0x304] ss:$8 sps:$4 sm:$0xff]  }
  0xf3   : > { %7659 = vmatpush1.bf16.msra.mxu0 %v10046_v38  ;;  %7004 = vmatprep.subr.bf16.mxu1 %v10051_v39  ;;  %v10138_v38 = vld [vmem:[%s11782_s27 + $0x1304] ss:$8 sps:$4 sm:$0xff]   ;;  %v12062_v39 = vrot.slane %v11971_v25, %v11862_v50  ;;  %v1390_v25 = vcombine.high %v11993_v37, %v11993_v37 }
  0xf4   : > { %7660 = vmatprep.subr.bf16.mxu0 %v10054_v40  ;;  %v12066_v40 = vrot.slane %v11974_v26, %v11862_v50  ;;  %v10139_v26 = vld [vmem:[%s11782_s27 + $0x310] ss:$8 sps:$4 sm:$0xff]   ;;  %v10147_v37 = vld [vmem:[%s11782_s27 + $0x324] ss:$8 sps:$4 sm:$0xff]  }
  0xf6   : > { %7005 = vmatpush1.bf16.msra.mxu1 %v10049_v41  ;;  %v10133_v41 = vld [vmem:[%s11782_s27 + $0x300] ss:$8 sps:$4 sm:$0xff]  }
  0xf7   : > { %7661 = vmatpush1.bf16.msra.mxu0 %v10052_v42  ;;  %7006 = vmatprep.subr.bf16.mxu1 %v10057_v43  ;;  %v10136_v42 = vld [vmem:[%s11782_s27 + $0x1300] ss:$8 sps:$4 sm:$0xff]   ;;  %v10141_v43 = vld [vmem:[%s11782_s27 + $0x314] ss:$8 sps:$4 sm:$0xff]  }
  0xf8   : > { %7662 = vmatprep.subr.bf16.mxu0 %v10060_v45  ;;  %v10144_v45 = vld [vmem:[%s11782_s27 + $0x1314] ss:$8 sps:$4 sm:$0xff]  }
  0xfa   : > { %7007 = vmatpush1.bf16.msra.mxu1 %v10055_v46  ;;  %v1586_v46 = vcombine.high %v11996_v17, %v11996_v17  ;;  %v10145_v17 = vld [vmem:[%s11782_s27 + $0x320] ss:$8 sps:$4 sm:$0xff]  }
  0xfb   : > { %7663 = vmatpush1.bf16.msra.mxu0 %v10058_v47  ;;  %7008 = vmatprep.subr.bf16.mxu1 %v10063_v48  ;;  %v10142_v47 = vld [vmem:[%s11782_s27 + $0x1310] ss:$8 sps:$4 sm:$0xff]   ;;  %v10150_v48 = vld [vmem:[%s11782_s27 + $0x1324] ss:$8 sps:$4 sm:$0xff]  }
  0xfc   : > { %7664 = vmatprep.subr.bf16.mxu0 %v10066_v49  ;;  %v10148_v49 = vld [vmem:[%s11782_s27 + $0x1320] ss:$8 sps:$4 sm:$0xff]  }
  0xfe   : > { %7009 = vmatpush1.bf16.msra.mxu1 %v10061_v51  ;;  %v10153_v51 = vld [vmem:[%s11782_s27 + $0x334] ss:$8 sps:$4 sm:$0xff]  }
  0xff   : > { %7665 = vmatpush1.bf16.msra.mxu0 %v10064_v52  ;;  %7010 = vmatprep.subr.bf16.mxu1 %v10069_v54  ;;  %v10156_v52 = vld [vmem:[%s11782_s27 + $0x1334] ss:$8 sps:$4 sm:$0xff]   ;;  %v10151_v54 = vld [vmem:[%s11782_s27 + $0x330] ss:$8 sps:$4 sm:$0xff]  }
 0x100   : > { %7666 = vmatprep.subr.bf16.mxu0 %v10072_v55  ;;  %v10154_v55 = vld [vmem:[%s11782_s27 + $0x1330] ss:$8 sps:$4 sm:$0xff]  }
 0x102   : > { %7011 = vmatpush1.bf16.msra.mxu1 %v10067_v56  ;;  %v10159_v56 = vld [vmem:[%s11782_s27 + $0x344] ss:$8 sps:$4 sm:$0xff]  }
 0x103   : > { %7667 = vmatpush1.bf16.msra.mxu0 %v10070_v58  ;;  %7012 = vmatprep.subr.bf16.mxu1 %v10075_v59  ;;  %v10162_v58 = vld [vmem:[%s11782_s27 + $0x1344] ss:$8 sps:$4 sm:$0xff]   ;;  %v10157_v59 = vld [vmem:[%s11782_s27 + $0x340] ss:$8 sps:$4 sm:$0xff]  }
 0x104   : > { %7668 = vmatprep.subr.bf16.mxu0 %v10078_v60  ;;  %v10160_v60 = vld [vmem:[%s11782_s27 + $0x1340] ss:$8 sps:$4 sm:$0xff]  }
 0x106   : > { %7013 = vmatpush1.bf16.msra.mxu1 %v10073_v61  ;;  %v10165_v61 = vld [vmem:[%s11782_s27 + $0x354] ss:$8 sps:$4 sm:$0xff]  }
 0x107   : > { %7669 = vmatpush1.bf16.msra.mxu0 %v10076_v62  ;;  %7014 = vmatprep.subr.bf16.mxu1 %v10081_v63  ;;  %v10168_v62 = vld [vmem:[%s11782_s27 + $0x1354] ss:$8 sps:$4 sm:$0xff]   ;;  %v10163_v63 = vld [vmem:[%s11782_s27 + $0x350] ss:$8 sps:$4 sm:$0xff]  }
 0x108   : > { %7670 = vmatprep.subr.bf16.mxu0 %v10084_v0  ;;  %v10166_v0 = vld [vmem:[%s11782_s27 + $0x1350] ss:$8 sps:$4 sm:$0xff]  }
 0x10a   : > { %7015 = vmatpush1.bf16.msra.mxu1 %v10079_v1  ;;  %v10171_v1 = vld [vmem:[%s11782_s27 + $0x364] ss:$8 sps:$4 sm:$0xff]  }
 0x10b   : > { %7671 = vmatpush1.bf16.msra.mxu0 %v10082_v2  ;;  %7016 = vmatprep.subr.bf16.mxu1 %v10087_v3  ;;  %v10174_v2 = vld [vmem:[%s11782_s27 + $0x1364] ss:$8 sps:$4 sm:$0xff]   ;;  %v10169_v3 = vld [vmem:[%s11782_s27 + $0x360] ss:$8 sps:$4 sm:$0xff]  }
 0x10c   : > { %7672 = vmatprep.subr.bf16.mxu0 %v10090_v4  ;;  %v10172_v4 = vld [vmem:[%s11782_s27 + $0x1360] ss:$8 sps:$4 sm:$0xff]  }
 0x10e   : > { %7017 = vmatpush1.bf16.msra.mxu1 %v10085_v5  ;;  %v10177_v5 = vld [vmem:[%s11782_s27 + $0x374] ss:$8 sps:$4 sm:$0xff]  }
 0x10f   : > { %7673 = vmatpush1.bf16.msra.mxu0 %v10088_v6  ;;  %7018 = vmatprep.subr.bf16.mxu1 %v10093_v7  ;;  %v10180_v6 = vld [vmem:[%s11782_s27 + $0x1374] ss:$8 sps:$4 sm:$0xff]   ;;  %v10175_v7 = vld [vmem:[%s11782_s27 + $0x370] ss:$8 sps:$4 sm:$0xff]  }
 0x110   : > { %7674 = vmatprep.subr.bf16.mxu0 %v10096_v8  ;;  %v10178_v8 = vld [vmem:[%s11782_s27 + $0x1370] ss:$8 sps:$4 sm:$0xff]  }
 0x112   : > { %7019 = vmatpush1.bf16.msra.mxu1 %v10091_v9  ;;  %v10183_v9 = vld [vmem:[%s11782_s27 + $0x384] ss:$8 sps:$4 sm:$0xff]  }
 0x113   : > { %7675 = vmatpush1.bf16.msra.mxu0 %v10094_v10  ;;  %7020 = vmatprep.subr.bf16.mxu1 %v10099_v11  ;;  %v10186_v10 = vld [vmem:[%s11782_s27 + $0x1384] ss:$8 sps:$4 sm:$0xff]   ;;  %v10181_v11 = vld [vmem:[%s11782_s27 + $0x380] ss:$8 sps:$4 sm:$0xff]  }
 0x114   : > { %7676 = vmatprep.subr.bf16.mxu0 %v10102_v12  ;;  %v10184_v12 = vld [vmem:[%s11782_s27 + $0x1380] ss:$8 sps:$4 sm:$0xff]  }
 0x116   : > { %7021 = vmatpush1.bf16.msra.mxu1 %v10097_v13  ;;  %v10189_v13 = vld [vmem:[%s11782_s27 + $0x394] ss:$8 sps:$4 sm:$0xff]  }
 0x117   : > { %7677 = vmatpush1.bf16.msra.mxu0 %v10100_v14  ;;  %7022 = vmatprep.subr.bf16.mxu1 %v10105_v15  ;;  %v10192_v14 = vld [vmem:[%s11782_s27 + $0x1394] ss:$8 sps:$4 sm:$0xff]   ;;  %v10187_v15 = vld [vmem:[%s11782_s27 + $0x390] ss:$8 sps:$4 sm:$0xff]  }
 0x118   : > { %7678 = vmatprep.subr.bf16.mxu0 %v10108_v16  ;;  %v10190_v16 = vld [vmem:[%s11782_s27 + $0x1390] ss:$8 sps:$4 sm:$0xff]  }
 0x11a   : > { %7023 = vmatpush1.bf16.msra.mxu1 %v10103_v19  ;;  %v10195_v19 = vld [vmem:[%s11782_s27 + $0x3a4] ss:$8 sps:$4 sm:$0xff]  }
 0x11b   : > { %7679 = vmatpush1.bf16.msra.mxu0 %v10106_v20  ;;  %7024 = vmatprep.subr.bf16.mxu1 %v10111_v21  ;;  %v10198_v20 = vld [vmem:[%s11782_s27 + $0x13a4] ss:$8 sps:$4 sm:$0xff]   ;;  %v10193_v21 = vld [vmem:[%s11782_s27 + $0x3a0] ss:$8 sps:$4 sm:$0xff]  }
 0x11c   : > { %7680 = vmatprep.subr.bf16.mxu0 %v10114_v22  ;;  %v10196_v22 = vld [vmem:[%s11782_s27 + $0x13a0] ss:$8 sps:$4 sm:$0xff]  }
 0x11e   : > { %7025 = vmatpush1.bf16.msra.mxu1 %v10109_v23  ;;  %v10201_v23 = vld [vmem:[%s11782_s27 + $0x3b4] ss:$8 sps:$4 sm:$0xff]  }
 0x11f   : > { %7681 = vmatpush1.bf16.msra.mxu0 %v10112_v24  ;;  %7026 = vmatprep.subr.bf16.mxu1 %v10117_v53  ;;  %v10204_v24 = vld [vmem:[%s11782_s27 + $0x13b4] ss:$8 sps:$4 sm:$0xff]   ;;  %v10199_v53 = vld [vmem:[%s11782_s27 + $0x3b0] ss:$8 sps:$4 sm:$0xff]  }
 0x120   : > { %7682 = vmatprep.subr.bf16.mxu0 %v10120_v57  ;;  %v10202_v57 = vld [vmem:[%s11782_s27 + $0x13b0] ss:$8 sps:$4 sm:$0xff]  }
 0x122   : > { %7027 = vmatpush1.bf16.msra.mxu1 %v10115_v27  ;;  %v10207_v27 = vld [vmem:[%s11782_s27 + $0x3c4] ss:$8 sps:$4 sm:$0xff]  }
 0x123   : > { %7683 = vmatpush1.bf16.msra.mxu0 %v10118_v28  ;;  %7028 = vmatprep.subr.bf16.mxu1 %v10123_v29  ;;  %v10210_v28 = vld [vmem:[%s11782_s27 + $0x13c4] ss:$8 sps:$4 sm:$0xff]   ;;  %v10205_v29 = vld [vmem:[%s11782_s27 + $0x3c0] ss:$8 sps:$4 sm:$0xff]  }
 0x124   : > { %7684 = vmatprep.subr.bf16.mxu0 %v10126_v30  ;;  %v10208_v30 = vld [vmem:[%s11782_s27 + $0x13c0] ss:$8 sps:$4 sm:$0xff]  }
 0x126   : > { %7029 = vmatpush1.bf16.msra.mxu1 %v10121_v31  ;;  %v10213_v31 = vld [vmem:[%s11782_s27 + $0x3d4] ss:$8 sps:$4 sm:$0xff]  }
 0x127   : > { %7685 = vmatpush1.bf16.msra.mxu0 %v10124_v32  ;;  %7030 = vmatprep.subr.bf16.mxu1 %v10129_v33  ;;  %v10216_v32 = vld [vmem:[%s11782_s27 + $0x13d4] ss:$8 sps:$4 sm:$0xff]   ;;  %v10211_v33 = vld [vmem:[%s11782_s27 + $0x3d0] ss:$8 sps:$4 sm:$0xff]  }
 0x128   : > { %7686 = vmatprep.subr.bf16.mxu0 %v10132_v34  ;;  %v10214_v34 = vld [vmem:[%s11782_s27 + $0x13d0] ss:$8 sps:$4 sm:$0xff]  }
 0x12a   : > { %7031 = vmatpush1.bf16.msra.mxu1 %v10127_v35  ;;  %v10219_v35 = vld [vmem:[%s11782_s27 + $0x3e4] ss:$8 sps:$4 sm:$0xff]  }
 0x12b   : > { %7687 = vmatpush1.bf16.msra.mxu0 %v10130_v36  ;;  %7041 = vmatprep.subr.bf16.mxu1 %v10135_v18  ;;  %v10222_v36 = vld [vmem:[%s11782_s27 + $0x13e4] ss:$8 sps:$4 sm:$0xff]   ;;  %v10217_v18 = vld [vmem:[%s11782_s27 + $0x3e0] ss:$8 sps:$4 sm:$0xff]  }
 0x12c   : > { %7697 = vmatprep.subr.bf16.mxu0 %v10138_v38  ;;  %v10220_v38 = vld [vmem:[%s11782_s27 + $0x13e0] ss:$8 sps:$4 sm:$0xff]  }
 0x12d   : > { %7033 = vmatmul.mubr.bf16.vlgmr.msra.gmra.mrb[0].mxu1 %v12062_v39 }
 0x12e   : > { %7689 = vmatmul.mubr.bf16.vlgmr.msra.gmra.mrb[0].mxu0 %v12066_v40  ;;  %7042 = vmatpush1.bf16.msra.mxu1 %v10133_v41  ;;  %v12133_v41 = vld.sshfl [vmem:[%s11859_s10 + $0x8] sm:$0xff pattern:$0x75316420] }
 0x12f   : > { %7698 = vmatpush1.bf16.msra.mxu0 %v10136_v42  ;;  %7043 = vmatprep.subr.bf16.mxu1 %v10141_v43  ;;  %v12136_v42 = vld.sshfl [vmem:[%s11859_s10 + $0x28] sm:$0xff pattern:$0x75316420]  ;;  %v10225_v43 = vld [vmem:[%s11782_s27 + $0x3f4] ss:$8 sps:$4 sm:$0xff]  }
 0x130   : > { %7699 = vmatprep.subr.bf16.mxu0 %v10144_v45  ;;  %7073 = vmatprep.mubr.bf16.mxu1 %v1390_v25  ;;  %v10228_v45 = vld [vmem:[%s11782_s27 + $0x13f4] ss:$8 sps:$4 sm:$0xff]   ;;  %v10223_v25 = vld [vmem:[%s11782_s27 + $0x3f0] ss:$8 sps:$4 sm:$0xff]  }
 0x131   : > { %7729 = vmatprep.mubr.bf16.mxu0 %v1586_v46  ;;  %v10226_v46 = vld [vmem:[%s11782_s27 + $0x13f0] ss:$8 sps:$4 sm:$0xff]  }
 0x132   : > { %7044 = vmatpush1.bf16.msra.mxu1 %v10139_v26  ;;  %v10231_v26 = vld [vmem:[%s11782_s27 + $0x404] ss:$8 sps:$4 sm:$0xff]  }
 0x133   : > { %7700 = vmatpush1.bf16.msra.mxu0 %v10142_v47  ;;  %7045 = vmatprep.subr.bf16.mxu1 %v10147_v37  ;;  %v10234_v47 = vld [vmem:[%s11782_s27 + $0x1404] ss:$8 sps:$4 sm:$0xff]   ;;  %v1406_v37 = vcombine.high %v12133_v41, %v12133_v41 }
 0x134   : > { %7701 = vmatprep.subr.bf16.mxu0 %v10150_v48  ;;  %v1602_v48 = vcombine.high %v12136_v42, %v12136_v42 }
 0x136   : > { %7046 = vmatpush1.bf16.msra.mxu1 %v10145_v17  ;;  %v10229_v17 = vld [vmem:[%s11782_s27 + $0x400] ss:$8 sps:$4 sm:$0xff]  }
 0x137   : > { %7702 = vmatpush1.bf16.msra.mxu0 %v10148_v49  ;;  %7047 = vmatprep.subr.bf16.mxu1 %v10153_v51  ;;  %v10232_v49 = vld [vmem:[%s11782_s27 + $0x1400] ss:$8 sps:$4 sm:$0xff]   ;;  %v1388_v51 = vcombine.high %v12062_v39, %v12062_v39  ;;  %v10235_v39 = vld [vmem:[%s11782_s27 + $0x410] ss:$8 sps:$4 sm:$0xff]  }
 0x138   : > { %7703 = vmatprep.subr.bf16.mxu0 %v10156_v52  ;;  %v1584_v52 = vcombine.high %v12066_v40, %v12066_v40  ;;  %v10238_v40 = vld [vmem:[%s11782_s27 + $0x1410] ss:$8 sps:$4 sm:$0xff]  }
 0x13a   : > { %7048 = vmatpush1.bf16.msra.mxu1 %v10151_v54  ;;  %v10237_v54 = vld [vmem:[%s11782_s27 + $0x414] ss:$8 sps:$4 sm:$0xff]  }
 0x13b   : > { %7704 = vmatpush1.bf16.msra.mxu0 %v10154_v55  ;;  %7049 = vmatprep.subr.bf16.mxu1 %v10159_v56  ;;  %v10240_v55 = vld [vmem:[%s11782_s27 + $0x1414] ss:$8 sps:$4 sm:$0xff]   ;;  %v12157_v56 = vrot.slane %v1406_v37, %v11862_v50  ;;  %v10315_v37 = vld [vmem:[%s11782_s27 + $0x4e4] ss:$8 sps:$4 sm:$0xff]  }
 0x13c   : > { %7705 = vmatprep.subr.bf16.mxu0 %v10162_v58  ;;  %v12160_v58 = vrot.slane %v1602_v48, %v11862_v50  ;;  %v10318_v48 = vld [vmem:[%s11782_s27 + $0x14e4] ss:$8 sps:$4 sm:$0xff]  }
 0x13e   : > { %7050 = vmatpush1.bf16.msra.mxu1 %v10157_v59  ;;  %v10243_v59 = vld [vmem:[%s11782_s27 + $0x424] ss:$8 sps:$4 sm:$0xff]  }
 0x13f   : > { %7706 = vmatpush1.bf16.msra.mxu0 %v10160_v60  ;;  %7051 = vmatprep.subr.bf16.mxu1 %v10165_v61  ;;  %v10246_v60 = vld [vmem:[%s11782_s27 + $0x1424] ss:$8 sps:$4 sm:$0xff]   ;;  %v10241_v61 = vld [vmem:[%s11782_s27 + $0x420] ss:$8 sps:$4 sm:$0xff]  }
 0x140   : > { %7707 = vmatprep.subr.bf16.mxu0 %v10168_v62  ;;  %v10244_v62 = vld [vmem:[%s11782_s27 + $0x1420] ss:$8 sps:$4 sm:$0xff]  }
 0x142   : > { %7052 = vmatpush1.bf16.msra.mxu1 %v10163_v63  ;;  %v10249_v63 = vld [vmem:[%s11782_s27 + $0x434] ss:$8 sps:$4 sm:$0xff]  }
 0x143   : > { %7708 = vmatpush1.bf16.msra.mxu0 %v10166_v0  ;;  %7053 = vmatprep.subr.bf16.mxu1 %v10171_v1  ;;  %v10252_v0 = vld [vmem:[%s11782_s27 + $0x1434] ss:$8 sps:$4 sm:$0xff]   ;;  %v10247_v1 = vld [vmem:[%s11782_s27 + $0x430] ss:$8 sps:$4 sm:$0xff]  }
 0x144   : > { %7709 = vmatprep.subr.bf16.mxu0 %v10174_v2  ;;  %v10250_v2 = vld [vmem:[%s11782_s27 + $0x1430] ss:$8 sps:$4 sm:$0xff]  }
 0x146   : > { %7054 = vmatpush1.bf16.msra.mxu1 %v10169_v3  ;;  %v10255_v3 = vld [vmem:[%s11782_s27 + $0x444] ss:$8 sps:$4 sm:$0xff]  }
 0x147   : > { %7710 = vmatpush1.bf16.msra.mxu0 %v10172_v4  ;;  %7055 = vmatprep.subr.bf16.mxu1 %v10177_v5  ;;  %v10258_v4 = vld [vmem:[%s11782_s27 + $0x1444] ss:$8 sps:$4 sm:$0xff]   ;;  %v10253_v5 = vld [vmem:[%s11782_s27 + $0x440] ss:$8 sps:$4 sm:$0xff]  }
 0x148   : > { %7711 = vmatprep.subr.bf16.mxu0 %v10180_v6  ;;  %v10256_v6 = vld [vmem:[%s11782_s27 + $0x1440] ss:$8 sps:$4 sm:$0xff]  }
 0x14a   : > { %7056 = vmatpush1.bf16.msra.mxu1 %v10175_v7  ;;  %v10261_v7 = vld [vmem:[%s11782_s27 + $0x454] ss:$8 sps:$4 sm:$0xff]  }
 0x14b   : > { %7712 = vmatpush1.bf16.msra.mxu0 %v10178_v8  ;;  %7057 = vmatprep.subr.bf16.mxu1 %v10183_v9  ;;  %v10264_v8 = vld [vmem:[%s11782_s27 + $0x1454] ss:$8 sps:$4 sm:$0xff]   ;;  %v10259_v9 = vld [vmem:[%s11782_s27 + $0x450] ss:$8 sps:$4 sm:$0xff]  }
 0x14c   : > { %7713 = vmatprep.subr.bf16.mxu0 %v10186_v10  ;;  %v10262_v10 = vld [vmem:[%s11782_s27 + $0x1450] ss:$8 sps:$4 sm:$0xff]  }
 0x14e   : > { %7058 = vmatpush1.bf16.msra.mxu1 %v10181_v11  ;;  %v10267_v11 = vld [vmem:[%s11782_s27 + $0x464] ss:$8 sps:$4 sm:$0xff]  }
 0x14f   : > { %7714 = vmatpush1.bf16.msra.mxu0 %v10184_v12  ;;  %7059 = vmatprep.subr.bf16.mxu1 %v10189_v13  ;;  %v10270_v12 = vld [vmem:[%s11782_s27 + $0x1464] ss:$8 sps:$4 sm:$0xff]   ;;  %v10265_v13 = vld [vmem:[%s11782_s27 + $0x460] ss:$8 sps:$4 sm:$0xff]  }
 0x150   : > { %7715 = vmatprep.subr.bf16.mxu0 %v10192_v14  ;;  %v10268_v14 = vld [vmem:[%s11782_s27 + $0x1460] ss:$8 sps:$4 sm:$0xff]  }
 0x152   : > { %7060 = vmatpush1.bf16.msra.mxu1 %v10187_v15  ;;  %v10273_v15 = vld [vmem:[%s11782_s27 + $0x474] ss:$8 sps:$4 sm:$0xff]  }
 0x153   : > { %7716 = vmatpush1.bf16.msra.mxu0 %v10190_v16  ;;  %7061 = vmatprep.subr.bf16.mxu1 %v10195_v19  ;;  %v10276_v16 = vld [vmem:[%s11782_s27 + $0x1474] ss:$8 sps:$4 sm:$0xff]   ;;  %v10271_v19 = vld [vmem:[%s11782_s27 + $0x470] ss:$8 sps:$4 sm:$0xff]  }
 0x154   : > { %7717 = vmatprep.subr.bf16.mxu0 %v10198_v20  ;;  %v10274_v20 = vld [vmem:[%s11782_s27 + $0x1470] ss:$8 sps:$4 sm:$0xff]  }
 0x156   : > { %7062 = vmatpush1.bf16.msra.mxu1 %v10193_v21  ;;  %v10279_v21 = vld [vmem:[%s11782_s27 + $0x484] ss:$8 sps:$4 sm:$0xff]  }
 0x157   : > { %7718 = vmatpush1.bf16.msra.mxu0 %v10196_v22  ;;  %7063 = vmatprep.subr.bf16.mxu1 %v10201_v23  ;;  %v10282_v22 = vld [vmem:[%s11782_s27 + $0x1484] ss:$8 sps:$4 sm:$0xff]   ;;  %v10277_v23 = vld [vmem:[%s11782_s27 + $0x480] ss:$8 sps:$4 sm:$0xff]  }
 0x158   : > { %7719 = vmatprep.subr.bf16.mxu0 %v10204_v24  ;;  %v10280_v24 = vld [vmem:[%s11782_s27 + $0x1480] ss:$8 sps:$4 sm:$0xff]  }
 0x15a   : > { %7064 = vmatpush1.bf16.msra.mxu1 %v10199_v53  ;;  %v10285_v53 = vld [vmem:[%s11782_s27 + $0x494] ss:$8 sps:$4 sm:$0xff]  }
 0x15b   : > { %7720 = vmatpush1.bf16.msra.mxu0 %v10202_v57  ;;  %7065 = vmatprep.subr.bf16.mxu1 %v10207_v27  ;;  %v10288_v57 = vld [vmem:[%s11782_s27 + $0x1494] ss:$8 sps:$4 sm:$0xff]   ;;  %v10283_v27 = vld [vmem:[%s11782_s27 + $0x490] ss:$8 sps:$4 sm:$0xff]  }
 0x15c   : > { %7721 = vmatprep.subr.bf16.mxu0 %v10210_v28  ;;  %v10286_v28 = vld [vmem:[%s11782_s27 + $0x1490] ss:$8 sps:$4 sm:$0xff]  }
 0x15e   : > { %7066 = vmatpush1.bf16.msra.mxu1 %v10205_v29  ;;  %v10291_v29 = vld [vmem:[%s11782_s27 + $0x4a4] ss:$8 sps:$4 sm:$0xff]  }
 0x15f   : > { %7722 = vmatpush1.bf16.msra.mxu0 %v10208_v30  ;;  %7067 = vmatprep.subr.bf16.mxu1 %v10213_v31  ;;  %v10294_v30 = vld [vmem:[%s11782_s27 + $0x14a4] ss:$8 sps:$4 sm:$0xff]   ;;  %v10289_v31 = vld [vmem:[%s11782_s27 + $0x4a0] ss:$8 sps:$4 sm:$0xff]  }
 0x160   : > { %7723 = vmatprep.subr.bf16.mxu0 %v10216_v32  ;;  %v10292_v32 = vld [vmem:[%s11782_s27 + $0x14a0] ss:$8 sps:$4 sm:$0xff]  }
 0x162   : > { %7068 = vmatpush1.bf16.msra.mxu1 %v10211_v33  ;;  %v10297_v33 = vld [vmem:[%s11782_s27 + $0x4b4] ss:$8 sps:$4 sm:$0xff]  }
 0x163   : > { %7724 = vmatpush1.bf16.msra.mxu0 %v10214_v34  ;;  %7069 = vmatprep.subr.bf16.mxu1 %v10219_v35  ;;  %v10300_v34 = vld [vmem:[%s11782_s27 + $0x14b4] ss:$8 sps:$4 sm:$0xff]   ;;  %v10295_v35 = vld [vmem:[%s11782_s27 + $0x4b0] ss:$8 sps:$4 sm:$0xff]  }
 0x164   : > { %7725 = vmatprep.subr.bf16.mxu0 %v10222_v36  ;;  %v10298_v36 = vld [vmem:[%s11782_s27 + $0x14b0] ss:$8 sps:$4 sm:$0xff]  }
 0x166   : > { %7070 = vmatpush1.bf16.msra.mxu1 %v10217_v18  ;;  %v10303_v18 = vld [vmem:[%s11782_s27 + $0x4c4] ss:$8 sps:$4 sm:$0xff]  }
 0x167   : > { %7726 = vmatpush1.bf16.msra.mxu0 %v10220_v38  ;;  %7071 = vmatprep.subr.bf16.mxu1 %v10225_v43  ;;  %v10306_v38 = vld [vmem:[%s11782_s27 + $0x14c4] ss:$8 sps:$4 sm:$0xff]   ;;  %v10301_v43 = vld [vmem:[%s11782_s27 + $0x4c0] ss:$8 sps:$4 sm:$0xff]  }
 0x168   : > { %7727 = vmatprep.subr.bf16.mxu0 %v10228_v45  ;;  %v10304_v45 = vld [vmem:[%s11782_s27 + $0x14c0] ss:$8 sps:$4 sm:$0xff]  }
 0x16a   : > { %7072 = vmatpush1.bf16.msra.mxu1 %v10223_v25  ;;  %v10309_v25 = vld [vmem:[%s11782_s27 + $0x4d4] ss:$8 sps:$4 sm:$0xff]  }
 0x16b   : > { %7728 = vmatpush1.bf16.msra.mxu0 %v10226_v46  ;;  %7082 = vmatprep.subr.bf16.mxu1 %v10231_v26  ;;  %v10312_v46 = vld [vmem:[%s11782_s27 + $0x14d4] ss:$8 sps:$4 sm:$0xff]   ;;  %v10307_v26 = vld [vmem:[%s11782_s27 + $0x4d0] ss:$8 sps:$4 sm:$0xff]  }
 0x16c   : > { %7738 = vmatprep.subr.bf16.mxu0 %v10234_v47  ;;  %v10310_v47 = vld [vmem:[%s11782_s27 + $0x14d0] ss:$8 sps:$4 sm:$0xff]  }
 0x16d   : > { %7074 = vmatmul.mubr.bf16.vlgmr.msra.gmra.mrb[0].mxu1 %v1388_v51  ;;  %v10321_v51 = vld [vmem:[%s11782_s27 + $0x4f4] ss:$8 sps:$4 sm:$0xff]  }
 0x16e   : > { %7730 = vmatmul.mubr.bf16.vlgmr.msra.gmra.mrb[0].mxu0 %v1584_v52  ;;  %7083 = vmatpush1.bf16.msra.mxu1 %v10229_v17  ;;  %v10313_v17 = vld [vmem:[%s11782_s27 + $0x4e0] ss:$8 sps:$4 sm:$0xff]   ;;  %v10324_v52 = vld [vmem:[%s11782_s27 + $0x14f4] ss:$8 sps:$4 sm:$0xff]  }
 0x16f   : > { %7739 = vmatpush1.bf16.msra.mxu0 %v10232_v49  ;;  %7084 = vmatprep.subr.bf16.mxu1 %v10237_v54  ;;  %v10316_v49 = vld [vmem:[%s11782_s27 + $0x14e0] ss:$8 sps:$4 sm:$0xff]   ;;  %v10319_v54 = vld [vmem:[%s11782_s27 + $0x4f0] ss:$8 sps:$4 sm:$0xff]  }
 0x170   : > { %7740 = vmatprep.subr.bf16.mxu0 %v10240_v55  ;;  %7114 = vmatprep.mubr.bf16.mxu1 %v12157_v56  ;;  %v10322_v55 = vld [vmem:[%s11782_s27 + $0x14f0] ss:$8 sps:$4 sm:$0xff]  }
 0x171   : > { %7770 = vmatprep.mubr.bf16.mxu0 %v12160_v58 }
 0x172   : > { %7085 = vmatpush1.bf16.msra.mxu1 %v10235_v39  ;;  %v10327_v39 = vld [vmem:[%s11782_s27 + $0x504] ss:$8 sps:$4 sm:$0xff]  }
 0x173   : > { %7741 = vmatpush1.bf16.msra.mxu0 %v10238_v40  ;;  %7086 = vmatprep.subr.bf16.mxu1 %v10243_v59  ;;  %v10330_v40 = vld [vmem:[%s11782_s27 + $0x1504] ss:$8 sps:$4 sm:$0xff]   ;;  %v12226_v59 = vrot.slane %v12133_v41, %v11862_v50  ;;  %v1438_v41 = vcombine.high %v12157_v56, %v12157_v56 }
 0x174   : > { %7742 = vmatprep.subr.bf16.mxu0 %v10246_v60  ;;  %v12230_v60 = vrot.slane %v12136_v42, %v11862_v50  ;;  %v10331_v42 = vld [vmem:[%s11782_s27 + $0x510] ss:$8 sps:$4 sm:$0xff]   ;;  %v10339_v56 = vld [vmem:[%s11782_s27 + $0x524] ss:$8 sps:$4 sm:$0xff]  }
 0x176   : > { %7087 = vmatpush1.bf16.msra.mxu1 %v10241_v61  ;;  %v10325_v61 = vld [vmem:[%s11782_s27 + $0x500] ss:$8 sps:$4 sm:$0xff]  }
 0x177   : > { %7743 = vmatpush1.bf16.msra.mxu0 %v10244_v62  ;;  %7088 = vmatprep.subr.bf16.mxu1 %v10249_v63  ;;  %v10328_v62 = vld [vmem:[%s11782_s27 + $0x1500] ss:$8 sps:$4 sm:$0xff]   ;;  %v10333_v63 = vld [vmem:[%s11782_s27 + $0x514] ss:$8 sps:$4 sm:$0xff]  }
 0x178   : > { %7744 = vmatprep.subr.bf16.mxu0 %v10252_v0  ;;  %v10336_v0 = vld [vmem:[%s11782_s27 + $0x1514] ss:$8 sps:$4 sm:$0xff]  }
 0x17a   : > { %7089 = vmatpush1.bf16.msra.mxu1 %v10247_v1  ;;  %v1634_v1 = vcombine.high %v12160_v58, %v12160_v58  ;;  %v10337_v58 = vld [vmem:[%s11782_s27 + $0x520] ss:$8 sps:$4 sm:$0xff]  }
 0x17b   : > { %7745 = vmatpush1.bf16.msra.mxu0 %v10250_v2  ;;  %7090 = vmatprep.subr.bf16.mxu1 %v10255_v3  ;;  %v10334_v2 = vld [vmem:[%s11782_s27 + $0x1510] ss:$8 sps:$4 sm:$0xff]   ;;  %v10342_v3 = vld [vmem:[%s11782_s27 + $0x1524] ss:$8 sps:$4 sm:$0xff]  }
 0x17c   : > { %7746 = vmatprep.subr.bf16.mxu0 %v10258_v4  ;;  %v10340_v4 = vld [vmem:[%s11782_s27 + $0x1520] ss:$8 sps:$4 sm:$0xff]  }
 0x17e   : > { %7091 = vmatpush1.bf16.msra.mxu1 %v10253_v5  ;;  %v10345_v5 = vld [vmem:[%s11782_s27 + $0x534] ss:$8 sps:$4 sm:$0xff]  }
 0x17f   : > { %7747 = vmatpush1.bf16.msra.mxu0 %v10256_v6  ;;  %7092 = vmatprep.subr.bf16.mxu1 %v10261_v7  ;;  %v10348_v6 = vld [vmem:[%s11782_s27 + $0x1534] ss:$8 sps:$4 sm:$0xff]   ;;  %v10343_v7 = vld [vmem:[%s11782_s27 + $0x530] ss:$8 sps:$4 sm:$0xff]  }
 0x180   : > { %7748 = vmatprep.subr.bf16.mxu0 %v10264_v8  ;;  %v10346_v8 = vld [vmem:[%s11782_s27 + $0x1530] ss:$8 sps:$4 sm:$0xff]  }
 0x182   : > { %7093 = vmatpush1.bf16.msra.mxu1 %v10259_v9  ;;  %v10351_v9 = vld [vmem:[%s11782_s27 + $0x544] ss:$8 sps:$4 sm:$0xff]  }
 0x183   : > { %7749 = vmatpush1.bf16.msra.mxu0 %v10262_v10  ;;  %7094 = vmatprep.subr.bf16.mxu1 %v10267_v11  ;;  %v10354_v10 = vld [vmem:[%s11782_s27 + $0x1544] ss:$8 sps:$4 sm:$0xff]   ;;  %v10349_v11 = vld [vmem:[%s11782_s27 + $0x540] ss:$8 sps:$4 sm:$0xff]  }
 0x184   : > { %7750 = vmatprep.subr.bf16.mxu0 %v10270_v12  ;;  %v10352_v12 = vld [vmem:[%s11782_s27 + $0x1540] ss:$8 sps:$4 sm:$0xff]  }
 0x186   : > { %7095 = vmatpush1.bf16.msra.mxu1 %v10265_v13  ;;  %v10357_v13 = vld [vmem:[%s11782_s27 + $0x554] ss:$8 sps:$4 sm:$0xff]  }
 0x187   : > { %7751 = vmatpush1.bf16.msra.mxu0 %v10268_v14  ;;  %7096 = vmatprep.subr.bf16.mxu1 %v10273_v15  ;;  %v10360_v14 = vld [vmem:[%s11782_s27 + $0x1554] ss:$8 sps:$4 sm:$0xff]   ;;  %v10355_v15 = vld [vmem:[%s11782_s27 + $0x550] ss:$8 sps:$4 sm:$0xff]  }
 0x188   : > { %7752 = vmatprep.subr.bf16.mxu0 %v10276_v16  ;;  %v10358_v16 = vld [vmem:[%s11782_s27 + $0x1550] ss:$8 sps:$4 sm:$0xff]  }
 0x18a   : > { %7097 = vmatpush1.bf16.msra.mxu1 %v10271_v19  ;;  %v10363_v19 = vld [vmem:[%s11782_s27 + $0x564] ss:$8 sps:$4 sm:$0xff]  }
 0x18b   : > { %7753 = vmatpush1.bf16.msra.mxu0 %v10274_v20  ;;  %7098 = vmatprep.subr.bf16.mxu1 %v10279_v21  ;;  %v10366_v20 = vld [vmem:[%s11782_s27 + $0x1564] ss:$8 sps:$4 sm:$0xff]   ;;  %v10361_v21 = vld [vmem:[%s11782_s27 + $0x560] ss:$8 sps:$4 sm:$0xff]  }
 0x18c   : > { %7754 = vmatprep.subr.bf16.mxu0 %v10282_v22  ;;  %v10364_v22 = vld [vmem:[%s11782_s27 + $0x1560] ss:$8 sps:$4 sm:$0xff]  }
 0x18e   : > { %7099 = vmatpush1.bf16.msra.mxu1 %v10277_v23  ;;  %v10369_v23 = vld [vmem:[%s11782_s27 + $0x574] ss:$8 sps:$4 sm:$0xff]  }
 0x18f   : > { %7755 = vmatpush1.bf16.msra.mxu0 %v10280_v24  ;;  %7100 = vmatprep.subr.bf16.mxu1 %v10285_v53  ;;  %v10372_v24 = vld [vmem:[%s11782_s27 + $0x1574] ss:$8 sps:$4 sm:$0xff]   ;;  %v10367_v53 = vld [vmem:[%s11782_s27 + $0x570] ss:$8 sps:$4 sm:$0xff]  }
 0x190   : > { %7756 = vmatprep.subr.bf16.mxu0 %v10288_v57  ;;  %v10370_v57 = vld [vmem:[%s11782_s27 + $0x1570] ss:$8 sps:$4 sm:$0xff]  }
 0x192   : > { %7101 = vmatpush1.bf16.msra.mxu1 %v10283_v27  ;;  %v10375_v27 = vld [vmem:[%s11782_s27 + $0x584] ss:$8 sps:$4 sm:$0xff]  }
 0x193   : > { %7757 = vmatpush1.bf16.msra.mxu0 %v10286_v28  ;;  %7102 = vmatprep.subr.bf16.mxu1 %v10291_v29  ;;  %v10378_v28 = vld [vmem:[%s11782_s27 + $0x1584] ss:$8 sps:$4 sm:$0xff]   ;;  %v10373_v29 = vld [vmem:[%s11782_s27 + $0x580] ss:$8 sps:$4 sm:$0xff]  }
 0x194   : > { %7758 = vmatprep.subr.bf16.mxu0 %v10294_v30  ;;  %v10376_v30 = vld [vmem:[%s11782_s27 + $0x1580] ss:$8 sps:$4 sm:$0xff]  }
 0x196   : > { %7103 = vmatpush1.bf16.msra.mxu1 %v10289_v31  ;;  %v10381_v31 = vld [vmem:[%s11782_s27 + $0x594] ss:$8 sps:$4 sm:$0xff]  }
 0x197   : > { %7759 = vmatpush1.bf16.msra.mxu0 %v10292_v32  ;;  %7104 = vmatprep.subr.bf16.mxu1 %v10297_v33  ;;  %v10384_v32 = vld [vmem:[%s11782_s27 + $0x1594] ss:$8 sps:$4 sm:$0xff]   ;;  %v10379_v33 = vld [vmem:[%s11782_s27 + $0x590] ss:$8 sps:$4 sm:$0xff]  }
 0x198   : > { %7760 = vmatprep.subr.bf16.mxu0 %v10300_v34  ;;  %v10382_v34 = vld [vmem:[%s11782_s27 + $0x1590] ss:$8 sps:$4 sm:$0xff]  }
 0x19a   : > { %7105 = vmatpush1.bf16.msra.mxu1 %v10295_v35  ;;  %v10387_v35 = vld [vmem:[%s11782_s27 + $0x5a4] ss:$8 sps:$4 sm:$0xff]  }
 0x19b   : > { %7761 = vmatpush1.bf16.msra.mxu0 %v10298_v36  ;;  %7106 = vmatprep.subr.bf16.mxu1 %v10303_v18  ;;  %v10390_v36 = vld [vmem:[%s11782_s27 + $0x15a4] ss:$8 sps:$4 sm:$0xff]   ;;  %v10385_v18 = vld [vmem:[%s11782_s27 + $0x5a0] ss:$8 sps:$4 sm:$0xff]  }
 0x19c   : > { %7762 = vmatprep.subr.bf16.mxu0 %v10306_v38  ;;  %v10388_v38 = vld [vmem:[%s11782_s27 + $0x15a0] ss:$8 sps:$4 sm:$0xff]  }
 0x19e   : > { %7107 = vmatpush1.bf16.msra.mxu1 %v10301_v43  ;;  %v10393_v43 = vld [vmem:[%s11782_s27 + $0x5b4] ss:$8 sps:$4 sm:$0xff]  }
 0x19f   : > { %7763 = vmatpush1.bf16.msra.mxu0 %v10304_v45  ;;  %7108 = vmatprep.subr.bf16.mxu1 %v10309_v25  ;;  %v10396_v45 = vld [vmem:[%s11782_s27 + $0x15b4] ss:$8 sps:$4 sm:$0xff]   ;;  %v10391_v25 = vld [vmem:[%s11782_s27 + $0x5b0] ss:$8 sps:$4 sm:$0xff]  }
 0x1a0   : > { %7764 = vmatprep.subr.bf16.mxu0 %v10312_v46  ;;  %v10394_v46 = vld [vmem:[%s11782_s27 + $0x15b0] ss:$8 sps:$4 sm:$0xff]  }
 0x1a2   : > { %7109 = vmatpush1.bf16.msra.mxu1 %v10307_v26  ;;  %v10399_v26 = vld [vmem:[%s11782_s27 + $0x5c4] ss:$8 sps:$4 sm:$0xff]  }
 0x1a3   : > { %7765 = vmatpush1.bf16.msra.mxu0 %v10310_v47  ;;  %7110 = vmatprep.subr.bf16.mxu1 %v10315_v37  ;;  %v10402_v47 = vld [vmem:[%s11782_s27 + $0x15c4] ss:$8 sps:$4 sm:$0xff]   ;;  %v10397_v37 = vld [vmem:[%s11782_s27 + $0x5c0] ss:$8 sps:$4 sm:$0xff]  }
 0x1a4   : > { %7766 = vmatprep.subr.bf16.mxu0 %v10318_v48  ;;  %v10400_v48 = vld [vmem:[%s11782_s27 + $0x15c0] ss:$8 sps:$4 sm:$0xff]  }
 0x1a6   : > { %7111 = vmatpush1.bf16.msra.mxu1 %v10313_v17  ;;  %v10405_v17 = vld [vmem:[%s11782_s27 + $0x5d4] ss:$8 sps:$4 sm:$0xff]  }
 0x1a7   : > { %7767 = vmatpush1.bf16.msra.mxu0 %v10316_v49  ;;  %7112 = vmatprep.subr.bf16.mxu1 %v10321_v51  ;;  %v10408_v49 = vld [vmem:[%s11782_s27 + $0x15d4] ss:$8 sps:$4 sm:$0xff]   ;;  %v10403_v51 = vld [vmem:[%s11782_s27 + $0x5d0] ss:$8 sps:$4 sm:$0xff]  }
 0x1a8   : > { %7768 = vmatprep.subr.bf16.mxu0 %v10324_v52  ;;  %v10406_v52 = vld [vmem:[%s11782_s27 + $0x15d0] ss:$8 sps:$4 sm:$0xff]  }
 0x1aa   : > { %7113 = vmatpush1.bf16.msra.mxu1 %v10319_v54  ;;  %v10411_v54 = vld [vmem:[%s11782_s27 + $0x5e4] ss:$8 sps:$4 sm:$0xff]  }
 0x1ab   : > { %7769 = vmatpush1.bf16.msra.mxu0 %v10322_v55  ;;  %7123 = vmatprep.subr.bf16.mxu1 %v10327_v39  ;;  %v10414_v55 = vld [vmem:[%s11782_s27 + $0x15e4] ss:$8 sps:$4 sm:$0xff]  }
 0x1ac   : > { %7779 = vmatprep.subr.bf16.mxu0 %v10330_v40  ;;  %v11387_v39 = vld [vmem:[%s11859_s10 + $0x8] sm:$0xff] }
 0x1ad   : > { %7115 = vmatmul.mubr.bf16.vlgmr.msra.gmra.mrb[0].mxu1 %v12226_v59  ;;  %v1391_v40 = vcombine.high %v11387_v39, %v11387_v39  ;;  %v10489_v39 = vld [vmem:[%s11782_s27 + $0x6b4] ss:$8 sps:$4 sm:$0xff]  }
 0x1ae   : > { %7771 = vmatmul.mubr.bf16.vlgmr.msra.gmra.mrb[0].mxu0 %v12230_v60  ;;  %7124 = vmatpush1.bf16.msra.mxu1 %v10325_v61  ;;  %v11388_v61 = vld [vmem:[%s11859_s10 + $0x28] sm:$0xff] }
 0x1af   : > { %7780 = vmatpush1.bf16.msra.mxu0 %v10328_v62  ;;  %7125 = vmatprep.subr.bf16.mxu1 %v10333_v63  ;;  %v1587_v62 = vcombine.high %v11388_v61, %v11388_v61  ;;  %v10409_v63 = vld [vmem:[%s11782_s27 + $0x5e0] ss:$8 sps:$4 sm:$0xff]   ;;  %v10487_v61 = vld [vmem:[%s11782_s27 + $0x6b0] ss:$8 sps:$4 sm:$0xff]  }
 0x1b0   : > { %7781 = vmatprep.subr.bf16.mxu0 %v10336_v0  ;;  %7155 = vmatprep.mubr.bf16.mxu1 %v1438_v41  ;;  %v10412_v0 = vld [vmem:[%s11782_s27 + $0x15e0] ss:$8 sps:$4 sm:$0xff]   ;;  %v10417_v41 = vld [vmem:[%s11782_s27 + $0x5f4] ss:$8 sps:$4 sm:$0xff]  }
 0x1b1   : > { %7811 = vmatprep.mubr.bf16.mxu0 %v1634_v1  ;;  %v10420_v1 = vld [vmem:[%s11782_s27 + $0x15f4] ss:$8 sps:$4 sm:$0xff]  }
 0x1b2   : > { %7126 = vmatpush1.bf16.msra.mxu1 %v10331_v42  ;;  %v12301_v42 = vrot.slane %v1391_v40, %v11862_v50  ;;  %v10492_v40 = vld [vmem:[%s11782_s27 + $0x16b4] ss:$8 sps:$4 sm:$0xff]  }
 0x1b3   : > { %7782 = vmatpush1.bf16.msra.mxu0 %v10334_v2  ;;  %7127 = vmatprep.subr.bf16.mxu1 %v10339_v56  ;;  %v12304_v2 = vrot.slane %v1587_v62, %v11862_v50  ;;  %v10415_v56 = vld [vmem:[%s11782_s27 + $0x5f0] ss:$8 sps:$4 sm:$0xff]  }
 0x1b4   : > { %7783 = vmatprep.subr.bf16.mxu0 %v10342_v3  ;;  %v10418_v3 = vld [vmem:[%s11782_s27 + $0x15f0] ss:$8 sps:$4 sm:$0xff]  }
 0x1b5   : > { %v10490_v62 = vld [vmem:[%s11782_s27 + $0x16b0] ss:$8 sps:$4 sm:$0xff]  }
 0x1b6   : > { %7128 = vmatpush1.bf16.msra.mxu1 %v10337_v58  ;;  %v10423_v58 = vld [vmem:[%s11782_s27 + $0x604] ss:$8 sps:$4 sm:$0xff]  }
 0x1b7   : > { %7784 = vmatpush1.bf16.msra.mxu0 %v10340_v4  ;;  %7129 = vmatprep.subr.bf16.mxu1 %v10345_v5  ;;  %v10426_v4 = vld [vmem:[%s11782_s27 + $0x1604] ss:$8 sps:$4 sm:$0xff]   ;;  %v1407_v5 = vcombine.high %v12301_v42, %v12301_v42 }
 0x1b8   : > { %7785 = vmatprep.subr.bf16.mxu0 %v10348_v6  ;;  %v1603_v6 = vcombine.high %v12304_v2, %v12304_v2 }
 0x1ba   : > { %7130 = vmatpush1.bf16.msra.mxu1 %v10343_v7  ;;  %v1436_v7 = vcombine.high %v12226_v59, %v12226_v59  ;;  %v12326_v59 = vrot.slane %v1603_v6, %v11862_v50  ;;  %v10510_v6 = vld [vmem:[%s11782_s27 + $0x16e4] ss:$8 sps:$4 sm:$0xff]  }
 0x1bb   : > { %7786 = vmatpush1.bf16.msra.mxu0 %v10346_v8  ;;  %7131 = vmatprep.subr.bf16.mxu1 %v10351_v9  ;;  %v1632_v8 = vcombine.high %v12230_v60, %v12230_v60  ;;  %v10421_v9 = vld [vmem:[%s11782_s27 + $0x600] ss:$8 sps:$4 sm:$0xff]   ;;  %v10427_v60 = vld [vmem:[%s11782_s27 + $0x610] ss:$8 sps:$4 sm:$0xff]  }
 0x1bc   : > { %7787 = vmatprep.subr.bf16.mxu0 %v10354_v10  ;;  %v10424_v10 = vld [vmem:[%s11782_s27 + $0x1600] ss:$8 sps:$4 sm:$0xff]  }
 0x1be   : > { %7132 = vmatpush1.bf16.msra.mxu1 %v10349_v11  ;;  %v10429_v11 = vld [vmem:[%s11782_s27 + $0x614] ss:$8 sps:$4 sm:$0xff]  }
 0x1bf   : > { %7788 = vmatpush1.bf16.msra.mxu0 %v10352_v12  ;;  %7133 = vmatprep.subr.bf16.mxu1 %v10357_v13  ;;  %v10432_v12 = vld [vmem:[%s11782_s27 + $0x1614] ss:$8 sps:$4 sm:$0xff]   ;;  %v12323_v13 = vrot.slane %v1407_v5, %v11862_v50  ;;  %v10507_v5 = vld [vmem:[%s11782_s27 + $0x6e4] ss:$8 sps:$4 sm:$0xff]  }
 0x1c0   : > { %7789 = vmatprep.subr.bf16.mxu0 %v10360_v14  ;;  %v10430_v14 = vld [vmem:[%s11782_s27 + $0x1610] ss:$8 sps:$4 sm:$0xff]  }
 0x1c2   : > { %7134 = vmatpush1.bf16.msra.mxu1 %v10355_v15  ;;  %v10435_v15 = vld [vmem:[%s11782_s27 + $0x624] ss:$8 sps:$4 sm:$0xff]  }
 0x1c3   : > { %7790 = vmatpush1.bf16.msra.mxu0 %v10358_v16  ;;  %7135 = vmatprep.subr.bf16.mxu1 %v10363_v19  ;;  %v10438_v16 = vld [vmem:[%s11782_s27 + $0x1624] ss:$8 sps:$4 sm:$0xff]   ;;  %v10433_v19 = vld [vmem:[%s11782_s27 + $0x620] ss:$8 sps:$4 sm:$0xff]  }
 0x1c4   : > { %7791 = vmatprep.subr.bf16.mxu0 %v10366_v20  ;;  %v10436_v20 = vld [vmem:[%s11782_s27 + $0x1620] ss:$8 sps:$4 sm:$0xff]  }
 0x1c6   : > { %7136 = vmatpush1.bf16.msra.mxu1 %v10361_v21  ;;  %v10441_v21 = vld [vmem:[%s11782_s27 + $0x634] ss:$8 sps:$4 sm:$0xff]  }
 0x1c7   : > { %7792 = vmatpush1.bf16.msra.mxu0 %v10364_v22  ;;  %7137 = vmatprep.subr.bf16.mxu1 %v10369_v23  ;;  %v10444_v22 = vld [vmem:[%s11782_s27 + $0x1634] ss:$8 sps:$4 sm:$0xff]   ;;  %v10439_v23 = vld [vmem:[%s11782_s27 + $0x630] ss:$8 sps:$4 sm:$0xff]  }
 0x1c8   : > { %7793 = vmatprep.subr.bf16.mxu0 %v10372_v24  ;;  %v10442_v24 = vld [vmem:[%s11782_s27 + $0x1630] ss:$8 sps:$4 sm:$0xff]  }
 0x1ca   : > { %7138 = vmatpush1.bf16.msra.mxu1 %v10367_v53  ;;  %v10447_v53 = vld [vmem:[%s11782_s27 + $0x644] ss:$8 sps:$4 sm:$0xff]  }
 0x1cb   : > { %7794 = vmatpush1.bf16.msra.mxu0 %v10370_v57  ;;  %7139 = vmatprep.subr.bf16.mxu1 %v10375_v27  ;;  %v10450_v57 = vld [vmem:[%s11782_s27 + $0x1644] ss:$8 sps:$4 sm:$0xff]   ;;  %v10445_v27 = vld [vmem:[%s11782_s27 + $0x640] ss:$8 sps:$4 sm:$0xff]  }
 0x1cc   : > { %7795 = vmatprep.subr.bf16.mxu0 %v10378_v28  ;;  %v10448_v28 = vld [vmem:[%s11782_s27 + $0x1640] ss:$8 sps:$4 sm:$0xff]  }
 0x1ce   : > { %7140 = vmatpush1.bf16.msra.mxu1 %v10373_v29  ;;  %v10453_v29 = vld [vmem:[%s11782_s27 + $0x654] ss:$8 sps:$4 sm:$0xff]  }
 0x1cf   : > { %7796 = vmatpush1.bf16.msra.mxu0 %v10376_v30  ;;  %7141 = vmatprep.subr.bf16.mxu1 %v10381_v31  ;;  %v10456_v30 = vld [vmem:[%s11782_s27 + $0x1654] ss:$8 sps:$4 sm:$0xff]   ;;  %v10451_v31 = vld [vmem:[%s11782_s27 + $0x650] ss:$8 sps:$4 sm:$0xff]  }
 0x1d0   : > { %7797 = vmatprep.subr.bf16.mxu0 %v10384_v32  ;;  %v10454_v32 = vld [vmem:[%s11782_s27 + $0x1650] ss:$8 sps:$4 sm:$0xff]  }
 0x1d2   : > { %7142 = vmatpush1.bf16.msra.mxu1 %v10379_v33  ;;  %v10459_v33 = vld [vmem:[%s11782_s27 + $0x664] ss:$8 sps:$4 sm:$0xff]  }
 0x1d3   : > { %7798 = vmatpush1.bf16.msra.mxu0 %v10382_v34  ;;  %7143 = vmatprep.subr.bf16.mxu1 %v10387_v35  ;;  %v10462_v34 = vld [vmem:[%s11782_s27 + $0x1664] ss:$8 sps:$4 sm:$0xff]   ;;  %v10457_v35 = vld [vmem:[%s11782_s27 + $0x660] ss:$8 sps:$4 sm:$0xff]  }
 0x1d4   : > { %7799 = vmatprep.subr.bf16.mxu0 %v10390_v36  ;;  %v10460_v36 = vld [vmem:[%s11782_s27 + $0x1660] ss:$8 sps:$4 sm:$0xff]  }
 0x1d6   : > { %7144 = vmatpush1.bf16.msra.mxu1 %v10385_v18  ;;  %v10465_v18 = vld [vmem:[%s11782_s27 + $0x674] ss:$8 sps:$4 sm:$0xff]  }
 0x1d7   : > { %7800 = vmatpush1.bf16.msra.mxu0 %v10388_v38  ;;  %7145 = vmatprep.subr.bf16.mxu1 %v10393_v43  ;;  %v10468_v38 = vld [vmem:[%s11782_s27 + $0x1674] ss:$8 sps:$4 sm:$0xff]   ;;  %v10463_v43 = vld [vmem:[%s11782_s27 + $0x670] ss:$8 sps:$4 sm:$0xff]  }
 0x1d8   : > { %7801 = vmatprep.subr.bf16.mxu0 %v10396_v45  ;;  %v10466_v45 = vld [vmem:[%s11782_s27 + $0x1670] ss:$8 sps:$4 sm:$0xff]  }
 0x1da   : > { %7146 = vmatpush1.bf16.msra.mxu1 %v10391_v25  ;;  %v10471_v25 = vld [vmem:[%s11782_s27 + $0x684] ss:$8 sps:$4 sm:$0xff]  }
 0x1db   : > { %7802 = vmatpush1.bf16.msra.mxu0 %v10394_v46  ;;  %7147 = vmatprep.subr.bf16.mxu1 %v10399_v26  ;;  %v10474_v46 = vld [vmem:[%s11782_s27 + $0x1684] ss:$8 sps:$4 sm:$0xff]   ;;  %v10469_v26 = vld [vmem:[%s11782_s27 + $0x680] ss:$8 sps:$4 sm:$0xff]  }
 0x1dc   : > { %7803 = vmatprep.subr.bf16.mxu0 %v10402_v47  ;;  %v10472_v47 = vld [vmem:[%s11782_s27 + $0x1680] ss:$8 sps:$4 sm:$0xff]  }
 0x1de   : > { %7148 = vmatpush1.bf16.msra.mxu1 %v10397_v37  ;;  %v10477_v37 = vld [vmem:[%s11782_s27 + $0x694] ss:$8 sps:$4 sm:$0xff]  }
 0x1df   : > { %7804 = vmatpush1.bf16.msra.mxu0 %v10400_v48  ;;  %7149 = vmatprep.subr.bf16.mxu1 %v10405_v17  ;;  %v10480_v48 = vld [vmem:[%s11782_s27 + $0x1694] ss:$8 sps:$4 sm:$0xff]   ;;  %v10475_v17 = vld [vmem:[%s11782_s27 + $0x690] ss:$8 sps:$4 sm:$0xff]  }
 0x1e0   : > { %7805 = vmatprep.subr.bf16.mxu0 %v10408_v49  ;;  %v10478_v49 = vld [vmem:[%s11782_s27 + $0x1690] ss:$8 sps:$4 sm:$0xff]  }
 0x1e2   : > { %7150 = vmatpush1.bf16.msra.mxu1 %v10403_v51  ;;  %v10483_v51 = vld [vmem:[%s11782_s27 + $0x6a4] ss:$8 sps:$4 sm:$0xff]  }
 0x1e3   : > { %7806 = vmatpush1.bf16.msra.mxu0 %v10406_v52  ;;  %7151 = vmatprep.subr.bf16.mxu1 %v10411_v54  ;;  %v10486_v52 = vld [vmem:[%s11782_s27 + $0x16a4] ss:$8 sps:$4 sm:$0xff]   ;;  %v10481_v54 = vld [vmem:[%s11782_s27 + $0x6a0] ss:$8 sps:$4 sm:$0xff]  }
 0x1e4   : > { %7807 = vmatprep.subr.bf16.mxu0 %v10414_v55  ;;  %v10484_v55 = vld [vmem:[%s11782_s27 + $0x16a0] ss:$8 sps:$4 sm:$0xff]  }
 0x1e6   : > { %7152 = vmatpush1.bf16.msra.mxu1 %v10409_v63  ;;  %v10495_v63 = vld [vmem:[%s11782_s27 + $0x6c4] ss:$8 sps:$4 sm:$0xff]  }
 0x1e7   : > { %7808 = vmatpush1.bf16.msra.mxu0 %v10412_v0  ;;  %7153 = vmatprep.subr.bf16.mxu1 %v10417_v41  ;;  %v10498_v0 = vld [vmem:[%s11782_s27 + $0x16c4] ss:$8 sps:$4 sm:$0xff]   ;;  %v10493_v41 = vld [vmem:[%s11782_s27 + $0x6c0] ss:$8 sps:$4 sm:$0xff]  }
 0x1e8   : > { %7809 = vmatprep.subr.bf16.mxu0 %v10420_v1  ;;  %v10496_v1 = vld [vmem:[%s11782_s27 + $0x16c0] ss:$8 sps:$4 sm:$0xff]  }
 0x1ea   : > { %7154 = vmatpush1.bf16.msra.mxu1 %v10415_v56  ;;  %v10501_v56 = vld [vmem:[%s11782_s27 + $0x6d4] ss:$8 sps:$4 sm:$0xff]  }
 0x1eb   : > { %7810 = vmatpush1.bf16.msra.mxu0 %v10418_v3  ;;  %7164 = vmatprep.subr.bf16.mxu1 %v10423_v58  ;;  %v10504_v3 = vld [vmem:[%s11782_s27 + $0x16d4] ss:$8 sps:$4 sm:$0xff]   ;;  %v10499_v58 = vld [vmem:[%s11782_s27 + $0x6d0] ss:$8 sps:$4 sm:$0xff]  }
 0x1ec   : > { %7820 = vmatprep.subr.bf16.mxu0 %v10426_v4  ;;  %v10502_v4 = vld [vmem:[%s11782_s27 + $0x16d0] ss:$8 sps:$4 sm:$0xff]  }
 0x1ed   : > { %7156 = vmatmul.mubr.bf16.vlgmr.msra.gmra.mrb[0].mxu1 %v1436_v7  ;;  %v10505_v7 = vld [vmem:[%s11782_s27 + $0x6e0] ss:$8 sps:$4 sm:$0xff]  }
 0x1ee   : > { %7812 = vmatmul.mubr.bf16.vlgmr.msra.gmra.mrb[0].mxu0 %v1632_v8  ;;  %7165 = vmatpush1.bf16.msra.mxu1 %v10421_v9  ;;  %v10508_v8 = vld [vmem:[%s11782_s27 + $0x16e0] ss:$8 sps:$4 sm:$0xff]   ;;  %v10513_v9 = vld [vmem:[%s11782_s27 + $0x6f4] ss:$8 sps:$4 sm:$0xff]  }
 0x1ef   : > { %7821 = vmatpush1.bf16.msra.mxu0 %v10424_v10  ;;  %7166 = vmatprep.subr.bf16.mxu1 %v10429_v11  ;;  %v10516_v10 = vld [vmem:[%s11782_s27 + $0x16f4] ss:$8 sps:$4 sm:$0xff]   ;;  %v10511_v11 = vld [vmem:[%s11782_s27 + $0x6f0] ss:$8 sps:$4 sm:$0xff]  }
 0x1f0   : > { %7822 = vmatprep.subr.bf16.mxu0 %v10432_v12  ;;  %7196 = vmatprep.mubr.bf16.mxu1 %v12323_v13  ;;  %v10514_v12 = vld [vmem:[%s11782_s27 + $0x16f0] ss:$8 sps:$4 sm:$0xff]  }
 0x1f1   : > { %7852 = vmatprep.mubr.bf16.mxu0 %v12326_v59 }
 0x1f2   : > { %7167 = vmatpush1.bf16.msra.mxu1 %v10427_v60  ;;  %v10520_v60 = vld [vmem:[%s11782_s27 + $0x704] ss:$8 sps:$4 sm:$0xff]  }
 0x1f3   : > { %7823 = vmatpush1.bf16.msra.mxu0 %v10430_v14  ;;  %7168 = vmatprep.subr.bf16.mxu1 %v10435_v15  ;;  %v10524_v14 = vld [vmem:[%s11782_s27 + $0x1704] ss:$8 sps:$4 sm:$0xff]   ;;  %v12392_v15 = vrot.slane %v12301_v42, %v11862_v50  ;;  %v1439_v42 = vcombine.high %v12323_v13, %v12323_v13 }
 0x1f4   : > { %7824 = vmatprep.subr.bf16.mxu0 %v10438_v16  ;;  %v12396_v16 = vrot.slane %v12304_v2, %v11862_v50  ;;  %v10525_v2 = vld [vmem:[%s11782_s27 + $0x710] ss:$8 sps:$4 sm:$0xff]   ;;  %v10533_v13 = vld [vmem:[%s11782_s27 + $0x724] ss:$8 sps:$4 sm:$0xff]  }
 0x1f6   : > { %7169 = vmatpush1.bf16.msra.mxu1 %v10433_v19  ;;  %v10518_v19 = vld [vmem:[%s11782_s27 + $0x700] ss:$8 sps:$4 sm:$0xff]  }
 0x1f7   : > { %7825 = vmatpush1.bf16.msra.mxu0 %v10436_v20  ;;  %7170 = vmatprep.subr.bf16.mxu1 %v10441_v21  ;;  %v10522_v20 = vld [vmem:[%s11782_s27 + $0x1700] ss:$8 sps:$4 sm:$0xff]   ;;  %v10527_v21 = vld [vmem:[%s11782_s27 + $0x714] ss:$8 sps:$4 sm:$0xff]  }
 0x1f8   : > { %7826 = vmatprep.subr.bf16.mxu0 %v10444_v22  ;;  %v10530_v22 = vld [vmem:[%s11782_s27 + $0x1714] ss:$8 sps:$4 sm:$0xff]  }
 0x1fa   : > { %7171 = vmatpush1.bf16.msra.mxu1 %v10439_v23  ;;  %v1635_v23 = vcombine.high %v12326_v59, %v12326_v59  ;;  %v10531_v59 = vld [vmem:[%s11782_s27 + $0x720] ss:$8 sps:$4 sm:$0xff]  }
 0x1fb   : > { %7827 = vmatpush1.bf16.msra.mxu0 %v10442_v24  ;;  %7172 = vmatprep.subr.bf16.mxu1 %v10447_v53  ;;  %v10528_v24 = vld [vmem:[%s11782_s27 + $0x1710] ss:$8 sps:$4 sm:$0xff]   ;;  %v10536_v53 = vld [vmem:[%s11782_s27 + $0x1724] ss:$8 sps:$4 sm:$0xff]  }
 0x1fc   : > { %7828 = vmatprep.subr.bf16.mxu0 %v10450_v57  ;;  %v10534_v57 = vld [vmem:[%s11782_s27 + $0x1720] ss:$8 sps:$4 sm:$0xff]  }
 0x1fe   : > { %7173 = vmatpush1.bf16.msra.mxu1 %v10445_v27  ;;  %v10539_v27 = vld [vmem:[%s11782_s27 + $0x734] ss:$8 sps:$4 sm:$0xff]  }
 0x1ff   : > { %7829 = vmatpush1.bf16.msra.mxu0 %v10448_v28  ;;  %7174 = vmatprep.subr.bf16.mxu1 %v10453_v29  ;;  %v10542_v28 = vld [vmem:[%s11782_s27 + $0x1734] ss:$8 sps:$4 sm:$0xff]   ;;  %v10537_v29 = vld [vmem:[%s11782_s27 + $0x730] ss:$8 sps:$4 sm:$0xff]  }
 0x200   : > { %7830 = vmatprep.subr.bf16.mxu0 %v10456_v30  ;;  %v10540_v30 = vld [vmem:[%s11782_s27 + $0x1730] ss:$8 sps:$4 sm:$0xff]  }
 0x202   : > { %7175 = vmatpush1.bf16.msra.mxu1 %v10451_v31  ;;  %v10545_v31 = vld [vmem:[%s11782_s27 + $0x744] ss:$8 sps:$4 sm:$0xff]  }
 0x203   : > { %7831 = vmatpush1.bf16.msra.mxu0 %v10454_v32  ;;  %7176 = vmatprep.subr.bf16.mxu1 %v10459_v33  ;;  %v10548_v32 = vld [vmem:[%s11782_s27 + $0x1744] ss:$8 sps:$4 sm:$0xff]   ;;  %v10543_v33 = vld [vmem:[%s11782_s27 + $0x740] ss:$8 sps:$4 sm:$0xff]  }
 0x204   : > { %7832 = vmatprep.subr.bf16.mxu0 %v10462_v34  ;;  %v10546_v34 = vld [vmem:[%s11782_s27 + $0x1740] ss:$8 sps:$4 sm:$0xff]  }
 0x206   : > { %7177 = vmatpush1.bf16.msra.mxu1 %v10457_v35  ;;  %v10551_v35 = vld [vmem:[%s11782_s27 + $0x754] ss:$8 sps:$4 sm:$0xff]  }
 0x207   : > { %7833 = vmatpush1.bf16.msra.mxu0 %v10460_v36  ;;  %7178 = vmatprep.subr.bf16.mxu1 %v10465_v18  ;;  %v10554_v36 = vld [vmem:[%s11782_s27 + $0x1754] ss:$8 sps:$4 sm:$0xff]   ;;  %v10549_v18 = vld [vmem:[%s11782_s27 + $0x750] ss:$8 sps:$4 sm:$0xff]  }
 0x208   : > { %7834 = vmatprep.subr.bf16.mxu0 %v10468_v38  ;;  %v10552_v38 = vld [vmem:[%s11782_s27 + $0x1750] ss:$8 sps:$4 sm:$0xff]  }
 0x20a   : > { %7179 = vmatpush1.bf16.msra.mxu1 %v10463_v43  ;;  %v10557_v43 = vld [vmem:[%s11782_s27 + $0x764] ss:$8 sps:$4 sm:$0xff]  }
 0x20b   : > { %7835 = vmatpush1.bf16.msra.mxu0 %v10466_v45  ;;  %7180 = vmatprep.subr.bf16.mxu1 %v10471_v25  ;;  %v10560_v45 = vld [vmem:[%s11782_s27 + $0x1764] ss:$8 sps:$4 sm:$0xff]   ;;  %v10555_v25 = vld [vmem:[%s11782_s27 + $0x760] ss:$8 sps:$4 sm:$0xff]  }
 0x20c   : > { %7836 = vmatprep.subr.bf16.mxu0 %v10474_v46  ;;  %v10558_v46 = vld [vmem:[%s11782_s27 + $0x1760] ss:$8 sps:$4 sm:$0xff]  }
 0x20e   : > { %7181 = vmatpush1.bf16.msra.mxu1 %v10469_v26  ;;  %v10563_v26 = vld [vmem:[%s11782_s27 + $0x774] ss:$8 sps:$4 sm:$0xff]  }
 0x20f   : > { %7837 = vmatpush1.bf16.msra.mxu0 %v10472_v47  ;;  %7182 = vmatprep.subr.bf16.mxu1 %v10477_v37  ;;  %v10566_v47 = vld [vmem:[%s11782_s27 + $0x1774] ss:$8 sps:$4 sm:$0xff]   ;;  %v10561_v37 = vld [vmem:[%s11782_s27 + $0x770] ss:$8 sps:$4 sm:$0xff]  }
 0x210   : > { %7838 = vmatprep.subr.bf16.mxu0 %v10480_v48  ;;  %v10564_v48 = vld [vmem:[%s11782_s27 + $0x1770] ss:$8 sps:$4 sm:$0xff]  }
 0x212   : > { %7183 = vmatpush1.bf16.msra.mxu1 %v10475_v17  ;;  %v10569_v17 = vld [vmem:[%s11782_s27 + $0x784] ss:$8 sps:$4 sm:$0xff]  }
 0x213   : > { %7839 = vmatpush1.bf16.msra.mxu0 %v10478_v49  ;;  %7184 = vmatprep.subr.bf16.mxu1 %v10483_v51  ;;  %v10572_v49 = vld [vmem:[%s11782_s27 + $0x1784] ss:$8 sps:$4 sm:$0xff]   ;;  %v10567_v51 = vld [vmem:[%s11782_s27 + $0x780] ss:$8 sps:$4 sm:$0xff]  }
 0x214   : > { %7840 = vmatprep.subr.bf16.mxu0 %v10486_v52  ;;  %v10570_v52 = vld [vmem:[%s11782_s27 + $0x1780] ss:$8 sps:$4 sm:$0xff]  }
 0x216   : > { %7185 = vmatpush1.bf16.msra.mxu1 %v10481_v54  ;;  %v10575_v54 = vld [vmem:[%s11782_s27 + $0x794] ss:$8 sps:$4 sm:$0xff]  }
 0x217   : > { %7841 = vmatpush1.bf16.msra.mxu0 %v10484_v55  ;;  %7186 = vmatprep.subr.bf16.mxu1 %v10489_v39  ;;  %v10578_v55 = vld [vmem:[%s11782_s27 + $0x1794] ss:$8 sps:$4 sm:$0xff]   ;;  %v10573_v39 = vld [vmem:[%s11782_s27 + $0x790] ss:$8 sps:$4 sm:$0xff]  }
 0x218   : > { %7842 = vmatprep.subr.bf16.mxu0 %v10492_v40  ;;  %v10576_v40 = vld [vmem:[%s11782_s27 + $0x1790] ss:$8 sps:$4 sm:$0xff]  }
 0x21a   : > { %7187 = vmatpush1.bf16.msra.mxu1 %v10487_v61  ;;  %v10581_v61 = vld [vmem:[%s11782_s27 + $0x7a4] ss:$8 sps:$4 sm:$0xff]  }
 0x21b   : > { %7843 = vmatpush1.bf16.msra.mxu0 %v10490_v62  ;;  %7188 = vmatprep.subr.bf16.mxu1 %v10495_v63  ;;  %v10584_v62 = vld [vmem:[%s11782_s27 + $0x17a4] ss:$8 sps:$4 sm:$0xff]   ;;  %v10579_v63 = vld [vmem:[%s11782_s27 + $0x7a0] ss:$8 sps:$4 sm:$0xff]  }
 0x21c   : > { %7844 = vmatprep.subr.bf16.mxu0 %v10498_v0  ;;  %v10582_v0 = vld [vmem:[%s11782_s27 + $0x17a0] ss:$8 sps:$4 sm:$0xff]  }
 0x21e   : > { %7189 = vmatpush1.bf16.msra.mxu1 %v10493_v41  ;;  %v10587_v41 = vld [vmem:[%s11782_s27 + $0x7b4] ss:$8 sps:$4 sm:$0xff]  }
 0x21f   : > { %7845 = vmatpush1.bf16.msra.mxu0 %v10496_v1  ;;  %7190 = vmatprep.subr.bf16.mxu1 %v10501_v56  ;;  %v10590_v1 = vld [vmem:[%s11782_s27 + $0x17b4] ss:$8 sps:$4 sm:$0xff]   ;;  %v10585_v56 = vld [vmem:[%s11782_s27 + $0x7b0] ss:$8 sps:$4 sm:$0xff]  }
 0x220   : > { %7846 = vmatprep.subr.bf16.mxu0 %v10504_v3  ;;  %v10588_v3 = vld [vmem:[%s11782_s27 + $0x17b0] ss:$8 sps:$4 sm:$0xff]  }
 0x222   : > { %7191 = vmatpush1.bf16.msra.mxu1 %v10499_v58  ;;  %v10593_v58 = vld [vmem:[%s11782_s27 + $0x7c4] ss:$8 sps:$4 sm:$0xff]  }
 0x223   : > { %7847 = vmatpush1.bf16.msra.mxu0 %v10502_v4  ;;  %7192 = vmatprep.subr.bf16.mxu1 %v10507_v5  ;;  %v10596_v4 = vld [vmem:[%s11782_s27 + $0x17c4] ss:$8 sps:$4 sm:$0xff]   ;;  %v10591_v5 = vld [vmem:[%s11782_s27 + $0x7c0] ss:$8 sps:$4 sm:$0xff]  }
 0x224   : > { %7848 = vmatprep.subr.bf16.mxu0 %v10510_v6  ;;  %v10594_v6 = vld [vmem:[%s11782_s27 + $0x17c0] ss:$8 sps:$4 sm:$0xff]  }
 0x226   : > { %7193 = vmatpush1.bf16.msra.mxu1 %v10505_v7  ;;  %v10599_v7 = vld [vmem:[%s11782_s27 + $0x7d4] ss:$8 sps:$4 sm:$0xff]  }
 0x227   : > { %7849 = vmatpush1.bf16.msra.mxu0 %v10508_v8  ;;  %7194 = vmatprep.subr.bf16.mxu1 %v10513_v9  ;;  %v10602_v8 = vld [vmem:[%s11782_s27 + $0x17d4] ss:$8 sps:$4 sm:$0xff]   ;;  %v10597_v9 = vld [vmem:[%s11782_s27 + $0x7d0] ss:$8 sps:$4 sm:$0xff]  }
 0x228   : > { %7850 = vmatprep.subr.bf16.mxu0 %v10516_v10  ;;  %v10600_v10 = vld [vmem:[%s11782_s27 + $0x17d0] ss:$8 sps:$4 sm:$0xff]  }
 0x22a   : > { %7195 = vmatpush1.bf16.msra.mxu1 %v10511_v11  ;;  %v10605_v11 = vld [vmem:[%s11782_s27 + $0x7e4] ss:$8 sps:$4 sm:$0xff]  }
 0x22b   : > { %7851 = vmatpush1.bf16.msra.mxu0 %v10514_v12  ;;  %7205 = vmatprep.subr.bf16.mxu1 %v10520_v60  ;;  %v10608_v12 = vld [vmem:[%s11782_s27 + $0x17e4] ss:$8 sps:$4 sm:$0xff]  }
 0x22c   : > { %7861 = vmatprep.subr.bf16.mxu0 %v10524_v14  ;;  %v12461_v60 = vld [vmem:[%s11859_s10 + $0x10] sm:$0xff] }
 0x22d   : > { %7197 = vmatmul.mubr.bf16.vlgmr.msra.gmra.mrb[0].mxu1 %v12392_v15  ;;  %v12464_v14 = vld [vmem:[%s11859_s10 + $0x30] sm:$0xff] }
 0x22e   : > { %7853 = vmatmul.mubr.bf16.vlgmr.msra.gmra.mrb[0].mxu0 %v12396_v16  ;;  %7206 = vmatpush1.bf16.msra.mxu1 %v10518_v19  ;;  %v10603_v19 = vld [vmem:[%s11782_s27 + $0x7e0] ss:$8 sps:$4 sm:$0xff]  }
 0x22f   : > { %7862 = vmatpush1.bf16.msra.mxu0 %v10522_v20  ;;  %7207 = vmatprep.subr.bf16.mxu1 %v10527_v21  ;;  %v10606_v20 = vld [vmem:[%s11782_s27 + $0x17e0] ss:$8 sps:$4 sm:$0xff]   ;;  %v10611_v21 = vld [vmem:[%s11782_s27 + $0x7f4] ss:$8 sps:$4 sm:$0xff]  }
 0x230   : > { %7863 = vmatprep.subr.bf16.mxu0 %v10530_v22  ;;  %7237 = vmatprep.mubr.bf16.mxu1 %v1439_v42  ;;  %v10614_v22 = vld [vmem:[%s11782_s27 + $0x17f4] ss:$8 sps:$4 sm:$0xff]   ;;  %v12472_v42 = vrot.slane %v12461_v60, %v11862_v50 }
 0x231   : > { %7893 = vmatprep.mubr.bf16.mxu0 %v1635_v23  ;;  %v12476_v23 = vrot.slane %v12464_v14, %v11862_v50 }
 0x232   : > { %7208 = vmatpush1.bf16.msra.mxu1 %v10525_v2  ;;  %v10609_v2 = vld [vmem:[%s11782_s27 + $0x7f0] ss:$8 sps:$4 sm:$0xff]  }
 0x233   : > { %7864 = vmatpush1.bf16.msra.mxu0 %v10528_v24  ;;  %7209 = vmatprep.subr.bf16.mxu1 %v10533_v13  ;;  %v10612_v24 = vld [vmem:[%s11782_s27 + $0x17f0] ss:$8 sps:$4 sm:$0xff]   ;;  %v10617_v13 = vld [vmem:[%s11782_s27 + $0x804] ss:$8 sps:$4 sm:$0xff]  }
 0x234   : > { %7865 = vmatprep.subr.bf16.mxu0 %v10536_v53  ;;  %v10620_v53 = vld [vmem:[%s11782_s27 + $0x1804] ss:$8 sps:$4 sm:$0xff]  }
 0x236   : > { %7210 = vmatpush1.bf16.msra.mxu1 %v10531_v59  ;;  %v1455_v59 = vcombine.high %v12472_v42, %v12472_v42 }
 0x237   : > { %7866 = vmatpush1.bf16.msra.mxu0 %v10534_v57  ;;  %7211 = vmatprep.subr.bf16.mxu1 %v10539_v27  ;;  %v1651_v57 = vcombine.high %v12476_v23, %v12476_v23  ;;  %v1437_v27 = vcombine.high %v12392_v15, %v12392_v15 }
 0x238   : > { %7867 = vmatprep.subr.bf16.mxu0 %v10542_v28  ;;  %v1633_v28 = vcombine.high %v12396_v16, %v12396_v16  ;;  %v10621_v16 = vld [vmem:[%s11782_s27 + $0x810] ss:$8 sps:$4 sm:$0xff]  }
 0x239   : > { %v12498_v15 = vrot.slane %v1651_v57, %v11862_v50  ;;  %v10696_v57 = vld [vmem:[%s11782_s27 + $0x18d0] ss:$8 sps:$4 sm:$0xff]  }
 0x23a   : > { %7212 = vmatpush1.bf16.msra.mxu1 %v10537_v29  ;;  %v10615_v29 = vld [vmem:[%s11782_s27 + $0x800] ss:$8 sps:$4 sm:$0xff]  }
 0x23b   : > { %7868 = vmatpush1.bf16.msra.mxu0 %v10540_v30  ;;  %7213 = vmatprep.subr.bf16.mxu1 %v10545_v31  ;;  %v10618_v30 = vld [vmem:[%s11782_s27 + $0x1800] ss:$8 sps:$4 sm:$0xff]   ;;  %v10623_v31 = vld [vmem:[%s11782_s27 + $0x814] ss:$8 sps:$4 sm:$0xff]  }
 0x23c   : > { %7869 = vmatprep.subr.bf16.mxu0 %v10548_v32  ;;  %v10626_v32 = vld [vmem:[%s11782_s27 + $0x1814] ss:$8 sps:$4 sm:$0xff]  }
 0x23e   : > { %7214 = vmatpush1.bf16.msra.mxu1 %v10543_v33  ;;  %v12495_v33 = vrot.slane %v1455_v59, %v11862_v50  ;;  %v10693_v59 = vld [vmem:[%s11782_s27 + $0x8d0] ss:$8 sps:$4 sm:$0xff]  }
 0x23f   : > { %7870 = vmatpush1.bf16.msra.mxu0 %v10546_v34  ;;  %7215 = vmatprep.subr.bf16.mxu1 %v10551_v35  ;;  %v10624_v34 = vld [vmem:[%s11782_s27 + $0x1810] ss:$8 sps:$4 sm:$0xff]   ;;  %v10629_v35 = vld [vmem:[%s11782_s27 + $0x824] ss:$8 sps:$4 sm:$0xff]  }
 0x240   : > { %7871 = vmatprep.subr.bf16.mxu0 %v10554_v36  ;;  %v10632_v36 = vld [vmem:[%s11782_s27 + $0x1824] ss:$8 sps:$4 sm:$0xff]  }
 0x242   : > { %7216 = vmatpush1.bf16.msra.mxu1 %v10549_v18  ;;  %v10627_v18 = vld [vmem:[%s11782_s27 + $0x820] ss:$8 sps:$4 sm:$0xff]  }
 0x243   : > { %7872 = vmatpush1.bf16.msra.mxu0 %v10552_v38  ;;  %7217 = vmatprep.subr.bf16.mxu1 %v10557_v43  ;;  %v10630_v38 = vld [vmem:[%s11782_s27 + $0x1820] ss:$8 sps:$4 sm:$0xff]   ;;  %v10635_v43 = vld [vmem:[%s11782_s27 + $0x834] ss:$8 sps:$4 sm:$0xff]  }
 0x244   : > { %7873 = vmatprep.subr.bf16.mxu0 %v10560_v45  ;;  %v10638_v45 = vld [vmem:[%s11782_s27 + $0x1834] ss:$8 sps:$4 sm:$0xff]  }
 0x246   : > { %7218 = vmatpush1.bf16.msra.mxu1 %v10555_v25  ;;  %v10633_v25 = vld [vmem:[%s11782_s27 + $0x830] ss:$8 sps:$4 sm:$0xff]  }
 0x247   : > { %7874 = vmatpush1.bf16.msra.mxu0 %v10558_v46  ;;  %7219 = vmatprep.subr.bf16.mxu1 %v10563_v26  ;;  %v10636_v46 = vld [vmem:[%s11782_s27 + $0x1830] ss:$8 sps:$4 sm:$0xff]   ;;  %v10641_v26 = vld [vmem:[%s11782_s27 + $0x844] ss:$8 sps:$4 sm:$0xff]  }
 0x248   : > { %7875 = vmatprep.subr.bf16.mxu0 %v10566_v47  ;;  %v10644_v47 = vld [vmem:[%s11782_s27 + $0x1844] ss:$8 sps:$4 sm:$0xff]  }
 0x24a   : > { %7220 = vmatpush1.bf16.msra.mxu1 %v10561_v37  ;;  %v10639_v37 = vld [vmem:[%s11782_s27 + $0x840] ss:$8 sps:$4 sm:$0xff]  }
 0x24b   : > { %7876 = vmatpush1.bf16.msra.mxu0 %v10564_v48  ;;  %7221 = vmatprep.subr.bf16.mxu1 %v10569_v17  ;;  %v10642_v48 = vld [vmem:[%s11782_s27 + $0x1840] ss:$8 sps:$4 sm:$0xff]   ;;  %v10647_v17 = vld [vmem:[%s11782_s27 + $0x854] ss:$8 sps:$4 sm:$0xff]  }
 0x24c   : > { %7877 = vmatprep.subr.bf16.mxu0 %v10572_v49  ;;  %v10650_v49 = vld [vmem:[%s11782_s27 + $0x1854] ss:$8 sps:$4 sm:$0xff]  }
 0x24e   : > { %7222 = vmatpush1.bf16.msra.mxu1 %v10567_v51  ;;  %v10645_v51 = vld [vmem:[%s11782_s27 + $0x850] ss:$8 sps:$4 sm:$0xff]  }
 0x24f   : > { %7878 = vmatpush1.bf16.msra.mxu0 %v10570_v52  ;;  %7223 = vmatprep.subr.bf16.mxu1 %v10575_v54  ;;  %v10648_v52 = vld [vmem:[%s11782_s27 + $0x1850] ss:$8 sps:$4 sm:$0xff]   ;;  %v10653_v54 = vld [vmem:[%s11782_s27 + $0x864] ss:$8 sps:$4 sm:$0xff]  }
 0x250   : > { %7879 = vmatprep.subr.bf16.mxu0 %v10578_v55  ;;  %v10656_v55 = vld [vmem:[%s11782_s27 + $0x1864] ss:$8 sps:$4 sm:$0xff]  }
 0x252   : > { %7224 = vmatpush1.bf16.msra.mxu1 %v10573_v39  ;;  %v10651_v39 = vld [vmem:[%s11782_s27 + $0x860] ss:$8 sps:$4 sm:$0xff]  }
 0x253   : > { %7880 = vmatpush1.bf16.msra.mxu0 %v10576_v40  ;;  %7225 = vmatprep.subr.bf16.mxu1 %v10581_v61  ;;  %v10654_v40 = vld [vmem:[%s11782_s27 + $0x1860] ss:$8 sps:$4 sm:$0xff]   ;;  %v10659_v61 = vld [vmem:[%s11782_s27 + $0x874] ss:$8 sps:$4 sm:$0xff]  }
 0x254   : > { %7881 = vmatprep.subr.bf16.mxu0 %v10584_v62  ;;  %v10662_v62 = vld [vmem:[%s11782_s27 + $0x1874] ss:$8 sps:$4 sm:$0xff]  }
 0x256   : > { %7226 = vmatpush1.bf16.msra.mxu1 %v10579_v63  ;;  %v10657_v63 = vld [vmem:[%s11782_s27 + $0x870] ss:$8 sps:$4 sm:$0xff]  }
 0x257   : > { %7882 = vmatpush1.bf16.msra.mxu0 %v10582_v0  ;;  %7227 = vmatprep.subr.bf16.mxu1 %v10587_v41  ;;  %v10660_v0 = vld [vmem:[%s11782_s27 + $0x1870] ss:$8 sps:$4 sm:$0xff]   ;;  %v10665_v41 = vld [vmem:[%s11782_s27 + $0x884] ss:$8 sps:$4 sm:$0xff]  }
 0x258   : > { %7883 = vmatprep.subr.bf16.mxu0 %v10590_v1  ;;  %v10668_v1 = vld [vmem:[%s11782_s27 + $0x1884] ss:$8 sps:$4 sm:$0xff]  }
 0x25a   : > { %7228 = vmatpush1.bf16.msra.mxu1 %v10585_v56  ;;  %v10663_v56 = vld [vmem:[%s11782_s27 + $0x880] ss:$8 sps:$4 sm:$0xff]  }
 0x25b   : > { %7884 = vmatpush1.bf16.msra.mxu0 %v10588_v3  ;;  %7229 = vmatprep.subr.bf16.mxu1 %v10593_v58  ;;  %v10666_v3 = vld [vmem:[%s11782_s27 + $0x1880] ss:$8 sps:$4 sm:$0xff]   ;;  %v10671_v58 = vld [vmem:[%s11782_s27 + $0x894] ss:$8 sps:$4 sm:$0xff]  }
 0x25c   : > { %7885 = vmatprep.subr.bf16.mxu0 %v10596_v4  ;;  %v10674_v4 = vld [vmem:[%s11782_s27 + $0x1894] ss:$8 sps:$4 sm:$0xff]  }
 0x25e   : > { %7230 = vmatpush1.bf16.msra.mxu1 %v10591_v5  ;;  %v10669_v5 = vld [vmem:[%s11782_s27 + $0x890] ss:$8 sps:$4 sm:$0xff]  }
 0x25f   : > { %7886 = vmatpush1.bf16.msra.mxu0 %v10594_v6  ;;  %7231 = vmatprep.subr.bf16.mxu1 %v10599_v7  ;;  %v10672_v6 = vld [vmem:[%s11782_s27 + $0x1890] ss:$8 sps:$4 sm:$0xff]   ;;  %v10677_v7 = vld [vmem:[%s11782_s27 + $0x8a4] ss:$8 sps:$4 sm:$0xff]  }
 0x260   : > { %7887 = vmatprep.subr.bf16.mxu0 %v10602_v8  ;;  %v10680_v8 = vld [vmem:[%s11782_s27 + $0x18a4] ss:$8 sps:$4 sm:$0xff]  }
 0x262   : > { %7232 = vmatpush1.bf16.msra.mxu1 %v10597_v9  ;;  %v10675_v9 = vld [vmem:[%s11782_s27 + $0x8a0] ss:$8 sps:$4 sm:$0xff]  }
 0x263   : > { %7888 = vmatpush1.bf16.msra.mxu0 %v10600_v10  ;;  %7233 = vmatprep.subr.bf16.mxu1 %v10605_v11  ;;  %v10678_v10 = vld [vmem:[%s11782_s27 + $0x18a0] ss:$8 sps:$4 sm:$0xff]   ;;  %v10683_v11 = vld [vmem:[%s11782_s27 + $0x8b4] ss:$8 sps:$4 sm:$0xff]  }
 0x264   : > { %7889 = vmatprep.subr.bf16.mxu0 %v10608_v12  ;;  %v10686_v12 = vld [vmem:[%s11782_s27 + $0x18b4] ss:$8 sps:$4 sm:$0xff]  }
 0x266   : > { %7234 = vmatpush1.bf16.msra.mxu1 %v10603_v19  ;;  %v10681_v19 = vld [vmem:[%s11782_s27 + $0x8b0] ss:$8 sps:$4 sm:$0xff]  }
 0x267   : > { %7890 = vmatpush1.bf16.msra.mxu0 %v10606_v20  ;;  %7235 = vmatprep.subr.bf16.mxu1 %v10611_v21  ;;  %v10684_v20 = vld [vmem:[%s11782_s27 + $0x18b0] ss:$8 sps:$4 sm:$0xff]   ;;  %v10689_v21 = vld [vmem:[%s11782_s27 + $0x8c4] ss:$8 sps:$4 sm:$0xff]  }
 0x268   : > { %7891 = vmatprep.subr.bf16.mxu0 %v10614_v22  ;;  %v10692_v22 = vld [vmem:[%s11782_s27 + $0x18c4] ss:$8 sps:$4 sm:$0xff]  }
 0x26a   : > { %7236 = vmatpush1.bf16.msra.mxu1 %v10609_v2  ;;  %v10687_v2 = vld [vmem:[%s11782_s27 + $0x8c0] ss:$8 sps:$4 sm:$0xff]  }
 0x26b   : > { %7892 = vmatpush1.bf16.msra.mxu0 %v10612_v24  ;;  %7246 = vmatprep.subr.bf16.mxu1 %v10617_v13  ;;  %v10690_v24 = vld [vmem:[%s11782_s27 + $0x18c0] ss:$8 sps:$4 sm:$0xff]   ;;  %v10695_v13 = vld [vmem:[%s11782_s27 + $0x8d4] ss:$8 sps:$4 sm:$0xff]  }
 0x26c   : > { %7902 = vmatprep.subr.bf16.mxu0 %v10620_v53  ;;  %v10698_v53 = vld [vmem:[%s11782_s27 + $0x18d4] ss:$8 sps:$4 sm:$0xff]  }
 0x26d   : > { %7238 = vmatmul.mubr.bf16.vlgmr.msra.gmra.mrb[0].mxu1 %v1437_v27  ;;  %v10701_v27 = vld [vmem:[%s11782_s27 + $0x8e4] ss:$8 sps:$4 sm:$0xff]  }
 0x26e   : > { %7894 = vmatmul.mubr.bf16.vlgmr.msra.gmra.mrb[0].mxu0 %v1633_v28  ;;  %7247 = vmatpush1.bf16.msra.mxu1 %v10615_v29  ;;  %v10704_v28 = vld [vmem:[%s11782_s27 + $0x18e4] ss:$8 sps:$4 sm:$0xff]   ;;  %v10699_v29 = vld [vmem:[%s11782_s27 + $0x8e0] ss:$8 sps:$4 sm:$0xff]  }
 0x26f   : > { %7903 = vmatpush1.bf16.msra.mxu0 %v10618_v30  ;;  %7248 = vmatprep.subr.bf16.mxu1 %v10623_v31  ;;  %v10702_v30 = vld [vmem:[%s11782_s27 + $0x18e0] ss:$8 sps:$4 sm:$0xff]   ;;  %v10707_v31 = vld [vmem:[%s11782_s27 + $0x8f4] ss:$8 sps:$4 sm:$0xff]  }
 0x270   : > { %7904 = vmatprep.subr.bf16.mxu0 %v10626_v32  ;;  %7278 = vmatprep.mubr.bf16.mxu1 %v12495_v33  ;;  %v10710_v32 = vld [vmem:[%s11782_s27 + $0x18f4] ss:$8 sps:$4 sm:$0xff]  }
 0x271   : > { %7934 = vmatprep.mubr.bf16.mxu0 %v12498_v15 }
 0x272   : > { %7249 = vmatpush1.bf16.msra.mxu1 %v10621_v16  ;;  %v10705_v16 = vld [vmem:[%s11782_s27 + $0x8f0] ss:$8 sps:$4 sm:$0xff]  }
 0x273   : > { %7905 = vmatpush1.bf16.msra.mxu0 %v10624_v34  ;;  %7250 = vmatprep.subr.bf16.mxu1 %v10629_v35  ;;  %v10708_v34 = vld [vmem:[%s11782_s27 + $0x18f0] ss:$8 sps:$4 sm:$0xff]   ;;  %v10713_v35 = vld [vmem:[%s11782_s27 + $0x904] ss:$8 sps:$4 sm:$0xff]  }
 0x274   : > { %7906 = vmatprep.subr.bf16.mxu0 %v10632_v36  ;;  %v10716_v36 = vld [vmem:[%s11782_s27 + $0x1904] ss:$8 sps:$4 sm:$0xff]  }
 0x276   : > { %7251 = vmatpush1.bf16.msra.mxu1 %v10627_v18  ;;  %v12564_v18 = vrot.slane %v12472_v42, %v11862_v50  ;;  %v1487_v42 = vcombine.high %v12495_v33, %v12495_v33  ;;  %v10725_v33 = vld [vmem:[%s11782_s27 + $0x924] ss:$8 sps:$4 sm:$0xff]  }
 0x277   : > { %7907 = vmatpush1.bf16.msra.mxu0 %v10630_v38  ;;  %7252 = vmatprep.subr.bf16.mxu1 %v10635_v43  ;;  %v12568_v38 = vrot.slane %v12476_v23, %v11862_v50  ;;  %v10711_v43 = vld [vmem:[%s11782_s27 + $0x900] ss:$8 sps:$4 sm:$0xff]   ;;  %v10717_v23 = vld [vmem:[%s11782_s27 + $0x910] ss:$8 sps:$4 sm:$0xff]  }
 0x278   : > { %7908 = vmatprep.subr.bf16.mxu0 %v10638_v45  ;;  %v10714_v45 = vld [vmem:[%s11782_s27 + $0x1900] ss:$8 sps:$4 sm:$0xff]  }
 0x27a   : > { %7253 = vmatpush1.bf16.msra.mxu1 %v10633_v25  ;;  %v10719_v25 = vld [vmem:[%s11782_s27 + $0x914] ss:$8 sps:$4 sm:$0xff]  }
 0x27b   : > { %7909 = vmatpush1.bf16.msra.mxu0 %v10636_v46  ;;  %7254 = vmatprep.subr.bf16.mxu1 %v10641_v26  ;;  %v10722_v46 = vld [vmem:[%s11782_s27 + $0x1914] ss:$8 sps:$4 sm:$0xff]   ;;  %v1683_v26 = vcombine.high %v12498_v15, %v12498_v15  ;;  %v10723_v15 = vld [vmem:[%s11782_s27 + $0x920] ss:$8 sps:$4 sm:$0xff]  }
 0x27c   : > { %7910 = vmatprep.subr.bf16.mxu0 %v10644_v47  ;;  %v10720_v47 = vld [vmem:[%s11782_s27 + $0x1910] ss:$8 sps:$4 sm:$0xff]  }
 0x27e   : > { %7255 = vmatpush1.bf16.msra.mxu1 %v10639_v37  ;;  %v10728_v37 = vld [vmem:[%s11782_s27 + $0x1924] ss:$8 sps:$4 sm:$0xff]  }
 0x27f   : > { %7911 = vmatpush1.bf16.msra.mxu0 %v10642_v48  ;;  %7256 = vmatprep.subr.bf16.mxu1 %v10647_v17  ;;  %v10726_v48 = vld [vmem:[%s11782_s27 + $0x1920] ss:$8 sps:$4 sm:$0xff]   ;;  %v10731_v17 = vld [vmem:[%s11782_s27 + $0x934] ss:$8 sps:$4 sm:$0xff]  }
 0x280   : > { %7912 = vmatprep.subr.bf16.mxu0 %v10650_v49  ;;  %v10734_v49 = vld [vmem:[%s11782_s27 + $0x1934] ss:$8 sps:$4 sm:$0xff]  }
 0x282   : > { %7257 = vmatpush1.bf16.msra.mxu1 %v10645_v51  ;;  %v10729_v51 = vld [vmem:[%s11782_s27 + $0x930] ss:$8 sps:$4 sm:$0xff]  }
 0x283   : > { %7913 = vmatpush1.bf16.msra.mxu0 %v10648_v52  ;;  %7258 = vmatprep.subr.bf16.mxu1 %v10653_v54  ;;  %v10732_v52 = vld [vmem:[%s11782_s27 + $0x1930] ss:$8 sps:$4 sm:$0xff]   ;;  %v10737_v54 = vld [vmem:[%s11782_s27 + $0x944] ss:$8 sps:$4 sm:$0xff]  }
 0x284   : > { %7914 = vmatprep.subr.bf16.mxu0 %v10656_v55  ;;  %v10740_v55 = vld [vmem:[%s11782_s27 + $0x1944] ss:$8 sps:$4 sm:$0xff]  }
 0x286   : > { %7259 = vmatpush1.bf16.msra.mxu1 %v10651_v39  ;;  %v10735_v39 = vld [vmem:[%s11782_s27 + $0x940] ss:$8 sps:$4 sm:$0xff]  }
 0x287   : > { %7915 = vmatpush1.bf16.msra.mxu0 %v10654_v40  ;;  %7260 = vmatprep.subr.bf16.mxu1 %v10659_v61  ;;  %v10738_v40 = vld [vmem:[%s11782_s27 + $0x1940] ss:$8 sps:$4 sm:$0xff]   ;;  %v10743_v61 = vld [vmem:[%s11782_s27 + $0x954] ss:$8 sps:$4 sm:$0xff]  }
 0x288   : > { %7916 = vmatprep.subr.bf16.mxu0 %v10662_v62  ;;  %v10746_v62 = vld [vmem:[%s11782_s27 + $0x1954] ss:$8 sps:$4 sm:$0xff]  }
 0x28a   : > { %7261 = vmatpush1.bf16.msra.mxu1 %v10657_v63  ;;  %v10741_v63 = vld [vmem:[%s11782_s27 + $0x950] ss:$8 sps:$4 sm:$0xff]  }
 0x28b   : > { %7917 = vmatpush1.bf16.msra.mxu0 %v10660_v0  ;;  %7262 = vmatprep.subr.bf16.mxu1 %v10665_v41  ;;  %v10744_v0 = vld [vmem:[%s11782_s27 + $0x1950] ss:$8 sps:$4 sm:$0xff]   ;;  %v10749_v41 = vld [vmem:[%s11782_s27 + $0x964] ss:$8 sps:$4 sm:$0xff]  }
 0x28c   : > { %7918 = vmatprep.subr.bf16.mxu0 %v10668_v1  ;;  %v10752_v1 = vld [vmem:[%s11782_s27 + $0x1964] ss:$8 sps:$4 sm:$0xff]  }
 0x28e   : > { %7263 = vmatpush1.bf16.msra.mxu1 %v10663_v56  ;;  %v10747_v56 = vld [vmem:[%s11782_s27 + $0x960] ss:$8 sps:$4 sm:$0xff]  }
 0x28f   : > { %7919 = vmatpush1.bf16.msra.mxu0 %v10666_v3  ;;  %7264 = vmatprep.subr.bf16.mxu1 %v10671_v58  ;;  %v10750_v3 = vld [vmem:[%s11782_s27 + $0x1960] ss:$8 sps:$4 sm:$0xff]   ;;  %v10755_v58 = vld [vmem:[%s11782_s27 + $0x974] ss:$8 sps:$4 sm:$0xff]  }
 0x290   : > { %7920 = vmatprep.subr.bf16.mxu0 %v10674_v4  ;;  %v10758_v4 = vld [vmem:[%s11782_s27 + $0x1974] ss:$8 sps:$4 sm:$0xff]  }
 0x292   : > { %7265 = vmatpush1.bf16.msra.mxu1 %v10669_v5  ;;  %v10753_v5 = vld [vmem:[%s11782_s27 + $0x970] ss:$8 sps:$4 sm:$0xff]  }
 0x293   : > { %7921 = vmatpush1.bf16.msra.mxu0 %v10672_v6  ;;  %7266 = vmatprep.subr.bf16.mxu1 %v10677_v7  ;;  %v10756_v6 = vld [vmem:[%s11782_s27 + $0x1970] ss:$8 sps:$4 sm:$0xff]   ;;  %v10761_v7 = vld [vmem:[%s11782_s27 + $0x984] ss:$8 sps:$4 sm:$0xff]  }
 0x294   : > { %7922 = vmatprep.subr.bf16.mxu0 %v10680_v8  ;;  %v10764_v8 = vld [vmem:[%s11782_s27 + $0x1984] ss:$8 sps:$4 sm:$0xff]  }
 0x296   : > { %7267 = vmatpush1.bf16.msra.mxu1 %v10675_v9  ;;  %v10759_v9 = vld [vmem:[%s11782_s27 + $0x980] ss:$8 sps:$4 sm:$0xff]  }
 0x297   : > { %7923 = vmatpush1.bf16.msra.mxu0 %v10678_v10  ;;  %7268 = vmatprep.subr.bf16.mxu1 %v10683_v11  ;;  %v10762_v10 = vld [vmem:[%s11782_s27 + $0x1980] ss:$8 sps:$4 sm:$0xff]   ;;  %v10767_v11 = vld [vmem:[%s11782_s27 + $0x994] ss:$8 sps:$4 sm:$0xff]  }
 0x298   : > { %7924 = vmatprep.subr.bf16.mxu0 %v10686_v12  ;;  %v10770_v12 = vld [vmem:[%s11782_s27 + $0x1994] ss:$8 sps:$4 sm:$0xff]  }
 0x29a   : > { %7269 = vmatpush1.bf16.msra.mxu1 %v10681_v19  ;;  %v10765_v19 = vld [vmem:[%s11782_s27 + $0x990] ss:$8 sps:$4 sm:$0xff]  }
 0x29b   : > { %7925 = vmatpush1.bf16.msra.mxu0 %v10684_v20  ;;  %7270 = vmatprep.subr.bf16.mxu1 %v10689_v21  ;;  %v10768_v20 = vld [vmem:[%s11782_s27 + $0x1990] ss:$8 sps:$4 sm:$0xff]   ;;  %v10773_v21 = vld [vmem:[%s11782_s27 + $0x9a4] ss:$8 sps:$4 sm:$0xff]  }
 0x29c   : > { %7926 = vmatprep.subr.bf16.mxu0 %v10692_v22  ;;  %v10776_v22 = vld [vmem:[%s11782_s27 + $0x19a4] ss:$8 sps:$4 sm:$0xff]  }
 0x29e   : > { %7271 = vmatpush1.bf16.msra.mxu1 %v10687_v2  ;;  %v10771_v2 = vld [vmem:[%s11782_s27 + $0x9a0] ss:$8 sps:$4 sm:$0xff]  }
 0x29f   : > { %7927 = vmatpush1.bf16.msra.mxu0 %v10690_v24  ;;  %7272 = vmatprep.subr.bf16.mxu1 %v10695_v13  ;;  %v10774_v24 = vld [vmem:[%s11782_s27 + $0x19a0] ss:$8 sps:$4 sm:$0xff]   ;;  %v10779_v13 = vld [vmem:[%s11782_s27 + $0x9b4] ss:$8 sps:$4 sm:$0xff]  }
 0x2a0   : > { %7928 = vmatprep.subr.bf16.mxu0 %v10698_v53  ;;  %v10782_v53 = vld [vmem:[%s11782_s27 + $0x19b4] ss:$8 sps:$4 sm:$0xff]  }
 0x2a2   : > { %7273 = vmatpush1.bf16.msra.mxu1 %v10693_v59  ;;  %v10777_v59 = vld [vmem:[%s11782_s27 + $0x9b0] ss:$8 sps:$4 sm:$0xff]  }
 0x2a3   : > { %7929 = vmatpush1.bf16.msra.mxu0 %v10696_v57  ;;  %7274 = vmatprep.subr.bf16.mxu1 %v10701_v27  ;;  %v10780_v57 = vld [vmem:[%s11782_s27 + $0x19b0] ss:$8 sps:$4 sm:$0xff]   ;;  %v10785_v27 = vld [vmem:[%s11782_s27 + $0x9c4] ss:$8 sps:$4 sm:$0xff]  }
 0x2a4   : > { %7930 = vmatprep.subr.bf16.mxu0 %v10704_v28  ;;  %v10788_v28 = vld [vmem:[%s11782_s27 + $0x19c4] ss:$8 sps:$4 sm:$0xff]  }
 0x2a6   : > { %7275 = vmatpush1.bf16.msra.mxu1 %v10699_v29  ;;  %v10783_v29 = vld [vmem:[%s11782_s27 + $0x9c0] ss:$8 sps:$4 sm:$0xff]  }
 0x2a7   : > { %7931 = vmatpush1.bf16.msra.mxu0 %v10702_v30  ;;  %7276 = vmatprep.subr.bf16.mxu1 %v10707_v31  ;;  %v10786_v30 = vld [vmem:[%s11782_s27 + $0x19c0] ss:$8 sps:$4 sm:$0xff]   ;;  %v10791_v31 = vld [vmem:[%s11782_s27 + $0x9d4] ss:$8 sps:$4 sm:$0xff]  }
 0x2a8   : > { %7932 = vmatprep.subr.bf16.mxu0 %v10710_v32  ;;  %v10794_v32 = vld [vmem:[%s11782_s27 + $0x19d4] ss:$8 sps:$4 sm:$0xff]  }
 0x2aa   : > { %7277 = vmatpush1.bf16.msra.mxu1 %v10705_v16  ;;  %v10789_v16 = vld [vmem:[%s11782_s27 + $0x9d0] ss:$8 sps:$4 sm:$0xff]  }
 0x2ab   : > { %7933 = vmatpush1.bf16.msra.mxu0 %v10708_v34  ;;  %7287 = vmatprep.subr.bf16.mxu1 %v10713_v35  ;;  %v10792_v34 = vld [vmem:[%s11782_s27 + $0x19d0] ss:$8 sps:$4 sm:$0xff]   ;;  %v10797_v35 = vld [vmem:[%s11782_s27 + $0x9e4] ss:$8 sps:$4 sm:$0xff]  }
 0x2ac   : > { %7943 = vmatprep.subr.bf16.mxu0 %v10716_v36  ;;  %v10800_v36 = vld [vmem:[%s11782_s27 + $0x19e4] ss:$8 sps:$4 sm:$0xff]  }
 0x2ad   : > { %7279 = vmatmul.mubr.bf16.vlgmr.msra.gmra.mrb[0].mxu1 %v12564_v18 }
 0x2ae   : > { %7935 = vmatmul.mubr.bf16.vlgmr.msra.gmra.mrb[0].mxu0 %v12568_v38  ;;  %7288 = vmatpush1.bf16.msra.mxu1 %v10711_v43  ;;  %v1440_v43 = vcombine.high %v12461_v60, %v12461_v60  ;;  %v10801_v60 = vld [vmem:[%s11782_s27 + $0x9f0] ss:$8 sps:$4 sm:$0xff]  }
 0x2af   : > { %7944 = vmatpush1.bf16.msra.mxu0 %v10714_v45  ;;  %7289 = vmatprep.subr.bf16.mxu1 %v10719_v25  ;;  %v1636_v45 = vcombine.high %v12464_v14, %v12464_v14  ;;  %v10795_v25 = vld [vmem:[%s11782_s27 + $0x9e0] ss:$8 sps:$4 sm:$0xff]   ;;  %v10804_v14 = vld [vmem:[%s11782_s27 + $0x19f0] ss:$8 sps:$4 sm:$0xff]  }
 0x2b0   : > { %7945 = vmatprep.subr.bf16.mxu0 %v10722_v46  ;;  %7319 = vmatprep.mubr.bf16.mxu1 %v1487_v42  ;;  %v10798_v46 = vld [vmem:[%s11782_s27 + $0x19e0] ss:$8 sps:$4 sm:$0xff]   ;;  %v10803_v42 = vld [vmem:[%s11782_s27 + $0x9f4] ss:$8 sps:$4 sm:$0xff]  }
 0x2b1   : > { %7975 = vmatprep.mubr.bf16.mxu0 %v1683_v26  ;;  %v10806_v26 = vld [vmem:[%s11782_s27 + $0x19f4] ss:$8 sps:$4 sm:$0xff]  }
 0x2b2   : > { %7290 = vmatpush1.bf16.msra.mxu1 %v10717_v23  ;;  %v12641_v23 = vrot.slane %v1440_v43, %v11862_v50  ;;  %v10873_v43 = vld [vmem:[%s11782_s27 + $0xab0] ss:$8 sps:$4 sm:$0xff]  }
 0x2b3   : > { %7946 = vmatpush1.bf16.msra.mxu0 %v10720_v47  ;;  %7291 = vmatprep.subr.bf16.mxu1 %v10725_v33  ;;  %v12644_v47 = vrot.slane %v1636_v45, %v11862_v50  ;;  %v10809_v33 = vld [vmem:[%s11782_s27 + $0xa04] ss:$8 sps:$4 sm:$0xff]   ;;  %v10876_v45 = vld [vmem:[%s11782_s27 + $0x1ab0] ss:$8 sps:$4 sm:$0xff]  }
 0x2b4   : > { %7947 = vmatprep.subr.bf16.mxu0 %v10728_v37  ;;  %v10812_v37 = vld [vmem:[%s11782_s27 + $0x1a04] ss:$8 sps:$4 sm:$0xff]  }
 0x2b6   : > { %7292 = vmatpush1.bf16.msra.mxu1 %v10723_v15  ;;  %v1456_v15 = vcombine.high %v12641_v23, %v12641_v23 }
 0x2b7   : > { %7948 = vmatpush1.bf16.msra.mxu0 %v10726_v48  ;;  %7293 = vmatprep.subr.bf16.mxu1 %v10731_v17  ;;  %v1652_v48 = vcombine.high %v12644_v47, %v12644_v47  ;;  %v1485_v17 = vcombine.high %v12564_v18, %v12564_v18 }
 0x2b8   : > { %7949 = vmatprep.subr.bf16.mxu0 %v10734_v49  ;;  %v1681_v49 = vcombine.high %v12568_v38, %v12568_v38  ;;  %v10813_v38 = vld [vmem:[%s11782_s27 + $0xa10] ss:$8 sps:$4 sm:$0xff]  }
 0x2b9   : > { %v12666_v18 = vrot.slane %v1652_v48, %v11862_v50  ;;  %v10896_v48 = vld [vmem:[%s11782_s27 + $0x1ae4] ss:$8 sps:$4 sm:$0xff]  }
 0x2ba   : > { %7294 = vmatpush1.bf16.msra.mxu1 %v10729_v51  ;;  %v10807_v51 = vld [vmem:[%s11782_s27 + $0xa00] ss:$8 sps:$4 sm:$0xff]  }
 0x2bb   : > { %7950 = vmatpush1.bf16.msra.mxu0 %v10732_v52  ;;  %7295 = vmatprep.subr.bf16.mxu1 %v10737_v54  ;;  %v10810_v52 = vld [vmem:[%s11782_s27 + $0x1a00] ss:$8 sps:$4 sm:$0xff]   ;;  %v10815_v54 = vld [vmem:[%s11782_s27 + $0xa14] ss:$8 sps:$4 sm:$0xff]  }
 0x2bc   : > { %7951 = vmatprep.subr.bf16.mxu0 %v10740_v55  ;;  %v10818_v55 = vld [vmem:[%s11782_s27 + $0x1a14] ss:$8 sps:$4 sm:$0xff]  }
 0x2be   : > { %7296 = vmatpush1.bf16.msra.mxu1 %v10735_v39  ;;  %v12663_v39 = vrot.slane %v1456_v15, %v11862_v50  ;;  %v10893_v15 = vld [vmem:[%s11782_s27 + $0xae4] ss:$8 sps:$4 sm:$0xff]  }
 0x2bf   : > { %7952 = vmatpush1.bf16.msra.mxu0 %v10738_v40  ;;  %7297 = vmatprep.subr.bf16.mxu1 %v10743_v61  ;;  %v10816_v40 = vld [vmem:[%s11782_s27 + $0x1a10] ss:$8 sps:$4 sm:$0xff]   ;;  %v10821_v61 = vld [vmem:[%s11782_s27 + $0xa24] ss:$8 sps:$4 sm:$0xff]  }
 0x2c0   : > { %7953 = vmatprep.subr.bf16.mxu0 %v10746_v62  ;;  %v10824_v62 = vld [vmem:[%s11782_s27 + $0x1a24] ss:$8 sps:$4 sm:$0xff]  }
 0x2c2   : > { %7298 = vmatpush1.bf16.msra.mxu1 %v10741_v63  ;;  %v10819_v63 = vld [vmem:[%s11782_s27 + $0xa20] ss:$8 sps:$4 sm:$0xff]  }
 0x2c3   : > { %7954 = vmatpush1.bf16.msra.mxu0 %v10744_v0  ;;  %7299 = vmatprep.subr.bf16.mxu1 %v10749_v41  ;;  %v10822_v0 = vld [vmem:[%s11782_s27 + $0x1a20] ss:$8 sps:$4 sm:$0xff]   ;;  %v10827_v41 = vld [vmem:[%s11782_s27 + $0xa34] ss:$8 sps:$4 sm:$0xff]  }
 0x2c4   : > { %7955 = vmatprep.subr.bf16.mxu0 %v10752_v1  ;;  %v10830_v1 = vld [vmem:[%s11782_s27 + $0x1a34] ss:$8 sps:$4 sm:$0xff]  }
 0x2c6   : > { %7300 = vmatpush1.bf16.msra.mxu1 %v10747_v56  ;;  %v10825_v56 = vld [vmem:[%s11782_s27 + $0xa30] ss:$8 sps:$4 sm:$0xff]  }
 0x2c7   : > { %7956 = vmatpush1.bf16.msra.mxu0 %v10750_v3  ;;  %7301 = vmatprep.subr.bf16.mxu1 %v10755_v58  ;;  %v10828_v3 = vld [vmem:[%s11782_s27 + $0x1a30] ss:$8 sps:$4 sm:$0xff]   ;;  %v10833_v58 = vld [vmem:[%s11782_s27 + $0xa44] ss:$8 sps:$4 sm:$0xff]  }
 0x2c8   : > { %7957 = vmatprep.subr.bf16.mxu0 %v10758_v4  ;;  %v10836_v4 = vld [vmem:[%s11782_s27 + $0x1a44] ss:$8 sps:$4 sm:$0xff]  }
 0x2ca   : > { %7302 = vmatpush1.bf16.msra.mxu1 %v10753_v5  ;;  %v10831_v5 = vld [vmem:[%s11782_s27 + $0xa40] ss:$8 sps:$4 sm:$0xff]  }
 0x2cb   : > { %7958 = vmatpush1.bf16.msra.mxu0 %v10756_v6  ;;  %7303 = vmatprep.subr.bf16.mxu1 %v10761_v7  ;;  %v10834_v6 = vld [vmem:[%s11782_s27 + $0x1a40] ss:$8 sps:$4 sm:$0xff]   ;;  %v10839_v7 = vld [vmem:[%s11782_s27 + $0xa54] ss:$8 sps:$4 sm:$0xff]  }
 0x2cc   : > { %7959 = vmatprep.subr.bf16.mxu0 %v10764_v8  ;;  %v10842_v8 = vld [vmem:[%s11782_s27 + $0x1a54] ss:$8 sps:$4 sm:$0xff]  }
 0x2ce   : > { %7304 = vmatpush1.bf16.msra.mxu1 %v10759_v9  ;;  %v10837_v9 = vld [vmem:[%s11782_s27 + $0xa50] ss:$8 sps:$4 sm:$0xff]  }
 0x2cf   : > { %7960 = vmatpush1.bf16.msra.mxu0 %v10762_v10  ;;  %7305 = vmatprep.subr.bf16.mxu1 %v10767_v11  ;;  %v10840_v10 = vld [vmem:[%s11782_s27 + $0x1a50] ss:$8 sps:$4 sm:$0xff]   ;;  %v10845_v11 = vld [vmem:[%s11782_s27 + $0xa64] ss:$8 sps:$4 sm:$0xff]  }
 0x2d0   : > { %7961 = vmatprep.subr.bf16.mxu0 %v10770_v12  ;;  %v10848_v12 = vld [vmem:[%s11782_s27 + $0x1a64] ss:$8 sps:$4 sm:$0xff]  }
 0x2d2   : > { %7306 = vmatpush1.bf16.msra.mxu1 %v10765_v19  ;;  %v10843_v19 = vld [vmem:[%s11782_s27 + $0xa60] ss:$8 sps:$4 sm:$0xff]  }
 0x2d3   : > { %7962 = vmatpush1.bf16.msra.mxu0 %v10768_v20  ;;  %7307 = vmatprep.subr.bf16.mxu1 %v10773_v21  ;;  %v10846_v20 = vld [vmem:[%s11782_s27 + $0x1a60] ss:$8 sps:$4 sm:$0xff]   ;;  %v10851_v21 = vld [vmem:[%s11782_s27 + $0xa74] ss:$8 sps:$4 sm:$0xff]  }
 0x2d4   : > { %7963 = vmatprep.subr.bf16.mxu0 %v10776_v22  ;;  %v10854_v22 = vld [vmem:[%s11782_s27 + $0x1a74] ss:$8 sps:$4 sm:$0xff]  }
 0x2d6   : > { %7308 = vmatpush1.bf16.msra.mxu1 %v10771_v2  ;;  %v10849_v2 = vld [vmem:[%s11782_s27 + $0xa70] ss:$8 sps:$4 sm:$0xff]  }
 0x2d7   : > { %7964 = vmatpush1.bf16.msra.mxu0 %v10774_v24  ;;  %7309 = vmatprep.subr.bf16.mxu1 %v10779_v13  ;;  %v10852_v24 = vld [vmem:[%s11782_s27 + $0x1a70] ss:$8 sps:$4 sm:$0xff]   ;;  %v10857_v13 = vld [vmem:[%s11782_s27 + $0xa84] ss:$8 sps:$4 sm:$0xff]  }
 0x2d8   : > { %7965 = vmatprep.subr.bf16.mxu0 %v10782_v53  ;;  %v10860_v53 = vld [vmem:[%s11782_s27 + $0x1a84] ss:$8 sps:$4 sm:$0xff]  }
 0x2da   : > { %7310 = vmatpush1.bf16.msra.mxu1 %v10777_v59  ;;  %v10855_v59 = vld [vmem:[%s11782_s27 + $0xa80] ss:$8 sps:$4 sm:$0xff]  }
 0x2db   : > { %7966 = vmatpush1.bf16.msra.mxu0 %v10780_v57  ;;  %7311 = vmatprep.subr.bf16.mxu1 %v10785_v27  ;;  %v10858_v57 = vld [vmem:[%s11782_s27 + $0x1a80] ss:$8 sps:$4 sm:$0xff]   ;;  %v10863_v27 = vld [vmem:[%s11782_s27 + $0xa94] ss:$8 sps:$4 sm:$0xff]  }
 0x2dc   : > { %7967 = vmatprep.subr.bf16.mxu0 %v10788_v28  ;;  %v10866_v28 = vld [vmem:[%s11782_s27 + $0x1a94] ss:$8 sps:$4 sm:$0xff]  }
 0x2de   : > { %7312 = vmatpush1.bf16.msra.mxu1 %v10783_v29  ;;  %v10861_v29 = vld [vmem:[%s11782_s27 + $0xa90] ss:$8 sps:$4 sm:$0xff]  }
 0x2df   : > { %7968 = vmatpush1.bf16.msra.mxu0 %v10786_v30  ;;  %7313 = vmatprep.subr.bf16.mxu1 %v10791_v31  ;;  %v10864_v30 = vld [vmem:[%s11782_s27 + $0x1a90] ss:$8 sps:$4 sm:$0xff]   ;;  %v10869_v31 = vld [vmem:[%s11782_s27 + $0xaa4] ss:$8 sps:$4 sm:$0xff]  }
 0x2e0   : > { %7969 = vmatprep.subr.bf16.mxu0 %v10794_v32  ;;  %v10872_v32 = vld [vmem:[%s11782_s27 + $0x1aa4] ss:$8 sps:$4 sm:$0xff]  }
 0x2e2   : > { %7314 = vmatpush1.bf16.msra.mxu1 %v10789_v16  ;;  %v10867_v16 = vld [vmem:[%s11782_s27 + $0xaa0] ss:$8 sps:$4 sm:$0xff]  }
 0x2e3   : > { %7970 = vmatpush1.bf16.msra.mxu0 %v10792_v34  ;;  %7315 = vmatprep.subr.bf16.mxu1 %v10797_v35  ;;  %v10870_v34 = vld [vmem:[%s11782_s27 + $0x1aa0] ss:$8 sps:$4 sm:$0xff]   ;;  %v10875_v35 = vld [vmem:[%s11782_s27 + $0xab4] ss:$8 sps:$4 sm:$0xff]  }
 0x2e4   : > { %7971 = vmatprep.subr.bf16.mxu0 %v10800_v36  ;;  %v10878_v36 = vld [vmem:[%s11782_s27 + $0x1ab4] ss:$8 sps:$4 sm:$0xff]  }
 0x2e6   : > { %7316 = vmatpush1.bf16.msra.mxu1 %v10795_v25  ;;  %v10881_v25 = vld [vmem:[%s11782_s27 + $0xac4] ss:$8 sps:$4 sm:$0xff]  }
 0x2e7   : > { %7972 = vmatpush1.bf16.msra.mxu0 %v10798_v46  ;;  %7317 = vmatprep.subr.bf16.mxu1 %v10803_v42  ;;  %v10884_v46 = vld [vmem:[%s11782_s27 + $0x1ac4] ss:$8 sps:$4 sm:$0xff]   ;;  %v10879_v42 = vld [vmem:[%s11782_s27 + $0xac0] ss:$8 sps:$4 sm:$0xff]  }
 0x2e8   : > { %7973 = vmatprep.subr.bf16.mxu0 %v10806_v26  ;;  %v10882_v26 = vld [vmem:[%s11782_s27 + $0x1ac0] ss:$8 sps:$4 sm:$0xff]  }
 0x2ea   : > { %7318 = vmatpush1.bf16.msra.mxu1 %v10801_v60  ;;  %v10887_v60 = vld [vmem:[%s11782_s27 + $0xad4] ss:$8 sps:$4 sm:$0xff]  }
 0x2eb   : > { %7974 = vmatpush1.bf16.msra.mxu0 %v10804_v14  ;;  %7328 = vmatprep.subr.bf16.mxu1 %v10809_v33  ;;  %v10890_v14 = vld [vmem:[%s11782_s27 + $0x1ad4] ss:$8 sps:$4 sm:$0xff]   ;;  %v10885_v33 = vld [vmem:[%s11782_s27 + $0xad0] ss:$8 sps:$4 sm:$0xff]  }
 0x2ec   : > { %7984 = vmatprep.subr.bf16.mxu0 %v10812_v37  ;;  %v10888_v37 = vld [vmem:[%s11782_s27 + $0x1ad0] ss:$8 sps:$4 sm:$0xff]  }
 0x2ed   : > { %7320 = vmatmul.mubr.bf16.vlgmr.msra.gmra.mrb[0].mxu1 %v1485_v17  ;;  %v10891_v17 = vld [vmem:[%s11782_s27 + $0xae0] ss:$8 sps:$4 sm:$0xff]  }
 0x2ee   : > { %7976 = vmatmul.mubr.bf16.vlgmr.msra.gmra.mrb[0].mxu0 %v1681_v49  ;;  %7329 = vmatpush1.bf16.msra.mxu1 %v10807_v51  ;;  %v10894_v49 = vld [vmem:[%s11782_s27 + $0x1ae0] ss:$8 sps:$4 sm:$0xff]   ;;  %v10899_v51 = vld [vmem:[%s11782_s27 + $0xaf4] ss:$8 sps:$4 sm:$0xff]  }
 0x2ef   : > { %7985 = vmatpush1.bf16.msra.mxu0 %v10810_v52  ;;  %7330 = vmatprep.subr.bf16.mxu1 %v10815_v54  ;;  %v10902_v52 = vld [vmem:[%s11782_s27 + $0x1af4] ss:$8 sps:$4 sm:$0xff]   ;;  %v10897_v54 = vld [vmem:[%s11782_s27 + $0xaf0] ss:$8 sps:$4 sm:$0xff]  }
 0x2f0   : > { %7986 = vmatprep.subr.bf16.mxu0 %v10818_v55  ;;  %7360 = vmatprep.mubr.bf16.mxu1 %v12663_v39  ;;  %v10900_v55 = vld [vmem:[%s11782_s27 + $0x1af0] ss:$8 sps:$4 sm:$0xff]  }
 0x2f1   : > { %8016 = vmatprep.mubr.bf16.mxu0 %v12666_v18 }
 0x2f2   : > { %7331 = vmatpush1.bf16.msra.mxu1 %v10813_v38  ;;  %v10906_v38 = vld [vmem:[%s11782_s27 + $0xb04] ss:$8 sps:$4 sm:$0xff]  }
 0x2f3   : > { %7987 = vmatpush1.bf16.msra.mxu0 %v10816_v40  ;;  %7332 = vmatprep.subr.bf16.mxu1 %v10821_v61  ;;  %v10910_v40 = vld [vmem:[%s11782_s27 + $0x1b04] ss:$8 sps:$4 sm:$0xff]   ;;  %v12732_v61 = vrot.slane %v12641_v23, %v11862_v50  ;;  %v1488_v23 = vcombine.high %v12663_v39, %v12663_v39 }
 0x2f4   : > { %7988 = vmatprep.subr.bf16.mxu0 %v10824_v62  ;;  %v12736_v62 = vrot.slane %v12644_v47, %v11862_v50  ;;  %v10911_v47 = vld [vmem:[%s11782_s27 + $0xb10] ss:$8 sps:$4 sm:$0xff]   ;;  %v10919_v39 = vld [vmem:[%s11782_s27 + $0xb24] ss:$8 sps:$4 sm:$0xff]  }
 0x2f6   : > { %7333 = vmatpush1.bf16.msra.mxu1 %v10819_v63  ;;  %v10904_v63 = vld [vmem:[%s11782_s27 + $0xb00] ss:$8 sps:$4 sm:$0xff]  }
 0x2f7   : > { %7989 = vmatpush1.bf16.msra.mxu0 %v10822_v0  ;;  %7334 = vmatprep.subr.bf16.mxu1 %v10827_v41  ;;  %v10908_v0 = vld [vmem:[%s11782_s27 + $0x1b00] ss:$8 sps:$4 sm:$0xff]   ;;  %v10913_v41 = vld [vmem:[%s11782_s27 + $0xb14] ss:$8 sps:$4 sm:$0xff]  }
 0x2f8   : > { %7990 = vmatprep.subr.bf16.mxu0 %v10830_v1  ;;  %v10916_v1 = vld [vmem:[%s11782_s27 + $0x1b14] ss:$8 sps:$4 sm:$0xff]  }
 0x2fa   : > { %7335 = vmatpush1.bf16.msra.mxu1 %v10825_v56  ;;  %v1684_v56 = vcombine.high %v12666_v18, %v12666_v18  ;;  %v10917_v18 = vld [vmem:[%s11782_s27 + $0xb20] ss:$8 sps:$4 sm:$0xff]  }
 0x2fb   : > { %7991 = vmatpush1.bf16.msra.mxu0 %v10828_v3  ;;  %7336 = vmatprep.subr.bf16.mxu1 %v10833_v58  ;;  %v10914_v3 = vld [vmem:[%s11782_s27 + $0x1b10] ss:$8 sps:$4 sm:$0xff]   ;;  %v10922_v58 = vld [vmem:[%s11782_s27 + $0x1b24] ss:$8 sps:$4 sm:$0xff]  }
 0x2fc   : > { %7992 = vmatprep.subr.bf16.mxu0 %v10836_v4  ;;  %v10920_v4 = vld [vmem:[%s11782_s27 + $0x1b20] ss:$8 sps:$4 sm:$0xff]  }
 0x2fe   : > { %7337 = vmatpush1.bf16.msra.mxu1 %v10831_v5  ;;  %v10925_v5 = vld [vmem:[%s11782_s27 + $0xb34] ss:$8 sps:$4 sm:$0xff]  }
 0x2ff   : > { %7993 = vmatpush1.bf16.msra.mxu0 %v10834_v6  ;;  %7338 = vmatprep.subr.bf16.mxu1 %v10839_v7  ;;  %v10928_v6 = vld [vmem:[%s11782_s27 + $0x1b34] ss:$8 sps:$4 sm:$0xff]   ;;  %v10923_v7 = vld [vmem:[%s11782_s27 + $0xb30] ss:$8 sps:$4 sm:$0xff]  }
 0x300   : > { %7994 = vmatprep.subr.bf16.mxu0 %v10842_v8  ;;  %v10926_v8 = vld [vmem:[%s11782_s27 + $0x1b30] ss:$8 sps:$4 sm:$0xff]  }
 0x302   : > { %7339 = vmatpush1.bf16.msra.mxu1 %v10837_v9  ;;  %v10931_v9 = vld [vmem:[%s11782_s27 + $0xb44] ss:$8 sps:$4 sm:$0xff]  }
 0x303   : > { %7995 = vmatpush1.bf16.msra.mxu0 %v10840_v10  ;;  %7340 = vmatprep.subr.bf16.mxu1 %v10845_v11  ;;  %v10934_v10 = vld [vmem:[%s11782_s27 + $0x1b44] ss:$8 sps:$4 sm:$0xff]   ;;  %v10929_v11 = vld [vmem:[%s11782_s27 + $0xb40] ss:$8 sps:$4 sm:$0xff]  }
 0x304   : > { %7996 = vmatprep.subr.bf16.mxu0 %v10848_v12  ;;  %v10932_v12 = vld [vmem:[%s11782_s27 + $0x1b40] ss:$8 sps:$4 sm:$0xff]  }
 0x306   : > { %7341 = vmatpush1.bf16.msra.mxu1 %v10843_v19  ;;  %v10937_v19 = vld [vmem:[%s11782_s27 + $0xb54] ss:$8 sps:$4 sm:$0xff]  }
 0x307   : > { %7997 = vmatpush1.bf16.msra.mxu0 %v10846_v20  ;;  %7342 = vmatprep.subr.bf16.mxu1 %v10851_v21  ;;  %v10940_v20 = vld [vmem:[%s11782_s27 + $0x1b54] ss:$8 sps:$4 sm:$0xff]   ;;  %v10935_v21 = vld [vmem:[%s11782_s27 + $0xb50] ss:$8 sps:$4 sm:$0xff]  }
 0x308   : > { %7998 = vmatprep.subr.bf16.mxu0 %v10854_v22  ;;  %v10938_v22 = vld [vmem:[%s11782_s27 + $0x1b50] ss:$8 sps:$4 sm:$0xff]  }
 0x30a   : > { %7343 = vmatpush1.bf16.msra.mxu1 %v10849_v2  ;;  %v10943_v2 = vld [vmem:[%s11782_s27 + $0xb64] ss:$8 sps:$4 sm:$0xff]  }
 0x30b   : > { %7999 = vmatpush1.bf16.msra.mxu0 %v10852_v24  ;;  %7344 = vmatprep.subr.bf16.mxu1 %v10857_v13  ;;  %v10946_v24 = vld [vmem:[%s11782_s27 + $0x1b64] ss:$8 sps:$4 sm:$0xff]   ;;  %v10941_v13 = vld [vmem:[%s11782_s27 + $0xb60] ss:$8 sps:$4 sm:$0xff]  }
 0x30c   : > { %8000 = vmatprep.subr.bf16.mxu0 %v10860_v53  ;;  %v10944_v53 = vld [vmem:[%s11782_s27 + $0x1b60] ss:$8 sps:$4 sm:$0xff]  }
 0x30e   : > { %7345 = vmatpush1.bf16.msra.mxu1 %v10855_v59  ;;  %v10949_v59 = vld [vmem:[%s11782_s27 + $0xb74] ss:$8 sps:$4 sm:$0xff]  }
 0x30f   : > { %8001 = vmatpush1.bf16.msra.mxu0 %v10858_v57  ;;  %7346 = vmatprep.subr.bf16.mxu1 %v10863_v27  ;;  %v10952_v57 = vld [vmem:[%s11782_s27 + $0x1b74] ss:$8 sps:$4 sm:$0xff]   ;;  %v10947_v27 = vld [vmem:[%s11782_s27 + $0xb70] ss:$8 sps:$4 sm:$0xff]  }
 0x310   : > { %8002 = vmatprep.subr.bf16.mxu0 %v10866_v28  ;;  %v10950_v28 = vld [vmem:[%s11782_s27 + $0x1b70] ss:$8 sps:$4 sm:$0xff]  }
 0x312   : > { %7347 = vmatpush1.bf16.msra.mxu1 %v10861_v29  ;;  %v10955_v29 = vld [vmem:[%s11782_s27 + $0xb84] ss:$8 sps:$4 sm:$0xff]  }
 0x313   : > { %8003 = vmatpush1.bf16.msra.mxu0 %v10864_v30  ;;  %7348 = vmatprep.subr.bf16.mxu1 %v10869_v31  ;;  %v10958_v30 = vld [vmem:[%s11782_s27 + $0x1b84] ss:$8 sps:$4 sm:$0xff]   ;;  %v10953_v31 = vld [vmem:[%s11782_s27 + $0xb80] ss:$8 sps:$4 sm:$0xff]  }
 0x314   : > { %8004 = vmatprep.subr.bf16.mxu0 %v10872_v32  ;;  %v10956_v32 = vld [vmem:[%s11782_s27 + $0x1b80] ss:$8 sps:$4 sm:$0xff]  }
 0x316   : > { %7349 = vmatpush1.bf16.msra.mxu1 %v10867_v16  ;;  %v10961_v16 = vld [vmem:[%s11782_s27 + $0xb94] ss:$8 sps:$4 sm:$0xff]  }
 0x317   : > { %8005 = vmatpush1.bf16.msra.mxu0 %v10870_v34  ;;  %7350 = vmatprep.subr.bf16.mxu1 %v10875_v35  ;;  %v10964_v34 = vld [vmem:[%s11782_s27 + $0x1b94] ss:$8 sps:$4 sm:$0xff]   ;;  %v10959_v35 = vld [vmem:[%s11782_s27 + $0xb90] ss:$8 sps:$4 sm:$0xff]  }
 0x318   : > { %8006 = vmatprep.subr.bf16.mxu0 %v10878_v36  ;;  %v10962_v36 = vld [vmem:[%s11782_s27 + $0x1b90] ss:$8 sps:$4 sm:$0xff]  }
 0x31a   : > { %7351 = vmatpush1.bf16.msra.mxu1 %v10873_v43  ;;  %v10967_v43 = vld [vmem:[%s11782_s27 + $0xba4] ss:$8 sps:$4 sm:$0xff]  }
 0x31b   : > { %8007 = vmatpush1.bf16.msra.mxu0 %v10876_v45  ;;  %7352 = vmatprep.subr.bf16.mxu1 %v10881_v25  ;;  %v10970_v45 = vld [vmem:[%s11782_s27 + $0x1ba4] ss:$8 sps:$4 sm:$0xff]   ;;  %v10965_v25 = vld [vmem:[%s11782_s27 + $0xba0] ss:$8 sps:$4 sm:$0xff]  }
 0x31c   : > { %8008 = vmatprep.subr.bf16.mxu0 %v10884_v46  ;;  %v10968_v46 = vld [vmem:[%s11782_s27 + $0x1ba0] ss:$8 sps:$4 sm:$0xff]  }
 0x31e   : > { %7353 = vmatpush1.bf16.msra.mxu1 %v10879_v42  ;;  %v10973_v42 = vld [vmem:[%s11782_s27 + $0xbb4] ss:$8 sps:$4 sm:$0xff]  }
 0x31f   : > { %8009 = vmatpush1.bf16.msra.mxu0 %v10882_v26  ;;  %7354 = vmatprep.subr.bf16.mxu1 %v10887_v60  ;;  %v10976_v26 = vld [vmem:[%s11782_s27 + $0x1bb4] ss:$8 sps:$4 sm:$0xff]   ;;  %v10971_v60 = vld [vmem:[%s11782_s27 + $0xbb0] ss:$8 sps:$4 sm:$0xff]  }
 0x320   : > { %8010 = vmatprep.subr.bf16.mxu0 %v10890_v14  ;;  %v10974_v14 = vld [vmem:[%s11782_s27 + $0x1bb0] ss:$8 sps:$4 sm:$0xff]  }
 0x322   : > { %7355 = vmatpush1.bf16.msra.mxu1 %v10885_v33  ;;  %v10979_v33 = vld [vmem:[%s11782_s27 + $0xbc4] ss:$8 sps:$4 sm:$0xff]  }
 0x323   : > { %8011 = vmatpush1.bf16.msra.mxu0 %v10888_v37  ;;  %7356 = vmatprep.subr.bf16.mxu1 %v10893_v15  ;;  %v10982_v37 = vld [vmem:[%s11782_s27 + $0x1bc4] ss:$8 sps:$4 sm:$0xff]   ;;  %v10977_v15 = vld [vmem:[%s11782_s27 + $0xbc0] ss:$8 sps:$4 sm:$0xff]  }
 0x324   : > { %8012 = vmatprep.subr.bf16.mxu0 %v10896_v48  ;;  %v10980_v48 = vld [vmem:[%s11782_s27 + $0x1bc0] ss:$8 sps:$4 sm:$0xff]  }
 0x326   : > { %7357 = vmatpush1.bf16.msra.mxu1 %v10891_v17  ;;  %v10985_v17 = vld [vmem:[%s11782_s27 + $0xbd4] ss:$8 sps:$4 sm:$0xff]  }
 0x327   : > { %8013 = vmatpush1.bf16.msra.mxu0 %v10894_v49  ;;  %7358 = vmatprep.subr.bf16.mxu1 %v10899_v51  ;;  %v10988_v49 = vld [vmem:[%s11782_s27 + $0x1bd4] ss:$8 sps:$4 sm:$0xff]   ;;  %v10983_v51 = vld [vmem:[%s11782_s27 + $0xbd0] ss:$8 sps:$4 sm:$0xff]  }
 0x328   : > { %8014 = vmatprep.subr.bf16.mxu0 %v10902_v52  ;;  %v10986_v52 = vld [vmem:[%s11782_s27 + $0x1bd0] ss:$8 sps:$4 sm:$0xff]  }
 0x32a   : > { %7359 = vmatpush1.bf16.msra.mxu1 %v10897_v54  ;;  %v10991_v54 = vld [vmem:[%s11782_s27 + $0xbe4] ss:$8 sps:$4 sm:$0xff]  }
 0x32b   : > { %8015 = vmatpush1.bf16.msra.mxu0 %v10900_v55  ;;  %7369 = vmatprep.subr.bf16.mxu1 %v10906_v38  ;;  %v10994_v55 = vld [vmem:[%s11782_s27 + $0x1be4] ss:$8 sps:$4 sm:$0xff]   ;;  %v12801_v38 = vld [vmem:[%s11859_s10 + $0x18] sm:$0xff] }
 0x32c   : > { %8025 = vmatprep.subr.bf16.mxu0 %v10910_v40  ;;  %v12804_v40 = vld [vmem:[%s11859_s10 + $0x38] sm:$0xff] }
 0x32d   : > { %7361 = vmatmul.mubr.bf16.vlgmr.msra.gmra.mrb[0].mxu1 %v12732_v61 }
 0x32e   : > { %8017 = vmatmul.mubr.bf16.vlgmr.msra.gmra.mrb[0].mxu0 %v12736_v62  ;;  %7370 = vmatpush1.bf16.msra.mxu1 %v10904_v63  ;;  %v10989_v63 = vld [vmem:[%s11782_s27 + $0xbe0] ss:$8 sps:$4 sm:$0xff]  }
 0x32f   : > { %8026 = vmatpush1.bf16.msra.mxu0 %v10908_v0  ;;  %7371 = vmatprep.subr.bf16.mxu1 %v10913_v41  ;;  %v10992_v0 = vld [vmem:[%s11782_s27 + $0x1be0] ss:$8 sps:$4 sm:$0xff]   ;;  %v10997_v41 = vld [vmem:[%s11782_s27 + $0xbf4] ss:$8 sps:$4 sm:$0xff]  }
 0x330   : > { %8027 = vmatprep.subr.bf16.mxu0 %v10916_v1  ;;  %7401 = vmatprep.mubr.bf16.mxu1 %v1488_v23  ;;  %v11000_v1 = vld [vmem:[%s11782_s27 + $0x1bf4] ss:$8 sps:$4 sm:$0xff]   ;;  %v12812_v23 = vrot.slane %v12801_v38, %v11862_v50 }
 0x331   : > { %8057 = vmatprep.mubr.bf16.mxu0 %v1684_v56  ;;  %v12816_v56 = vrot.slane %v12804_v40, %v11862_v50 }
 0x332   : > { %7372 = vmatpush1.bf16.msra.mxu1 %v10911_v47  ;;  %v10995_v47 = vld [vmem:[%s11782_s27 + $0xbf0] ss:$8 sps:$4 sm:$0xff]  }
 0x333   : > { %8028 = vmatpush1.bf16.msra.mxu0 %v10914_v3  ;;  %7373 = vmatprep.subr.bf16.mxu1 %v10919_v39  ;;  %v10998_v3 = vld [vmem:[%s11782_s27 + $0x1bf0] ss:$8 sps:$4 sm:$0xff]   ;;  %v11003_v39 = vld [vmem:[%s11782_s27 + $0xc04] ss:$8 sps:$4 sm:$0xff]  }
 0x334   : > { %8029 = vmatprep.subr.bf16.mxu0 %v10922_v58  ;;  %v11006_v58 = vld [vmem:[%s11782_s27 + $0x1c04] ss:$8 sps:$4 sm:$0xff]  }
 0x336   : > { %7374 = vmatpush1.bf16.msra.mxu1 %v10917_v18  ;;  %v1504_v18 = vcombine.high %v12812_v23, %v12812_v23 }
 0x337   : > { %8030 = vmatpush1.bf16.msra.mxu0 %v10920_v4  ;;  %7375 = vmatprep.subr.bf16.mxu1 %v10925_v5  ;;  %v1700_v4 = vcombine.high %v12816_v56, %v12816_v56  ;;  %v1486_v5 = vcombine.high %v12732_v61, %v12732_v61 }
 0x338   : > { %8031 = vmatprep.subr.bf16.mxu0 %v10928_v6  ;;  %v1682_v6 = vcombine.high %v12736_v62, %v12736_v62  ;;  %v11007_v62 = vld [vmem:[%s11782_s27 + $0xc10] ss:$8 sps:$4 sm:$0xff]  }
 0x339   : > { %v12838_v61 = vrot.slane %v1700_v4, %v11862_v50  ;;  %v11082_v4 = vld [vmem:[%s11782_s27 + $0x1cd0] ss:$8 sps:$4 sm:$0xff]  }
 0x33a   : > { %7376 = vmatpush1.bf16.msra.mxu1 %v10923_v7  ;;  %v11001_v7 = vld [vmem:[%s11782_s27 + $0xc00] ss:$8 sps:$4 sm:$0xff]  }
 0x33b   : > { %8032 = vmatpush1.bf16.msra.mxu0 %v10926_v8  ;;  %7377 = vmatprep.subr.bf16.mxu1 %v10931_v9  ;;  %v11004_v8 = vld [vmem:[%s11782_s27 + $0x1c00] ss:$8 sps:$4 sm:$0xff]   ;;  %v11009_v9 = vld [vmem:[%s11782_s27 + $0xc14] ss:$8 sps:$4 sm:$0xff]  }
 0x33c   : > { %8033 = vmatprep.subr.bf16.mxu0 %v10934_v10  ;;  %v11012_v10 = vld [vmem:[%s11782_s27 + $0x1c14] ss:$8 sps:$4 sm:$0xff]  }
 0x33e   : > { %7378 = vmatpush1.bf16.msra.mxu1 %v10929_v11  ;;  %v12835_v11 = vrot.slane %v1504_v18, %v11862_v50  ;;  %v11079_v18 = vld [vmem:[%s11782_s27 + $0xcd0] ss:$8 sps:$4 sm:$0xff]  }
 0x33f   : > { %8034 = vmatpush1.bf16.msra.mxu0 %v10932_v12  ;;  %7379 = vmatprep.subr.bf16.mxu1 %v10937_v19  ;;  %v11010_v12 = vld [vmem:[%s11782_s27 + $0x1c10] ss:$8 sps:$4 sm:$0xff]   ;;  %v11015_v19 = vld [vmem:[%s11782_s27 + $0xc24] ss:$8 sps:$4 sm:$0xff]  }
 0x340   : > { %8035 = vmatprep.subr.bf16.mxu0 %v10940_v20  ;;  %v11018_v20 = vld [vmem:[%s11782_s27 + $0x1c24] ss:$8 sps:$4 sm:$0xff]  }
 0x342   : > { %7380 = vmatpush1.bf16.msra.mxu1 %v10935_v21  ;;  %v11013_v21 = vld [vmem:[%s11782_s27 + $0xc20] ss:$8 sps:$4 sm:$0xff]  }
 0x343   : > { %8036 = vmatpush1.bf16.msra.mxu0 %v10938_v22  ;;  %7381 = vmatprep.subr.bf16.mxu1 %v10943_v2  ;;  %v11016_v22 = vld [vmem:[%s11782_s27 + $0x1c20] ss:$8 sps:$4 sm:$0xff]   ;;  %v11021_v2 = vld [vmem:[%s11782_s27 + $0xc34] ss:$8 sps:$4 sm:$0xff]  }
 0x344   : > { %8037 = vmatprep.subr.bf16.mxu0 %v10946_v24  ;;  %v11024_v24 = vld [vmem:[%s11782_s27 + $0x1c34] ss:$8 sps:$4 sm:$0xff]  }
 0x346   : > { %7382 = vmatpush1.bf16.msra.mxu1 %v10941_v13  ;;  %v11019_v13 = vld [vmem:[%s11782_s27 + $0xc30] ss:$8 sps:$4 sm:$0xff]  }
 0x347   : > { %8038 = vmatpush1.bf16.msra.mxu0 %v10944_v53  ;;  %7383 = vmatprep.subr.bf16.mxu1 %v10949_v59  ;;  %v11022_v53 = vld [vmem:[%s11782_s27 + $0x1c30] ss:$8 sps:$4 sm:$0xff]   ;;  %v11027_v59 = vld [vmem:[%s11782_s27 + $0xc44] ss:$8 sps:$4 sm:$0xff]  }
 0x348   : > { %8039 = vmatprep.subr.bf16.mxu0 %v10952_v57  ;;  %v11030_v57 = vld [vmem:[%s11782_s27 + $0x1c44] ss:$8 sps:$4 sm:$0xff]  }
 0x34a   : > { %7384 = vmatpush1.bf16.msra.mxu1 %v10947_v27  ;;  %v11025_v27 = vld [vmem:[%s11782_s27 + $0xc40] ss:$8 sps:$4 sm:$0xff]  }
 0x34b   : > { %8040 = vmatpush1.bf16.msra.mxu0 %v10950_v28  ;;  %7385 = vmatprep.subr.bf16.mxu1 %v10955_v29  ;;  %v11028_v28 = vld [vmem:[%s11782_s27 + $0x1c40] ss:$8 sps:$4 sm:$0xff]   ;;  %v11033_v29 = vld [vmem:[%s11782_s27 + $0xc54] ss:$8 sps:$4 sm:$0xff]  }
 0x34c   : > { %8041 = vmatprep.subr.bf16.mxu0 %v10958_v30  ;;  %v11036_v30 = vld [vmem:[%s11782_s27 + $0x1c54] ss:$8 sps:$4 sm:$0xff]  }
 0x34e   : > { %7386 = vmatpush1.bf16.msra.mxu1 %v10953_v31  ;;  %v11031_v31 = vld [vmem:[%s11782_s27 + $0xc50] ss:$8 sps:$4 sm:$0xff]  }
 0x34f   : > { %8042 = vmatpush1.bf16.msra.mxu0 %v10956_v32  ;;  %7387 = vmatprep.subr.bf16.mxu1 %v10961_v16  ;;  %v11034_v32 = vld [vmem:[%s11782_s27 + $0x1c50] ss:$8 sps:$4 sm:$0xff]   ;;  %v11039_v16 = vld [vmem:[%s11782_s27 + $0xc64] ss:$8 sps:$4 sm:$0xff]  }
 0x350   : > { %8043 = vmatprep.subr.bf16.mxu0 %v10964_v34  ;;  %v11042_v34 = vld [vmem:[%s11782_s27 + $0x1c64] ss:$8 sps:$4 sm:$0xff]  }
 0x352   : > { %7388 = vmatpush1.bf16.msra.mxu1 %v10959_v35  ;;  %v11037_v35 = vld [vmem:[%s11782_s27 + $0xc60] ss:$8 sps:$4 sm:$0xff]  }
 0x353   : > { %8044 = vmatpush1.bf16.msra.mxu0 %v10962_v36  ;;  %7389 = vmatprep.subr.bf16.mxu1 %v10967_v43  ;;  %v11040_v36 = vld [vmem:[%s11782_s27 + $0x1c60] ss:$8 sps:$4 sm:$0xff]   ;;  %v11045_v43 = vld [vmem:[%s11782_s27 + $0xc74] ss:$8 sps:$4 sm:$0xff]  }
 0x354   : > { %8045 = vmatprep.subr.bf16.mxu0 %v10970_v45  ;;  %v11048_v45 = vld [vmem:[%s11782_s27 + $0x1c74] ss:$8 sps:$4 sm:$0xff]  }
 0x356   : > { %7390 = vmatpush1.bf16.msra.mxu1 %v10965_v25  ;;  %v11043_v25 = vld [vmem:[%s11782_s27 + $0xc70] ss:$8 sps:$4 sm:$0xff]  }
 0x357   : > { %8046 = vmatpush1.bf16.msra.mxu0 %v10968_v46  ;;  %7391 = vmatprep.subr.bf16.mxu1 %v10973_v42  ;;  %v11046_v46 = vld [vmem:[%s11782_s27 + $0x1c70] ss:$8 sps:$4 sm:$0xff]   ;;  %v11051_v42 = vld [vmem:[%s11782_s27 + $0xc84] ss:$8 sps:$4 sm:$0xff]  }
 0x358   : > { %8047 = vmatprep.subr.bf16.mxu0 %v10976_v26  ;;  %v11054_v26 = vld [vmem:[%s11782_s27 + $0x1c84] ss:$8 sps:$4 sm:$0xff]  }
 0x35a   : > { %7392 = vmatpush1.bf16.msra.mxu1 %v10971_v60  ;;  %v11049_v60 = vld [vmem:[%s11782_s27 + $0xc80] ss:$8 sps:$4 sm:$0xff]  }
 0x35b   : > { %8048 = vmatpush1.bf16.msra.mxu0 %v10974_v14  ;;  %7393 = vmatprep.subr.bf16.mxu1 %v10979_v33  ;;  %v11052_v14 = vld [vmem:[%s11782_s27 + $0x1c80] ss:$8 sps:$4 sm:$0xff]   ;;  %v11057_v33 = vld [vmem:[%s11782_s27 + $0xc94] ss:$8 sps:$4 sm:$0xff]  }
 0x35c   : > { %8049 = vmatprep.subr.bf16.mxu0 %v10982_v37  ;;  %v11060_v37 = vld [vmem:[%s11782_s27 + $0x1c94] ss:$8 sps:$4 sm:$0xff]  }
 0x35e   : > { %7394 = vmatpush1.bf16.msra.mxu1 %v10977_v15  ;;  %v11055_v15 = vld [vmem:[%s11782_s27 + $0xc90] ss:$8 sps:$4 sm:$0xff]  }
 0x35f   : > { %8050 = vmatpush1.bf16.msra.mxu0 %v10980_v48  ;;  %7395 = vmatprep.subr.bf16.mxu1 %v10985_v17  ;;  %v11058_v48 = vld [vmem:[%s11782_s27 + $0x1c90] ss:$8 sps:$4 sm:$0xff]   ;;  %v11063_v17 = vld [vmem:[%s11782_s27 + $0xca4] ss:$8 sps:$4 sm:$0xff]  }
 0x360   : > { %8051 = vmatprep.subr.bf16.mxu0 %v10988_v49  ;;  %v11066_v49 = vld [vmem:[%s11782_s27 + $0x1ca4] ss:$8 sps:$4 sm:$0xff]  }
 0x362   : > { %7396 = vmatpush1.bf16.msra.mxu1 %v10983_v51  ;;  %v11061_v51 = vld [vmem:[%s11782_s27 + $0xca0] ss:$8 sps:$4 sm:$0xff]  }
 0x363   : > { %8052 = vmatpush1.bf16.msra.mxu0 %v10986_v52  ;;  %7397 = vmatprep.subr.bf16.mxu1 %v10991_v54  ;;  %v11064_v52 = vld [vmem:[%s11782_s27 + $0x1ca0] ss:$8 sps:$4 sm:$0xff]   ;;  %v11069_v54 = vld [vmem:[%s11782_s27 + $0xcb4] ss:$8 sps:$4 sm:$0xff]  }
 0x364   : > { %8053 = vmatprep.subr.bf16.mxu0 %v10994_v55  ;;  %v11072_v55 = vld [vmem:[%s11782_s27 + $0x1cb4] ss:$8 sps:$4 sm:$0xff]  }
 0x366   : > { %7398 = vmatpush1.bf16.msra.mxu1 %v10989_v63  ;;  %v11067_v63 = vld [vmem:[%s11782_s27 + $0xcb0] ss:$8 sps:$4 sm:$0xff]  }
 0x367   : > { %8054 = vmatpush1.bf16.msra.mxu0 %v10992_v0  ;;  %7399 = vmatprep.subr.bf16.mxu1 %v10997_v41  ;;  %v11070_v0 = vld [vmem:[%s11782_s27 + $0x1cb0] ss:$8 sps:$4 sm:$0xff]   ;;  %v11075_v41 = vld [vmem:[%s11782_s27 + $0xcc4] ss:$8 sps:$4 sm:$0xff]  }
 0x368   : > { %8055 = vmatprep.subr.bf16.mxu0 %v11000_v1  ;;  %v11078_v1 = vld [vmem:[%s11782_s27 + $0x1cc4] ss:$8 sps:$4 sm:$0xff]  }
 0x36a   : > { %7400 = vmatpush1.bf16.msra.mxu1 %v10995_v47  ;;  %v11073_v47 = vld [vmem:[%s11782_s27 + $0xcc0] ss:$8 sps:$4 sm:$0xff]  }
 0x36b   : > { %8056 = vmatpush1.bf16.msra.mxu0 %v10998_v3  ;;  %7410 = vmatprep.subr.bf16.mxu1 %v11003_v39  ;;  %v11076_v3 = vld [vmem:[%s11782_s27 + $0x1cc0] ss:$8 sps:$4 sm:$0xff]   ;;  %v11081_v39 = vld [vmem:[%s11782_s27 + $0xcd4] ss:$8 sps:$4 sm:$0xff]  }
 0x36c   : > { %8066 = vmatprep.subr.bf16.mxu0 %v11006_v58  ;;  %v11084_v58 = vld [vmem:[%s11782_s27 + $0x1cd4] ss:$8 sps:$4 sm:$0xff]  }
 0x36d   : > { %7402 = vmatmul.mubr.bf16.vlgmr.msra.gmra.mrb[0].mxu1 %v1486_v5  ;;  %v11087_v5 = vld [vmem:[%s11782_s27 + $0xce4] ss:$8 sps:$4 sm:$0xff]  }
 0x36e   : > { %8058 = vmatmul.mubr.bf16.vlgmr.msra.gmra.mrb[0].mxu0 %v1682_v6  ;;  %7411 = vmatpush1.bf16.msra.mxu1 %v11001_v7  ;;  %v11090_v6 = vld [vmem:[%s11782_s27 + $0x1ce4] ss:$8 sps:$4 sm:$0xff]   ;;  %v11085_v7 = vld [vmem:[%s11782_s27 + $0xce0] ss:$8 sps:$4 sm:$0xff]  }
 0x36f   : > { %8067 = vmatpush1.bf16.msra.mxu0 %v11004_v8  ;;  %7412 = vmatprep.subr.bf16.mxu1 %v11009_v9  ;;  %v11088_v8 = vld [vmem:[%s11782_s27 + $0x1ce0] ss:$8 sps:$4 sm:$0xff]   ;;  %v11093_v9 = vld [vmem:[%s11782_s27 + $0xcf4] ss:$8 sps:$4 sm:$0xff]  }
 0x370   : > { %8068 = vmatprep.subr.bf16.mxu0 %v11012_v10  ;;  %7442 = vmatprep.mubr.bf16.mxu1 %v12835_v11  ;;  %v11096_v10 = vld [vmem:[%s11782_s27 + $0x1cf4] ss:$8 sps:$4 sm:$0xff]  }
 0x371   : > { %8098 = vmatprep.mubr.bf16.mxu0 %v12838_v61 }
 0x372   : > { %7413 = vmatpush1.bf16.msra.mxu1 %v11007_v62  ;;  %v11091_v62 = vld [vmem:[%s11782_s27 + $0xcf0] ss:$8 sps:$4 sm:$0xff]  }
 0x373   : > { %8069 = vmatpush1.bf16.msra.mxu0 %v11010_v12  ;;  %7414 = vmatprep.subr.bf16.mxu1 %v11015_v19  ;;  %v11094_v12 = vld [vmem:[%s11782_s27 + $0x1cf0] ss:$8 sps:$4 sm:$0xff]   ;;  %v11099_v19 = vld [vmem:[%s11782_s27 + $0xd04] ss:$8 sps:$4 sm:$0xff]  }
 0x374   : > { %8070 = vmatprep.subr.bf16.mxu0 %v11018_v20  ;;  %v11102_v20 = vld [vmem:[%s11782_s27 + $0x1d04] ss:$8 sps:$4 sm:$0xff]  }
 0x376   : > { %7415 = vmatpush1.bf16.msra.mxu1 %v11013_v21  ;;  %v12904_v21 = vrot.slane %v12812_v23, %v11862_v50  ;;  %v1536_v23 = vcombine.high %v12835_v11, %v12835_v11  ;;  %v11111_v11 = vld [vmem:[%s11782_s27 + $0xd24] ss:$8 sps:$4 sm:$0xff]  }
 0x377   : > { %8071 = vmatpush1.bf16.msra.mxu0 %v11016_v22  ;;  %7416 = vmatprep.subr.bf16.mxu1 %v11021_v2  ;;  %v12908_v22 = vrot.slane %v12816_v56, %v11862_v50  ;;  %v11097_v2 = vld [vmem:[%s11782_s27 + $0xd00] ss:$8 sps:$4 sm:$0xff]   ;;  %v11103_v56 = vld [vmem:[%s11782_s27 + $0xd10] ss:$8 sps:$4 sm:$0xff]  }
 0x378   : > { %8072 = vmatprep.subr.bf16.mxu0 %v11024_v24  ;;  %v11100_v24 = vld [vmem:[%s11782_s27 + $0x1d00] ss:$8 sps:$4 sm:$0xff]  }
 0x37a   : > { %7417 = vmatpush1.bf16.msra.mxu1 %v11019_v13  ;;  %v11105_v13 = vld [vmem:[%s11782_s27 + $0xd14] ss:$8 sps:$4 sm:$0xff]  }
 0x37b   : > { %8073 = vmatpush1.bf16.msra.mxu0 %v11022_v53  ;;  %7418 = vmatprep.subr.bf16.mxu1 %v11027_v59  ;;  %v11108_v53 = vld [vmem:[%s11782_s27 + $0x1d14] ss:$8 sps:$4 sm:$0xff]   ;;  %v1732_v59 = vcombine.high %v12838_v61, %v12838_v61  ;;  %v11109_v61 = vld [vmem:[%s11782_s27 + $0xd20] ss:$8 sps:$4 sm:$0xff]  }
 0x37c   : > { %8074 = vmatprep.subr.bf16.mxu0 %v11030_v57  ;;  %v11106_v57 = vld [vmem:[%s11782_s27 + $0x1d10] ss:$8 sps:$4 sm:$0xff]  }
 0x37e   : > { %7419 = vmatpush1.bf16.msra.mxu1 %v11025_v27  ;;  %v11114_v27 = vld [vmem:[%s11782_s27 + $0x1d24] ss:$8 sps:$4 sm:$0xff]  }
 0x37f   : > { %8075 = vmatpush1.bf16.msra.mxu0 %v11028_v28  ;;  %7420 = vmatprep.subr.bf16.mxu1 %v11033_v29  ;;  %v11112_v28 = vld [vmem:[%s11782_s27 + $0x1d20] ss:$8 sps:$4 sm:$0xff]   ;;  %v11117_v29 = vld [vmem:[%s11782_s27 + $0xd34] ss:$8 sps:$4 sm:$0xff]  }
 0x380   : > { %8076 = vmatprep.subr.bf16.mxu0 %v11036_v30  ;;  %v11120_v30 = vld [vmem:[%s11782_s27 + $0x1d34] ss:$8 sps:$4 sm:$0xff]  }
 0x382   : > { %7421 = vmatpush1.bf16.msra.mxu1 %v11031_v31  ;;  %v11115_v31 = vld [vmem:[%s11782_s27 + $0xd30] ss:$8 sps:$4 sm:$0xff]  }
 0x383   : > { %8077 = vmatpush1.bf16.msra.mxu0 %v11034_v32  ;;  %7422 = vmatprep.subr.bf16.mxu1 %v11039_v16  ;;  %v11118_v32 = vld [vmem:[%s11782_s27 + $0x1d30] ss:$8 sps:$4 sm:$0xff]   ;;  %v11123_v16 = vld [vmem:[%s11782_s27 + $0xd44] ss:$8 sps:$4 sm:$0xff]  }
 0x384   : > { %8078 = vmatprep.subr.bf16.mxu0 %v11042_v34  ;;  %v11126_v34 = vld [vmem:[%s11782_s27 + $0x1d44] ss:$8 sps:$4 sm:$0xff]  }
 0x386   : > { %7423 = vmatpush1.bf16.msra.mxu1 %v11037_v35  ;;  %v11121_v35 = vld [vmem:[%s11782_s27 + $0xd40] ss:$8 sps:$4 sm:$0xff]  }
 0x387   : > { %8079 = vmatpush1.bf16.msra.mxu0 %v11040_v36  ;;  %7424 = vmatprep.subr.bf16.mxu1 %v11045_v43  ;;  %v11124_v36 = vld [vmem:[%s11782_s27 + $0x1d40] ss:$8 sps:$4 sm:$0xff]   ;;  %v11129_v43 = vld [vmem:[%s11782_s27 + $0xd54] ss:$8 sps:$4 sm:$0xff]  }
 0x388   : > { %8080 = vmatprep.subr.bf16.mxu0 %v11048_v45  ;;  %v11132_v45 = vld [vmem:[%s11782_s27 + $0x1d54] ss:$8 sps:$4 sm:$0xff]  }
 0x38a   : > { %7425 = vmatpush1.bf16.msra.mxu1 %v11043_v25  ;;  %v11127_v25 = vld [vmem:[%s11782_s27 + $0xd50] ss:$8 sps:$4 sm:$0xff]  }
 0x38b   : > { %8081 = vmatpush1.bf16.msra.mxu0 %v11046_v46  ;;  %7426 = vmatprep.subr.bf16.mxu1 %v11051_v42  ;;  %v11130_v46 = vld [vmem:[%s11782_s27 + $0x1d50] ss:$8 sps:$4 sm:$0xff]   ;;  %v11135_v42 = vld [vmem:[%s11782_s27 + $0xd64] ss:$8 sps:$4 sm:$0xff]  }
 0x38c   : > { %8082 = vmatprep.subr.bf16.mxu0 %v11054_v26  ;;  %v11138_v26 = vld [vmem:[%s11782_s27 + $0x1d64] ss:$8 sps:$4 sm:$0xff]  }
 0x38e   : > { %7427 = vmatpush1.bf16.msra.mxu1 %v11049_v60  ;;  %v11133_v60 = vld [vmem:[%s11782_s27 + $0xd60] ss:$8 sps:$4 sm:$0xff]  }
 0x38f   : > { %8083 = vmatpush1.bf16.msra.mxu0 %v11052_v14  ;;  %7428 = vmatprep.subr.bf16.mxu1 %v11057_v33  ;;  %v11136_v14 = vld [vmem:[%s11782_s27 + $0x1d60] ss:$8 sps:$4 sm:$0xff]   ;;  %v11141_v33 = vld [vmem:[%s11782_s27 + $0xd74] ss:$8 sps:$4 sm:$0xff]  }
 0x390   : > { %8084 = vmatprep.subr.bf16.mxu0 %v11060_v37  ;;  %v11144_v37 = vld [vmem:[%s11782_s27 + $0x1d74] ss:$8 sps:$4 sm:$0xff]  }
 0x392   : > { %7429 = vmatpush1.bf16.msra.mxu1 %v11055_v15  ;;  %v11139_v15 = vld [vmem:[%s11782_s27 + $0xd70] ss:$8 sps:$4 sm:$0xff]  }
 0x393   : > { %8085 = vmatpush1.bf16.msra.mxu0 %v11058_v48  ;;  %7430 = vmatprep.subr.bf16.mxu1 %v11063_v17  ;;  %v11142_v48 = vld [vmem:[%s11782_s27 + $0x1d70] ss:$8 sps:$4 sm:$0xff]   ;;  %v11147_v17 = vld [vmem:[%s11782_s27 + $0xd84] ss:$8 sps:$4 sm:$0xff]  }
 0x394   : > { %8086 = vmatprep.subr.bf16.mxu0 %v11066_v49  ;;  %v11150_v49 = vld [vmem:[%s11782_s27 + $0x1d84] ss:$8 sps:$4 sm:$0xff]  }
 0x396   : > { %7431 = vmatpush1.bf16.msra.mxu1 %v11061_v51  ;;  %v11145_v51 = vld [vmem:[%s11782_s27 + $0xd80] ss:$8 sps:$4 sm:$0xff]  }
 0x397   : > { %8087 = vmatpush1.bf16.msra.mxu0 %v11064_v52  ;;  %7432 = vmatprep.subr.bf16.mxu1 %v11069_v54  ;;  %v11148_v52 = vld [vmem:[%s11782_s27 + $0x1d80] ss:$8 sps:$4 sm:$0xff]   ;;  %v11153_v54 = vld [vmem:[%s11782_s27 + $0xd94] ss:$8 sps:$4 sm:$0xff]  }
 0x398   : > { %8088 = vmatprep.subr.bf16.mxu0 %v11072_v55  ;;  %v11156_v55 = vld [vmem:[%s11782_s27 + $0x1d94] ss:$8 sps:$4 sm:$0xff]  }
 0x39a   : > { %7433 = vmatpush1.bf16.msra.mxu1 %v11067_v63  ;;  %v11151_v63 = vld [vmem:[%s11782_s27 + $0xd90] ss:$8 sps:$4 sm:$0xff]  }
 0x39b   : > { %8089 = vmatpush1.bf16.msra.mxu0 %v11070_v0  ;;  %7434 = vmatprep.subr.bf16.mxu1 %v11075_v41  ;;  %v11154_v0 = vld [vmem:[%s11782_s27 + $0x1d90] ss:$8 sps:$4 sm:$0xff]   ;;  %v11159_v41 = vld [vmem:[%s11782_s27 + $0xda4] ss:$8 sps:$4 sm:$0xff]  }
 0x39c   : > { %8090 = vmatprep.subr.bf16.mxu0 %v11078_v1  ;;  %v11162_v1 = vld [vmem:[%s11782_s27 + $0x1da4] ss:$8 sps:$4 sm:$0xff]  }
 0x39e   : > { %7435 = vmatpush1.bf16.msra.mxu1 %v11073_v47  ;;  %v11157_v47 = vld [vmem:[%s11782_s27 + $0xda0] ss:$8 sps:$4 sm:$0xff]  }
 0x39f   : > { %8091 = vmatpush1.bf16.msra.mxu0 %v11076_v3  ;;  %7436 = vmatprep.subr.bf16.mxu1 %v11081_v39  ;;  %v11160_v3 = vld [vmem:[%s11782_s27 + $0x1da0] ss:$8 sps:$4 sm:$0xff]   ;;  %v11165_v39 = vld [vmem:[%s11782_s27 + $0xdb4] ss:$8 sps:$4 sm:$0xff]  }
 0x3a0   : > { %8092 = vmatprep.subr.bf16.mxu0 %v11084_v58  ;;  %v11168_v58 = vld [vmem:[%s11782_s27 + $0x1db4] ss:$8 sps:$4 sm:$0xff]  }
 0x3a2   : > { %7437 = vmatpush1.bf16.msra.mxu1 %v11079_v18  ;;  %v11163_v18 = vld [vmem:[%s11782_s27 + $0xdb0] ss:$8 sps:$4 sm:$0xff]  }
 0x3a3   : > { %8093 = vmatpush1.bf16.msra.mxu0 %v11082_v4  ;;  %7438 = vmatprep.subr.bf16.mxu1 %v11087_v5  ;;  %v11166_v4 = vld [vmem:[%s11782_s27 + $0x1db0] ss:$8 sps:$4 sm:$0xff]   ;;  %v11171_v5 = vld [vmem:[%s11782_s27 + $0xdc4] ss:$8 sps:$4 sm:$0xff]  }
 0x3a4   : > { %8094 = vmatprep.subr.bf16.mxu0 %v11090_v6  ;;  %v11174_v6 = vld [vmem:[%s11782_s27 + $0x1dc4] ss:$8 sps:$4 sm:$0xff]  }
 0x3a6   : > { %7439 = vmatpush1.bf16.msra.mxu1 %v11085_v7  ;;  %v11169_v7 = vld [vmem:[%s11782_s27 + $0xdc0] ss:$8 sps:$4 sm:$0xff]  }
 0x3a7   : > { %8095 = vmatpush1.bf16.msra.mxu0 %v11088_v8  ;;  %7440 = vmatprep.subr.bf16.mxu1 %v11093_v9  ;;  %v11172_v8 = vld [vmem:[%s11782_s27 + $0x1dc0] ss:$8 sps:$4 sm:$0xff]   ;;  %v11177_v9 = vld [vmem:[%s11782_s27 + $0xdd4] ss:$8 sps:$4 sm:$0xff]  }
 0x3a8   : > { %8096 = vmatprep.subr.bf16.mxu0 %v11096_v10  ;;  %v11180_v10 = vld [vmem:[%s11782_s27 + $0x1dd4] ss:$8 sps:$4 sm:$0xff]  }
 0x3aa   : > { %7441 = vmatpush1.bf16.msra.mxu1 %v11091_v62  ;;  %v11175_v62 = vld [vmem:[%s11782_s27 + $0xdd0] ss:$8 sps:$4 sm:$0xff]  }
 0x3ab   : > { %8097 = vmatpush1.bf16.msra.mxu0 %v11094_v12  ;;  %7451 = vmatprep.subr.bf16.mxu1 %v11099_v19  ;;  %v11178_v12 = vld [vmem:[%s11782_s27 + $0x1dd0] ss:$8 sps:$4 sm:$0xff]   ;;  %v11183_v19 = vld [vmem:[%s11782_s27 + $0xde4] ss:$8 sps:$4 sm:$0xff]  }
 0x3ac   : > { %8107 = vmatprep.subr.bf16.mxu0 %v11102_v20  ;;  %v11186_v20 = vld [vmem:[%s11782_s27 + $0x1de4] ss:$8 sps:$4 sm:$0xff]  }
 0x3ad   : > { %7443 = vmatmul.mubr.bf16.vlgmr.msra.gmra.mrb[0].mxu1 %v12904_v21 }
 0x3ae   : > { %8099 = vmatmul.mubr.bf16.vlgmr.msra.gmra.mrb[0].mxu0 %v12908_v22  ;;  %7452 = vmatpush1.bf16.msra.mxu1 %v11097_v2  ;;  %v1489_v2 = vcombine.high %v12801_v38, %v12801_v38  ;;  %v11187_v38 = vld [vmem:[%s11782_s27 + $0xdf0] ss:$8 sps:$4 sm:$0xff]  }
 0x3af   : > { %8108 = vmatpush1.bf16.msra.mxu0 %v11100_v24  ;;  %7453 = vmatprep.subr.bf16.mxu1 %v11105_v13  ;;  %v1685_v24 = vcombine.high %v12804_v40, %v12804_v40  ;;  %v11181_v13 = vld [vmem:[%s11782_s27 + $0xde0] ss:$8 sps:$4 sm:$0xff]   ;;  %v11190_v40 = vld [vmem:[%s11782_s27 + $0x1df0] ss:$8 sps:$4 sm:$0xff]  }
 0x3b0   : > { %8109 = vmatprep.subr.bf16.mxu0 %v11108_v53  ;;  %7483 = vmatprep.mubr.bf16.mxu1 %v1536_v23  ;;  %v11184_v53 = vld [vmem:[%s11782_s27 + $0x1de0] ss:$8 sps:$4 sm:$0xff]   ;;  %v11189_v23 = vld [vmem:[%s11782_s27 + $0xdf4] ss:$8 sps:$4 sm:$0xff]  }
 0x3b1   : > { %8139 = vmatprep.mubr.bf16.mxu0 %v1732_v59  ;;  %v11192_v59 = vld [vmem:[%s11782_s27 + $0x1df4] ss:$8 sps:$4 sm:$0xff]  }
 0x3b2   : > { %7454 = vmatpush1.bf16.msra.mxu1 %v11103_v56  ;;  %v12981_v56 = vrot.slane %v1489_v2, %v11862_v50  ;;  %v11259_v2 = vld [vmem:[%s11782_s27 + $0xeb0] ss:$8 sps:$4 sm:$0xff]  }
 0x3b3   : > { %8110 = vmatpush1.bf16.msra.mxu0 %v11106_v57  ;;  %7455 = vmatprep.subr.bf16.mxu1 %v11111_v11  ;;  %v12984_v57 = vrot.slane %v1685_v24, %v11862_v50  ;;  %v11195_v11 = vld [vmem:[%s11782_s27 + $0xe04] ss:$8 sps:$4 sm:$0xff]   ;;  %v11262_v24 = vld [vmem:[%s11782_s27 + $0x1eb0] ss:$8 sps:$4 sm:$0xff]  }
 0x3b4   : > { %8111 = vmatprep.subr.bf16.mxu0 %v11114_v27  ;;  %v11198_v27 = vld [vmem:[%s11782_s27 + $0x1e04] ss:$8 sps:$4 sm:$0xff]  }
 0x3b6   : > { %7456 = vmatpush1.bf16.msra.mxu1 %v11109_v61  ;;  %v1505_v61 = vcombine.high %v12981_v56, %v12981_v56 }
 0x3b7   : > { %8112 = vmatpush1.bf16.msra.mxu0 %v11112_v28  ;;  %7457 = vmatprep.subr.bf16.mxu1 %v11117_v29  ;;  %v1701_v28 = vcombine.high %v12984_v57, %v12984_v57  ;;  %v1534_v29 = vcombine.high %v12904_v21, %v12904_v21 }
 0x3b8   : > { %8113 = vmatprep.subr.bf16.mxu0 %v11120_v30  ;;  %v1730_v30 = vcombine.high %v12908_v22, %v12908_v22  ;;  %v11199_v22 = vld [vmem:[%s11782_s27 + $0xe10] ss:$8 sps:$4 sm:$0xff]  }
 0x3b9   : > { %v13006_v21 = vrot.slane %v1701_v28, %v11862_v50  ;;  %v11282_v28 = vld [vmem:[%s11782_s27 + $0x1ee4] ss:$8 sps:$4 sm:$0xff]  }
 0x3ba   : > { %7458 = vmatpush1.bf16.msra.mxu1 %v11115_v31  ;;  %v11193_v31 = vld [vmem:[%s11782_s27 + $0xe00] ss:$8 sps:$4 sm:$0xff]  }
 0x3bb   : > { %8114 = vmatpush1.bf16.msra.mxu0 %v11118_v32  ;;  %7459 = vmatprep.subr.bf16.mxu1 %v11123_v16  ;;  %v11196_v32 = vld [vmem:[%s11782_s27 + $0x1e00] ss:$8 sps:$4 sm:$0xff]   ;;  %v11201_v16 = vld [vmem:[%s11782_s27 + $0xe14] ss:$8 sps:$4 sm:$0xff]  }
 0x3bc   : > { %8115 = vmatprep.subr.bf16.mxu0 %v11126_v34  ;;  %v11204_v34 = vld [vmem:[%s11782_s27 + $0x1e14] ss:$8 sps:$4 sm:$0xff]  }
 0x3be   : > { %7460 = vmatpush1.bf16.msra.mxu1 %v11121_v35  ;;  %v13003_v35 = vrot.slane %v1505_v61, %v11862_v50  ;;  %v11279_v61 = vld [vmem:[%s11782_s27 + $0xee4] ss:$8 sps:$4 sm:$0xff]  }
 0x3bf   : > { %8116 = vmatpush1.bf16.msra.mxu0 %v11124_v36  ;;  %7461 = vmatprep.subr.bf16.mxu1 %v11129_v43  ;;  %v11202_v36 = vld [vmem:[%s11782_s27 + $0x1e10] ss:$8 sps:$4 sm:$0xff]   ;;  %v11207_v43 = vld [vmem:[%s11782_s27 + $0xe24] ss:$8 sps:$4 sm:$0xff]  }
 0x3c0   : > { %8117 = vmatprep.subr.bf16.mxu0 %v11132_v45  ;;  %v11210_v45 = vld [vmem:[%s11782_s27 + $0x1e24] ss:$8 sps:$4 sm:$0xff]  }
 0x3c2   : > { %7462 = vmatpush1.bf16.msra.mxu1 %v11127_v25  ;;  %v11205_v25 = vld [vmem:[%s11782_s27 + $0xe20] ss:$8 sps:$4 sm:$0xff]  }
 0x3c3   : > { %8118 = vmatpush1.bf16.msra.mxu0 %v11130_v46  ;;  %7463 = vmatprep.subr.bf16.mxu1 %v11135_v42  ;;  %v11208_v46 = vld [vmem:[%s11782_s27 + $0x1e20] ss:$8 sps:$4 sm:$0xff]   ;;  %v11213_v42 = vld [vmem:[%s11782_s27 + $0xe34] ss:$8 sps:$4 sm:$0xff]  }
 0x3c4   : > { %8119 = vmatprep.subr.bf16.mxu0 %v11138_v26  ;;  %v11216_v26 = vld [vmem:[%s11782_s27 + $0x1e34] ss:$8 sps:$4 sm:$0xff]  }
 0x3c6   : > { %7464 = vmatpush1.bf16.msra.mxu1 %v11133_v60  ;;  %v11211_v60 = vld [vmem:[%s11782_s27 + $0xe30] ss:$8 sps:$4 sm:$0xff]  }
 0x3c7   : > { %8120 = vmatpush1.bf16.msra.mxu0 %v11136_v14  ;;  %7465 = vmatprep.subr.bf16.mxu1 %v11141_v33  ;;  %v11214_v14 = vld [vmem:[%s11782_s27 + $0x1e30] ss:$8 sps:$4 sm:$0xff]   ;;  %v11219_v33 = vld [vmem:[%s11782_s27 + $0xe44] ss:$8 sps:$4 sm:$0xff]  }
 0x3c8   : > { %8121 = vmatprep.subr.bf16.mxu0 %v11144_v37  ;;  %v11222_v37 = vld [vmem:[%s11782_s27 + $0x1e44] ss:$8 sps:$4 sm:$0xff]  }
 0x3ca   : > { %7466 = vmatpush1.bf16.msra.mxu1 %v11139_v15  ;;  %v11217_v15 = vld [vmem:[%s11782_s27 + $0xe40] ss:$8 sps:$4 sm:$0xff]  }
 0x3cb   : > { %8122 = vmatpush1.bf16.msra.mxu0 %v11142_v48  ;;  %7467 = vmatprep.subr.bf16.mxu1 %v11147_v17  ;;  %v11220_v48 = vld [vmem:[%s11782_s27 + $0x1e40] ss:$8 sps:$4 sm:$0xff]   ;;  %v11225_v17 = vld [vmem:[%s11782_s27 + $0xe54] ss:$8 sps:$4 sm:$0xff]  }
 0x3cc   : > { %8123 = vmatprep.subr.bf16.mxu0 %v11150_v49  ;;  %v11228_v49 = vld [vmem:[%s11782_s27 + $0x1e54] ss:$8 sps:$4 sm:$0xff]  }
 0x3ce   : > { %7468 = vmatpush1.bf16.msra.mxu1 %v11145_v51  ;;  %v11223_v51 = vld [vmem:[%s11782_s27 + $0xe50] ss:$8 sps:$4 sm:$0xff]  }
 0x3cf   : > { %8124 = vmatpush1.bf16.msra.mxu0 %v11148_v52  ;;  %7469 = vmatprep.subr.bf16.mxu1 %v11153_v54  ;;  %v11226_v52 = vld [vmem:[%s11782_s27 + $0x1e50] ss:$8 sps:$4 sm:$0xff]   ;;  %v11231_v54 = vld [vmem:[%s11782_s27 + $0xe64] ss:$8 sps:$4 sm:$0xff]  }
 0x3d0   : > { %8125 = vmatprep.subr.bf16.mxu0 %v11156_v55  ;;  %v11234_v55 = vld [vmem:[%s11782_s27 + $0x1e64] ss:$8 sps:$4 sm:$0xff]  }
 0x3d2   : > { %7470 = vmatpush1.bf16.msra.mxu1 %v11151_v63  ;;  %v11229_v63 = vld [vmem:[%s11782_s27 + $0xe60] ss:$8 sps:$4 sm:$0xff]  }
 0x3d3   : > { %8126 = vmatpush1.bf16.msra.mxu0 %v11154_v0  ;;  %7471 = vmatprep.subr.bf16.mxu1 %v11159_v41  ;;  %v11232_v0 = vld [vmem:[%s11782_s27 + $0x1e60] ss:$8 sps:$4 sm:$0xff]   ;;  %v11237_v41 = vld [vmem:[%s11782_s27 + $0xe74] ss:$8 sps:$4 sm:$0xff]  }
 0x3d4   : > { %8127 = vmatprep.subr.bf16.mxu0 %v11162_v1  ;;  %v11240_v1 = vld [vmem:[%s11782_s27 + $0x1e74] ss:$8 sps:$4 sm:$0xff]  }
 0x3d6   : > { %7472 = vmatpush1.bf16.msra.mxu1 %v11157_v47  ;;  %v11235_v47 = vld [vmem:[%s11782_s27 + $0xe70] ss:$8 sps:$4 sm:$0xff]  }
 0x3d7   : > { %8128 = vmatpush1.bf16.msra.mxu0 %v11160_v3  ;;  %7473 = vmatprep.subr.bf16.mxu1 %v11165_v39  ;;  %v11238_v3 = vld [vmem:[%s11782_s27 + $0x1e70] ss:$8 sps:$4 sm:$0xff]   ;;  %v11243_v39 = vld [vmem:[%s11782_s27 + $0xe84] ss:$8 sps:$4 sm:$0xff]  }
 0x3d8   : > { %8129 = vmatprep.subr.bf16.mxu0 %v11168_v58  ;;  %v11246_v58 = vld [vmem:[%s11782_s27 + $0x1e84] ss:$8 sps:$4 sm:$0xff]  }
 0x3da   : > { %7474 = vmatpush1.bf16.msra.mxu1 %v11163_v18  ;;  %v11241_v18 = vld [vmem:[%s11782_s27 + $0xe80] ss:$8 sps:$4 sm:$0xff]  }
 0x3db   : > { %8130 = vmatpush1.bf16.msra.mxu0 %v11166_v4  ;;  %7475 = vmatprep.subr.bf16.mxu1 %v11171_v5  ;;  %v11244_v4 = vld [vmem:[%s11782_s27 + $0x1e80] ss:$8 sps:$4 sm:$0xff]   ;;  %v11249_v5 = vld [vmem:[%s11782_s27 + $0xe94] ss:$8 sps:$4 sm:$0xff]  }
 0x3dc   : > { %8131 = vmatprep.subr.bf16.mxu0 %v11174_v6  ;;  %v11252_v6 = vld [vmem:[%s11782_s27 + $0x1e94] ss:$8 sps:$4 sm:$0xff]  }
 0x3de   : > { %7476 = vmatpush1.bf16.msra.mxu1 %v11169_v7  ;;  %v11247_v7 = vld [vmem:[%s11782_s27 + $0xe90] ss:$8 sps:$4 sm:$0xff]  }
 0x3df   : > { %8132 = vmatpush1.bf16.msra.mxu0 %v11172_v8  ;;  %7477 = vmatprep.subr.bf16.mxu1 %v11177_v9  ;;  %v11250_v8 = vld [vmem:[%s11782_s27 + $0x1e90] ss:$8 sps:$4 sm:$0xff]   ;;  %v11255_v9 = vld [vmem:[%s11782_s27 + $0xea4] ss:$8 sps:$4 sm:$0xff]  }
 0x3e0   : > { %8133 = vmatprep.subr.bf16.mxu0 %v11180_v10  ;;  %v11258_v10 = vld [vmem:[%s11782_s27 + $0x1ea4] ss:$8 sps:$4 sm:$0xff]  }
 0x3e2   : > { %7478 = vmatpush1.bf16.msra.mxu1 %v11175_v62  ;;  %v11253_v62 = vld [vmem:[%s11782_s27 + $0xea0] ss:$8 sps:$4 sm:$0xff]  }
 0x3e3   : > { %8134 = vmatpush1.bf16.msra.mxu0 %v11178_v12  ;;  %7479 = vmatprep.subr.bf16.mxu1 %v11183_v19  ;;  %v11256_v12 = vld [vmem:[%s11782_s27 + $0x1ea0] ss:$8 sps:$4 sm:$0xff]   ;;  %v11261_v19 = vld [vmem:[%s11782_s27 + $0xeb4] ss:$8 sps:$4 sm:$0xff]  }
 0x3e4   : > { %8135 = vmatprep.subr.bf16.mxu0 %v11186_v20  ;;  %v11264_v20 = vld [vmem:[%s11782_s27 + $0x1eb4] ss:$8 sps:$4 sm:$0xff]  }
 0x3e6   : > { %7480 = vmatpush1.bf16.msra.mxu1 %v11181_v13  ;;  %v11267_v13 = vld [vmem:[%s11782_s27 + $0xec4] ss:$8 sps:$4 sm:$0xff]  }
 0x3e7   : > { %8136 = vmatpush1.bf16.msra.mxu0 %v11184_v53  ;;  %7481 = vmatprep.subr.bf16.mxu1 %v11189_v23  ;;  %v11270_v53 = vld [vmem:[%s11782_s27 + $0x1ec4] ss:$8 sps:$4 sm:$0xff]   ;;  %v11265_v23 = vld [vmem:[%s11782_s27 + $0xec0] ss:$8 sps:$4 sm:$0xff]  }
 0x3e8   : > { %8137 = vmatprep.subr.bf16.mxu0 %v11192_v59  ;;  %v11268_v59 = vld [vmem:[%s11782_s27 + $0x1ec0] ss:$8 sps:$4 sm:$0xff]  }
 0x3ea   : > { %7482 = vmatpush1.bf16.msra.mxu1 %v11187_v38  ;;  %v11273_v38 = vld [vmem:[%s11782_s27 + $0xed4] ss:$8 sps:$4 sm:$0xff]  }
 0x3eb   : > { %8138 = vmatpush1.bf16.msra.mxu0 %v11190_v40  ;;  %7492 = vmatprep.subr.bf16.mxu1 %v11195_v11  ;;  %v11276_v40 = vld [vmem:[%s11782_s27 + $0x1ed4] ss:$8 sps:$4 sm:$0xff]   ;;  %v11271_v11 = vld [vmem:[%s11782_s27 + $0xed0] ss:$8 sps:$4 sm:$0xff]  }
 0x3ec   : > { %8148 = vmatprep.subr.bf16.mxu0 %v11198_v27  ;;  %v11274_v27 = vld [vmem:[%s11782_s27 + $0x1ed0] ss:$8 sps:$4 sm:$0xff]  }
 0x3ed   : > { %7484 = vmatmul.mubr.bf16.vlgmr.msra.gmra.mrb[0].mxu1 %v1534_v29  ;;  %v11277_v29 = vld [vmem:[%s11782_s27 + $0xee0] ss:$8 sps:$4 sm:$0xff]  }
 0x3ee   : > { %8140 = vmatmul.mubr.bf16.vlgmr.msra.gmra.mrb[0].mxu0 %v1730_v30  ;;  %7493 = vmatpush1.bf16.msra.mxu1 %v11193_v31  ;;  %v11280_v30 = vld [vmem:[%s11782_s27 + $0x1ee0] ss:$8 sps:$4 sm:$0xff]   ;;  %v11285_v31 = vld [vmem:[%s11782_s27 + $0xef4] ss:$8 sps:$4 sm:$0xff]  }
 0x3ef   : > { %8149 = vmatpush1.bf16.msra.mxu0 %v11196_v32  ;;  %7494 = vmatprep.subr.bf16.mxu1 %v11201_v16  ;;  %v11288_v32 = vld [vmem:[%s11782_s27 + $0x1ef4] ss:$8 sps:$4 sm:$0xff]   ;;  %v11283_v16 = vld [vmem:[%s11782_s27 + $0xef0] ss:$8 sps:$4 sm:$0xff]  }
 0x3f0   : > { %8150 = vmatprep.subr.bf16.mxu0 %v11204_v34  ;;  %7524 = vmatprep.mubr.bf16.mxu1 %v13003_v35  ;;  %v11286_v34 = vld [vmem:[%s11782_s27 + $0x1ef0] ss:$8 sps:$4 sm:$0xff]  }
 0x3f1   : > { %8180 = vmatprep.mubr.bf16.mxu0 %v13006_v21 }
 0x3f2   : > { %7495 = vmatpush1.bf16.msra.mxu1 %v11199_v22  ;;  %v11292_v22 = vld [vmem:[%s11782_s27 + $0xf04] ss:$8 sps:$4 sm:$0xff]  }
 0x3f3   : > { %8151 = vmatpush1.bf16.msra.mxu0 %v11202_v36  ;;  %7496 = vmatprep.subr.bf16.mxu1 %v11207_v43  ;;  %v11296_v36 = vld [vmem:[%s11782_s27 + $0x1f04] ss:$8 sps:$4 sm:$0xff]   ;;  %v13072_v43 = vrot.slane %v12981_v56, %v11862_v50  ;;  %v1537_v56 = vcombine.high %v13003_v35, %v13003_v35 }
 0x3f4   : > { %8152 = vmatprep.subr.bf16.mxu0 %v11210_v45  ;;  %v13076_v45 = vrot.slane %v12984_v57, %v11862_v50  ;;  %v11297_v50 = vld [vmem:[%s11782_s27 + $0xf10] ss:$8 sps:$4 sm:$0xff]   ;;  %v11305_v35 = vld [vmem:[%s11782_s27 + $0xf24] ss:$8 sps:$4 sm:$0xff]  }
 0x3f5   : > { %v11300_v57 = vld [vmem:[%s11782_s27 + $0x1f10] ss:$8 sps:$4 sm:$0xff]  }
 0x3f6   : > { %7497 = vmatpush1.bf16.msra.mxu1 %v11205_v25  ;;  %v11290_v25 = vld [vmem:[%s11782_s27 + $0xf00] ss:$8 sps:$4 sm:$0xff]  }
 0x3f7   : > { %8153 = vmatpush1.bf16.msra.mxu0 %v11208_v46  ;;  %7498 = vmatprep.subr.bf16.mxu1 %v11213_v42  ;;  %v11294_v46 = vld [vmem:[%s11782_s27 + $0x1f00] ss:$8 sps:$4 sm:$0xff]   ;;  %v11299_v42 = vld [vmem:[%s11782_s27 + $0xf14] ss:$8 sps:$4 sm:$0xff]  }
 0x3f8   : > { %8154 = vmatprep.subr.bf16.mxu0 %v11216_v26  ;;  %v11302_v26 = vld [vmem:[%s11782_s27 + $0x1f14] ss:$8 sps:$4 sm:$0xff]  }
 0x3fa   : > { %7499 = vmatpush1.bf16.msra.mxu1 %v11211_v60  ;;  %v1733_v60 = vcombine.high %v13006_v21, %v13006_v21  ;;  %v11303_v21 = vld [vmem:[%s11782_s27 + $0xf20] ss:$8 sps:$4 sm:$0xff]  }
 0x3fb   : > { %8155 = vmatpush1.bf16.msra.mxu0 %v11214_v14  ;;  %7500 = vmatprep.subr.bf16.mxu1 %v11219_v33  ;;  %v11308_v14 = vld [vmem:[%s11782_s27 + $0x1f24] ss:$8 sps:$4 sm:$0xff]   ;;  %v11306_v33 = vld [vmem:[%s11782_s27 + $0x1f20] ss:$8 sps:$4 sm:$0xff]  }
 0x3fc   : > { %8156 = vmatprep.subr.bf16.mxu0 %v11222_v37  ;;  %v11311_v37 = vld [vmem:[%s11782_s27 + $0xf34] ss:$8 sps:$4 sm:$0xff]  }
 0x3fe   : > { %7501 = vmatpush1.bf16.msra.mxu1 %v11217_v15  ;;  %v11314_v15 = vld [vmem:[%s11782_s27 + $0x1f34] ss:$8 sps:$4 sm:$0xff]  }
 0x3ff   : > { %8157 = vmatpush1.bf16.msra.mxu0 %v11220_v48  ;;  %7502 = vmatprep.subr.bf16.mxu1 %v11225_v17  ;;  %v11309_v48 = vld [vmem:[%s11782_s27 + $0xf30] ss:$8 sps:$4 sm:$0xff]  }
 0x400   : > { %8158 = vmatprep.subr.bf16.mxu0 %v11228_v49  ;;  %v11312_v17 = vld [vmem:[%s11782_s27 + $0x1f30] ss:$8 sps:$4 sm:$0xff]   ;;  %v11317_v49 = vld [vmem:[%s11782_s27 + $0xf44] ss:$8 sps:$4 sm:$0xff]  }
 0x402   : > { %7503 = vmatpush1.bf16.msra.mxu1 %v11223_v51  ;;  %v11320_v51 = vld [vmem:[%s11782_s27 + $0x1f44] ss:$8 sps:$4 sm:$0xff]  }
 0x403   : > { %8159 = vmatpush1.bf16.msra.mxu0 %v11226_v52  ;;  %7504 = vmatprep.subr.bf16.mxu1 %v11231_v54  ;;  %v11315_v52 = vld [vmem:[%s11782_s27 + $0xf40] ss:$8 sps:$4 sm:$0xff]  }
 0x404   : > { %8160 = vmatprep.subr.bf16.mxu0 %v11234_v55  ;;  %v11318_v54 = vld [vmem:[%s11782_s27 + $0x1f40] ss:$8 sps:$4 sm:$0xff]   ;;  %v11323_v55 = vld [vmem:[%s11782_s27 + $0xf54] ss:$8 sps:$4 sm:$0xff]  }
 0x406   : > { %7505 = vmatpush1.bf16.msra.mxu1 %v11229_v63  ;;  %v11326_v63 = vld [vmem:[%s11782_s27 + $0x1f54] ss:$8 sps:$4 sm:$0xff]  }
 0x407   : > { %8161 = vmatpush1.bf16.msra.mxu0 %v11232_v0  ;;  %7506 = vmatprep.subr.bf16.mxu1 %v11237_v41  ;;  %v11321_v0 = vld [vmem:[%s11782_s27 + $0xf50] ss:$8 sps:$4 sm:$0xff]  }
 0x408   : > { %8162 = vmatprep.subr.bf16.mxu0 %v11240_v1  ;;  %v11324_v41 = vld [vmem:[%s11782_s27 + $0x1f50] ss:$8 sps:$4 sm:$0xff]   ;;  %v11329_v1 = vld [vmem:[%s11782_s27 + $0xf64] ss:$8 sps:$4 sm:$0xff]  }
 0x40a   : > { %7507 = vmatpush1.bf16.msra.mxu1 %v11235_v47  ;;  %v11332_v47 = vld [vmem:[%s11782_s27 + $0x1f64] ss:$8 sps:$4 sm:$0xff]  }
 0x40b   : > { %8163 = vmatpush1.bf16.msra.mxu0 %v11238_v3  ;;  %7508 = vmatprep.subr.bf16.mxu1 %v11243_v39  ;;  %v11327_v3 = vld [vmem:[%s11782_s27 + $0xf60] ss:$8 sps:$4 sm:$0xff]  }
 0x40c   : > { %8164 = vmatprep.subr.bf16.mxu0 %v11246_v58  ;;  %v11330_v39 = vld [vmem:[%s11782_s27 + $0x1f60] ss:$8 sps:$4 sm:$0xff]   ;;  %v11335_v58 = vld [vmem:[%s11782_s27 + $0xf74] ss:$8 sps:$4 sm:$0xff]  }
 0x40e   : > { %7509 = vmatpush1.bf16.msra.mxu1 %v11241_v18  ;;  %v11338_v18 = vld [vmem:[%s11782_s27 + $0x1f74] ss:$8 sps:$4 sm:$0xff]  }
 0x40f   : > { %8165 = vmatpush1.bf16.msra.mxu0 %v11244_v4  ;;  %7510 = vmatprep.subr.bf16.mxu1 %v11249_v5  ;;  %v11333_v4 = vld [vmem:[%s11782_s27 + $0xf70] ss:$8 sps:$4 sm:$0xff]  }
 0x410   : > { %8166 = vmatprep.subr.bf16.mxu0 %v11252_v6  ;;  %v11336_v5 = vld [vmem:[%s11782_s27 + $0x1f70] ss:$8 sps:$4 sm:$0xff]   ;;  %v11341_v6 = vld [vmem:[%s11782_s27 + $0xf84] ss:$8 sps:$4 sm:$0xff]  }
 0x412   : > { %7511 = vmatpush1.bf16.msra.mxu1 %v11247_v7  ;;  %v11344_v7 = vld [vmem:[%s11782_s27 + $0x1f84] ss:$8 sps:$4 sm:$0xff]  }
 0x413   : > { %8167 = vmatpush1.bf16.msra.mxu0 %v11250_v8  ;;  %7512 = vmatprep.subr.bf16.mxu1 %v11255_v9  ;;  %v11339_v8 = vld [vmem:[%s11782_s27 + $0xf80] ss:$8 sps:$4 sm:$0xff]  }
 0x414   : > { %8168 = vmatprep.subr.bf16.mxu0 %v11258_v10  ;;  %v11342_v9 = vld [vmem:[%s11782_s27 + $0x1f80] ss:$8 sps:$4 sm:$0xff]   ;;  %v11347_v10 = vld [vmem:[%s11782_s27 + $0xf94] ss:$8 sps:$4 sm:$0xff]  }
 0x416   : > { %7513 = vmatpush1.bf16.msra.mxu1 %v11253_v62  ;;  %v11350_v62 = vld [vmem:[%s11782_s27 + $0x1f94] ss:$8 sps:$4 sm:$0xff]  }
 0x417   : > { %8169 = vmatpush1.bf16.msra.mxu0 %v11256_v12  ;;  %7514 = vmatprep.subr.bf16.mxu1 %v11261_v19  ;;  %v11345_v12 = vld [vmem:[%s11782_s27 + $0xf90] ss:$8 sps:$4 sm:$0xff]  }
 0x418   : > { %8170 = vmatprep.subr.bf16.mxu0 %v11264_v20  ;;  %v11348_v19 = vld [vmem:[%s11782_s27 + $0x1f90] ss:$8 sps:$4 sm:$0xff]   ;;  %v11353_v20 = vld [vmem:[%s11782_s27 + $0xfa4] ss:$8 sps:$4 sm:$0xff]  }
 0x41a   : > { %7515 = vmatpush1.bf16.msra.mxu1 %v11259_v2  ;;  %v11356_v2 = vld [vmem:[%s11782_s27 + $0x1fa4] ss:$8 sps:$4 sm:$0xff]  }
 0x41b   : > { %8171 = vmatpush1.bf16.msra.mxu0 %v11262_v24  ;;  %7516 = vmatprep.subr.bf16.mxu1 %v11267_v13  ;;  %v11351_v24 = vld [vmem:[%s11782_s27 + $0xfa0] ss:$8 sps:$4 sm:$0xff]  }
 0x41c   : > { %8172 = vmatprep.subr.bf16.mxu0 %v11270_v53  ;;  %v11354_v13 = vld [vmem:[%s11782_s27 + $0x1fa0] ss:$8 sps:$4 sm:$0xff]   ;;  %v11359_v53 = vld [vmem:[%s11782_s27 + $0xfb4] ss:$8 sps:$4 sm:$0xff]  }
 0x41e   : > { %7517 = vmatpush1.bf16.msra.mxu1 %v11265_v23  ;;  %v11362_v23 = vld [vmem:[%s11782_s27 + $0x1fb4] ss:$8 sps:$4 sm:$0xff]  }
 0x41f   : > { %8173 = vmatpush1.bf16.msra.mxu0 %v11268_v59  ;;  %7518 = vmatprep.subr.bf16.mxu1 %v11273_v38  ;;  %v11357_v59 = vld [vmem:[%s11782_s27 + $0xfb0] ss:$8 sps:$4 sm:$0xff]  }
 0x420   : > { %8174 = vmatprep.subr.bf16.mxu0 %v11276_v40  ;;  %v11360_v38 = vld [vmem:[%s11782_s27 + $0x1fb0] ss:$8 sps:$4 sm:$0xff]   ;;  %v11365_v40 = vld [vmem:[%s11782_s27 + $0xfc4] ss:$8 sps:$4 sm:$0xff]  }
 0x422   : > { %7519 = vmatpush1.bf16.msra.mxu1 %v11271_v11  ;;  %v11368_v11 = vld [vmem:[%s11782_s27 + $0x1fc4] ss:$8 sps:$4 sm:$0xff]  }
 0x423   : > { %8175 = vmatpush1.bf16.msra.mxu0 %v11274_v27  ;;  %7520 = vmatprep.subr.bf16.mxu1 %v11279_v61  ;;  %v11363_v27 = vld [vmem:[%s11782_s27 + $0xfc0] ss:$8 sps:$4 sm:$0xff]  }
 0x424   : > { %8176 = vmatprep.subr.bf16.mxu0 %v11282_v28  ;;  %v11366_v61 = vld [vmem:[%s11782_s27 + $0x1fc0] ss:$8 sps:$4 sm:$0xff]   ;;  %v11371_v28 = vld [vmem:[%s11782_s27 + $0xfd4] ss:$8 sps:$4 sm:$0xff]  }
 0x426   : > { %7521 = vmatpush1.bf16.msra.mxu1 %v11277_v29  ;;  %v11374_v29 = vld [vmem:[%s11782_s27 + $0x1fd4] ss:$8 sps:$4 sm:$0xff]  }
 0x427   : > { %8177 = vmatpush1.bf16.msra.mxu0 %v11280_v30  ;;  %7522 = vmatprep.subr.bf16.mxu1 %v11285_v31  ;;  %v11369_v30 = vld [vmem:[%s11782_s27 + $0xfd0] ss:$8 sps:$4 sm:$0xff]  }
 0x428   : > { %8178 = vmatprep.subr.bf16.mxu0 %v11288_v32  ;;  %v11372_v31 = vld [vmem:[%s11782_s27 + $0x1fd0] ss:$8 sps:$4 sm:$0xff]   ;;  %v11377_v32 = vld [vmem:[%s11782_s27 + $0xfe4] ss:$8 sps:$4 sm:$0xff]  }
 0x42a   : > { %7523 = vmatpush1.bf16.msra.mxu1 %v11283_v16  ;;  %v11380_v16 = vld [vmem:[%s11782_s27 + $0x1fe4] ss:$8 sps:$4 sm:$0xff]  }
 0x42b   : > { %8179 = vmatpush1.bf16.msra.mxu0 %v11286_v34  ;;  %7533 = vmatprep.subr.bf16.mxu1 %v11292_v22  ;;  %v11375_v34 = vld [vmem:[%s11782_s27 + $0xfe0] ss:$8 sps:$4 sm:$0xff]  }
 0x42c   : > { %8189 = vmatprep.subr.bf16.mxu0 %v11296_v36  ;;  %v11378_v22 = vld [vmem:[%s11782_s27 + $0x1fe0] ss:$8 sps:$4 sm:$0xff]   ;;  %v11383_v36 = vld [vmem:[%s11782_s27 + $0xff4] ss:$8 sps:$4 sm:$0xff]  }
 0x42d   : > { %7525 = vmatmul.mubr.bf16.vlgmr.msra.gmra.mrb[0].mxu1 %v13072_v43 }
 0x42e   : > { %8181 = vmatmul.mubr.bf16.vlgmr.msra.gmra.mrb[0].mxu0 %v13076_v45  ;;  %7534 = vmatpush1.bf16.msra.mxu1 %v11290_v25  ;;  %v11386_v25 = vld [vmem:[%s11782_s27 + $0x1ff4] ss:$8 sps:$4 sm:$0xff]  }
 0x42f   : > { %8190 = vmatpush1.bf16.msra.mxu0 %v11294_v46  ;;  %7535 = vmatprep.subr.bf16.mxu1 %v11299_v42  ;;  %v11381_v46 = vld [vmem:[%s11782_s27 + $0xff0] ss:$8 sps:$4 sm:$0xff]  }
 0x430   : > { %8191 = vmatprep.subr.bf16.mxu0 %v11302_v26  ;;  %7565 = vmatprep.mubr.bf16.mxu1 %v1537_v56  ;;  %v11384_v42 = vld [vmem:[%s11782_s27 + $0x1ff0] ss:$8 sps:$4 sm:$0xff]   ;;  %v1535_v26 = vcombine.high %v13072_v43, %v13072_v43  ;;  %v1731_v56 = vcombine.high %v13076_v45, %v13076_v45 }
 0x431   : > { %8221 = vmatprep.mubr.bf16.mxu0 %v1733_v60  ;;  %v11553_v60 = vmov 1983009808  }
 0x432   : > { %7536 = vmatpush1.bf16.msra.mxu1 %v11297_v50  ;;  %v8234_v50 = vunpack.c.l.s4 %v11553_v60 }
 0x433   : > { %8192 = vmatpush1.bf16.msra.mxu0 %v11300_v57  ;;  %7537 = vmatprep.subr.bf16.mxu1 %v11305_v35 }
 0x434   : > { %8193 = vmatprep.subr.bf16.mxu0 %v11308_v14  ;;  %v8235_v57 = vunpack.c.0.s8 %v8234_v50 }
 0x436   : > { %7538 = vmatpush1.bf16.msra.mxu1 %v11303_v21 }
 0x437   : > { %8194 = vmatpush1.bf16.msra.mxu0 %v11306_v33  ;;  %7539 = vmatprep.subr.bf16.mxu1 %v11311_v37 }
 0x438   : > { %8195 = vmatprep.subr.bf16.mxu0 %v11314_v15 }
 0x43a   : > { %7540 = vmatpush1.bf16.msra.mxu1 %v11309_v48  ;;  %v13151_v48 = vsub.s32 %v8235_v57, %v11849_v44 }
 0x43b   : > { %8196 = vmatpush1.bf16.msra.mxu0 %v11312_v17  ;;  %7541 = vmatprep.subr.bf16.mxu1 %v11317_v49 }
 0x43c   : > { %8197 = vmatprep.subr.bf16.mxu0 %v11320_v51 }
 0x43e   : > { %7542 = vmatpush1.bf16.msra.mxu1 %v11315_v52  ;;  %v298_v52 = vld [vmem:[#allocation2] sm:$0xf] }
 0x43f   : > { %8198 = vmatpush1.bf16.msra.mxu0 %v11318_v54  ;;  %7543 = vmatprep.subr.bf16.mxu1 %v11323_v55 }
 0x440   : > { %8199 = vmatprep.subr.bf16.mxu0 %v11326_v63  ;;  %v8285_v63 = vld [vmem:[%s11801_s29 + $0x80] sm:$0xff] (!%p9542_p0) }
 0x442   : > { %7544 = vmatpush1.bf16.msra.mxu1 %v11321_v0  ;;  %v8286_v0 = vld [vmem:[%s11801_s29 + $0x88] sm:$0xff] (!%p9542_p0) }
 0x443   : > { %8200 = vmatpush1.bf16.msra.mxu0 %v11324_v41  ;;  %7545 = vmatprep.subr.bf16.mxu1 %v11329_v1  ;;  %v8269_v41 = vld [vmem:[%s11801_s29] sm:$0xff] (!%p9542_p0)  ;;  %v9583_v1 = vpack.c.bf16 (!%p9542_p0), %v8286_v0, %v8285_v63 }
 0x444   : > { %8201 = vmatprep.subr.bf16.mxu0 %v11332_v47  ;;  %v8270_v47 = vld [vmem:[%s11801_s29 + $0x8] sm:$0xff] (!%p9542_p0) }
 0x446   : > { %7546 = vmatpush1.bf16.msra.mxu1 %v11327_v3  ;;  %v8287_v3 = vld [vmem:[%s11801_s29 + $0x90] sm:$0xff] (!%p9542_p0) }
 0x447   : > { %8202 = vmatpush1.bf16.msra.mxu0 %v11330_v39  ;;  %7547 = vmatprep.subr.bf16.mxu1 %v11335_v58  ;;  %v8288_v39 = vld [vmem:[%s11801_s29 + $0x98] sm:$0xff] (!%p9542_p0)  ;;  %v9585_v58 = vpack.c.bf16 (!%p9542_p0), %v8270_v47, %v8269_v41 }
 0x448   : > { %8203 = vmatprep.subr.bf16.mxu0 %v11338_v18  ;;  %v9587_v18 = vpack.c.bf16 (!%p9542_p0), %v8288_v39, %v8287_v3 }
 0x44a   : > { %7548 = vmatpush1.bf16.msra.mxu1 %v11333_v4  ;;  %v8271_v4 = vld [vmem:[%s11801_s29 + $0x10] sm:$0xff] (!%p9542_p0) }
 0x44b   : > { %8204 = vmatpush1.bf16.msra.mxu0 %v11336_v5  ;;  %7549 = vmatprep.subr.bf16.mxu1 %v11341_v6  ;;  %v8272_v5 = vld [vmem:[%s11801_s29 + $0x18] sm:$0xff] (!%p9542_p0)  ;;  %v8289_v6 = vld [vmem:[%s11801_s29 + $0xa0] sm:$0xff] (!%p9542_p0) }
 0x44c   : > { %8205 = vmatprep.subr.bf16.mxu0 %v11344_v7  ;;  %v8290_v7 = vld [vmem:[%s11801_s29 + $0xa8] sm:$0xff] (!%p9542_p0) }
 0x44e   : > { %7550 = vmatpush1.bf16.msra.mxu1 %v11339_v8  ;;  %v9589_v8 = vpack.c.bf16 (!%p9542_p0), %v8272_v5, %v8271_v4 }
 0x44f   : > { %8206 = vmatpush1.bf16.msra.mxu0 %v11342_v9  ;;  %7551 = vmatprep.subr.bf16.mxu1 %v11347_v10  ;;  %v9591_v9 = vpack.c.bf16 (!%p9542_p0), %v8290_v7, %v8289_v6  ;;  %v8273_v10 = vld [vmem:[%s11801_s29 + $0x20] sm:$0xff] (!%p9542_p0) }
 0x450   : > { %8207 = vmatprep.subr.bf16.mxu0 %v11350_v62  ;;  %v8274_v62 = vld [vmem:[%s11801_s29 + $0x28] sm:$0xff] (!%p9542_p0) }
 0x452   : > { %7552 = vmatpush1.bf16.msra.mxu1 %v11345_v12  ;;  %v8291_v12 = vld [vmem:[%s11801_s29 + $0xb0] sm:$0xff] (!%p9542_p0) }
 0x453   : > { %8208 = vmatpush1.bf16.msra.mxu0 %v11348_v19  ;;  %7553 = vmatprep.subr.bf16.mxu1 %v11353_v20  ;;  %v8292_v19 = vld [vmem:[%s11801_s29 + $0xb8] sm:$0xff] (!%p9542_p0)  ;;  %v9593_v20 = vpack.c.bf16 (!%p9542_p0), %v8274_v62, %v8273_v10 }
 0x454   : > { %8209 = vmatprep.subr.bf16.mxu0 %v11356_v2  ;;  %v8252_v2 = vsub.s32 (!%p9542_p0), 0, %v11849_v44 }
 0x456   : > { %7554 = vmatpush1.bf16.msra.mxu1 %v11351_v24  ;;  %v8256_v24 = vsub.s32 (!%p9542_p0), 1, %v11849_v44 }
 0x457   : > { %8210 = vmatpush1.bf16.msra.mxu0 %v11354_v13  ;;  %7555 = vmatprep.subr.bf16.mxu1 %v11359_v53  ;;  %v9595_v13 = vpack.c.bf16 (!%p9542_p0), %v8292_v19, %v8291_v12  ;;  %v8275_v53 = vld [vmem:[%s11801_s29 + $0x30] sm:$0xff] (!%p9542_p0) }
 0x458   : > { %8211 = vmatprep.subr.bf16.mxu0 %v11362_v23  ;;  %v8276_v23 = vld [vmem:[%s11801_s29 + $0x38] sm:$0xff] (!%p9542_p0) }
 0x45a   : > { %7556 = vmatpush1.bf16.msra.mxu1 %v11357_v59  ;;  %v8293_v59 = vld [vmem:[%s11801_s29 + $0xc0] sm:$0xff] (!%p9542_p0) }
 0x45b   : > { %8212 = vmatpush1.bf16.msra.mxu0 %v11360_v38  ;;  %7557 = vmatprep.subr.bf16.mxu1 %v11365_v40  ;;  %v8294_v38 = vld [vmem:[%s11801_s29 + $0xc8] sm:$0xff] (!%p9542_p0)  ;;  %v8248_v40 = vld [vmem:[%s248_s18] sm:$0x3] (!%p9542_p0) }
 0x45c   : > { %8213 = vmatprep.subr.bf16.mxu0 %v11368_v11  ;;  %v9597_v11 = vpack.c.bf16 (!%p9542_p0), %v8276_v23, %v8275_v53  ;;  %v9599_v44 = vpack.c.bf16 (!%p9542_p0), %v8294_v38, %v8293_v59 }
 0x45e   : > { %7558 = vmatpush1.bf16.msra.mxu1 %v11363_v27  ;;  %v8253_v27 = vrot.slane (!%p9542_p0), %v8248_v40, %v8252_v2 }
 0x45f   : > { %8214 = vmatpush1.bf16.msra.mxu0 %v11366_v61  ;;  %7559 = vmatprep.subr.bf16.mxu1 %v11371_v28  ;;  %v8257_v61 = vrot.slane (!%p9542_p0), %v8248_v40, %v8256_v24  ;;  %v8277_v28 = vld [vmem:[%s11801_s29 + $0x40] sm:$0xff] (!%p9542_p0) }
 0x460   : > { %8215 = vmatprep.subr.bf16.mxu0 %v11374_v29  ;;  %v8278_v29 = vld [vmem:[%s11801_s29 + $0x48] sm:$0xff] (!%p9542_p0) }
 0x462   : > { %7560 = vmatpush1.bf16.msra.mxu1 %v11369_v30  ;;  %v8295_v30 = vld [vmem:[%s11801_s29 + $0xd0] sm:$0xff] (!%p9542_p0) }
 0x463   : > { %8216 = vmatpush1.bf16.msra.mxu0 %v11372_v31  ;;  %7561 = vmatprep.subr.bf16.mxu1 %v11377_v32  ;;  %v8296_v31 = vld [vmem:[%s11801_s29 + $0xd8] sm:$0xff] (!%p9542_p0)  ;;  %v8258_v32 = vcombine.low (!%p9542_p0), %v8253_v27, %v8257_v61 }
 0x464   : > { %8217 = vmatprep.subr.bf16.mxu0 %v11380_v16 }
 0x466   : > { %7562 = vmatpush1.bf16.msra.mxu1 %v11375_v34  ;;  %v9601_v34 = vpack.c.bf16 (!%p9542_p0), %v8278_v29, %v8277_v28 }
 0x467   : > { %8218 = vmatpush1.bf16.msra.mxu0 %v11378_v22  ;;  %7563 = vmatprep.subr.bf16.mxu1 %v11383_v36  ;;  %v8265_v22 = vrot.slane (!%p9542_p0), %v8258_v32, %v13151_v48  ;;  %v9603_v36 = vpack.c.bf16 (!%p9542_p0), %v8296_v31, %v8295_v30 }
 0x468   : > { %8219 = vmatprep.subr.bf16.mxu0 %v11386_v25  ;;  %v8279_v25 = vld [vmem:[%s11801_s29 + $0x50] sm:$0xff] (!%p9542_p0) }
 0x46a   : > { %7564 = vmatpush1.bf16.msra.mxu1 %v11381_v46  ;;  %v8280_v46 = vld [vmem:[%s11801_s29 + $0x58] sm:$0xff] (!%p9542_p0) }
 0x46b   : > { %8220 = vmatpush1.bf16.msra.mxu0 %v11384_v42  ;;  %v8297_v42 = vld [vmem:[%s11801_s29 + $0xe0] sm:$0xff] (!%p9542_p0)  ;;  %v9605_v60 = vpack.c.bf16 (!%p9542_p0), %v8280_v46, %v8279_v25 }
 0x46c   : > { %9584 = vmatprep.subr.bf16.mxu0 (!%p9542_p0), %v9583_v1 }
 0x46d   : > { %7566 = vmatmul.mubr.bf16.vlgmr.msra.gmra.mrb[0].mxu1 %v1535_v26  ;;  %v8298_v26 = vld [vmem:[%s11801_s29 + $0xe8] sm:$0xff] (!%p9542_p0) }
 0x46e   : > { %8222 = vmatmul.mubr.bf16.vlgmr.msra.gmra.mrb[0].mxu0 %v1731_v56  ;;  %v9607_v57 = vpack.c.bf16 (!%p9542_p0), %v8298_v26, %v8297_v42 }
 0x46f   : > { %9586 = vmatpush3.bf16.msra.mxu0 (!%p9542_p0), %v9585_v58 }
 0x470   : > { %9588 = vmatprep.subr.bf16.mxu0 (!%p9542_p0), %v9587_v18 }
 0x473   : > { %9590 = vmatpush3.bf16.msra.mxu0 (!%p9542_p0), %v9589_v8 }
 0x474   : > { %9592 = vmatprep.subr.bf16.mxu0 (!%p9542_p0), %v9591_v9 }
 0x477   : > { %9594 = vmatpush3.bf16.msra.mxu0 (!%p9542_p0), %v9593_v20 }
 0x478   : > { %9596 = vmatprep.subr.bf16.mxu0 (!%p9542_p0), %v9595_v13 }
 0x47b   : > { %9598 = vmatpush3.bf16.msra.mxu0 (!%p9542_p0), %v9597_v11 }
 0x47c   : > { %9600 = vmatprep.subr.bf16.mxu0 (!%p9542_p0), %v9599_v44 }
 0x47f   : > { %9602 = vmatpush3.bf16.msra.mxu0 (!%p9542_p0), %v9601_v34 }
 0x480   : > { %9604 = vmatprep.subr.bf16.mxu0 (!%p9542_p0), %v9603_v36 }
 0x483   : > { %9606 = vmatpush3.bf16.msra.mxu0 (!%p9542_p0), %v9605_v60 }
 0x484   : > { %9608 = vmatprep.subr.bf16.mxu0 (!%p9542_p0), %v9607_v57 }
 0x540   : > { %v7567_v35 = vpop.f32.mrb[0].mxu1 }
 0x541   : > { %v8223_v14 = vpop.f32.mrb[0].mxu0  ;;  %v7569_v33 = vpop.f32.mrb[1].mxu1 }
 0x542   : > { %v9615_v21 = vadd.f32 %v8223_v14, %v7567_v35  ;;  %v8225_v37 = vpop.f32.mrb[1].mxu0  ;;  %v7571_v43 = vpop.f32.mrb[2].mxu1  ;;  %v8281_v35 = vld [vmem:[%s11801_s29 + $0x60] sm:$0xff] (!%p9542_p0)  ;;  %v8282_v14 = vld [vmem:[%s11801_s29 + $0x68] sm:$0xff] (!%p9542_p0) }
 0x543   : > { %v9616_v15 = vadd.f32 %v8225_v37, %v7569_v33  ;;  %v8227_v17 = vpop.f32.mrb[2].mxu0  ;;  %v7572_v49 = vpop.f32.mrb[3].mxu1  ;;  %v8300_v33 = vld [vmem:[%s11801_s29 + $0xf8] sm:$0xff] (!%p9542_p0) }
 0x544   : > { %v8228_v45 = vpop.f32.mrb[3].mxu0  ;;  %v8283_v49 = vld [vmem:[%s11801_s29 + $0x70] sm:$0xff] (!%p9542_p0) }
 0x545   : > { %v8232_v51 = vcombine.low %v9615_v21, %v9616_v15  ;;  %8246 = sbr.rel (%p9542_p0) target bundleno = 1588 (0x634), region = 52  ;;  %v8299_v21 = vld [vmem:[%s11801_s29 + $0xf0] sm:$0xff] (!%p9542_p0)  ;;  %v9609_v15 = vpack.c.bf16 (!%p9542_p0), %v8282_v14, %v8281_v35  ;;  %v8284_v45 = vld [vmem:[%s11801_s29 + $0x78] sm:$0xff] (!%p9542_p0) }
 0x546   : > { %v9611_v17 = vpack.c.bf16 (!%p9542_p0), %v8300_v33, %v8299_v21 }
 0x547   : > { %v8239_v54 = vrot.slane %v8232_v51, %v13151_v48  ;;  %9610 = vmatpush3.bf16.msra.mxu0 (!%p9542_p0), %v9609_v15  ;;  %v9613_v51 = vpack.c.bf16 (!%p9542_p0), %v8284_v45, %v8283_v49 }
 0x548   : > { %9612 = vmatprep.subr.bf16.mxu0 (!%p9542_p0), %v9611_v17 }
 0x549   : > { %v8241_v55 = vadd.f32 %v8239_v54, %v298_v52 }
 0x54b   : > { %8242 = vst [vmem:[#allocation2] sm:$0xf] %v8241_v55  ;;  %9614 = vmatpush3.bf16.msra.mxu0 (!%p9542_p0), %v9613_v51 }
 0x552   : > { %v8247_v16 = vld [vmem:[#allocation2] sm:$0xf] }
 0x553   : > { %v8267_v56 = vadd.f32 %v8265_v22, %v8247_v16 }
 0x555   : > { %v8268_v50 = vmax.f32 %v8267_v56, 0.0 }
 0x557   : > { %v8308_v37 = vrot.slane %v8268_v50, %v13151_v48 }
 0x559   : > { %v8309_v43 = vcombine.high %v8308_v37, %v8308_v37 }
 0x55b   : > { %8376 = vmatprep.mubr.f32.mxu0 %v8309_v43 }
 0x55c   : > { %8377 = vmatmul.mubr.f32.vlgmr.msra.gmra.mrb[0].mxu0 %v8308_v37 }
 0x62f   : > { %v9580_v52 = vpop.f32.mrb[0].mxu0 }
 0x630   : > { %v9581_v54 = vpop.f32.mrb[1].mxu0 }
 0x631   : > { %v9582_v55 = vadd.f32 %v9581_v54, %v9580_v52 }
 0x633   : > { %8383 = vst.msk [vmem:[%s11806_s15] sm:$0x3] %vm8382_vm0, %v9582_v55 }
 0x634 PF: > { %s20_s25 = sadd.s32 1, %s11545_s25   ;;  %s13254_s21 = sld [smem:[#allocation9_spill]] }
 0x635   : > { %p17_p12 = scmp.ge.s32.totalorder %s20_s25, 8   ;;  %s13255_s23 = sld [smem:[#allocation10_spill]] }
 0x636   : > { %s13256_s27 = sld [smem:[#allocation11_spill]]  ;;  %s13257_s15 = smov %s11509_s16 }
 0x637   : > { %s13258_s16 = smov %s11513_s17  ;;  %s13259_s17 = smov %s11731_s0 }
 0x638   : > { %s13260_s18 = smov %s11521_s19  ;;  %s13261_s19 = smov %s11525_s20 }
 0x639   : > { %s13262_s20 = smov %s11665_s13  ;;  %s13263_s22 = smov %s11541_s24 }
 0x63a   :  { %19 = sbr.rel (!%p17_p12) target bundleno = 11 (0xb), region = 101 }
 0x63c   : > { %s13264_s24 = smov %s13256_s27 }
 0x641   :  { %8403 = vsyncpa [#allocation4], 1 }
 0x642   :  { %8405 = vsyncpa [#allocation4 + $0x1], 1 }
 0x643   :  { %8406 = vsyncpa [#allocation6], 1 }
 0x644   :  { %8408 = vsyncpa [#allocation6 + $0x1], 1 }

</bundles_post_ra>
